<compile_context>
chip_gen: v7x
topology: tpu7x:2x2x1
jax: 0.10.0
libtpu: 0.0.40
codegen_flags: <defaults>
</compile_context>

<pallas_src>
import math

import jax
import jax.numpy as jnp
from jax import lax
from jax.experimental import pallas as pl
from jax.experimental.pallas import tpu as pltpu

# ----------------------------------------------------------------------------
# Small synthetic RoBERTa-CRF configuration (deterministic, no checkpoint load)
# ----------------------------------------------------------------------------
BATCH = 2
SEQ = 8
HIDDEN = 32
NUM_HEADS = 2
HEAD_DIM = HIDDEN // NUM_HEADS
INTERMEDIATE = 64
NUM_LAYERS = 2
VOCAB = 50
MAX_POS = 24
NUM_LABELS = 5          # num_labels_mwe
PAD_IDX = 1             # RoBERTa padding_idx
LN_EPS = 1e-5
NEG_INF = -1e9


# ----------------------------------------------------------------------------
# In-kernel helpers
# ----------------------------------------------------------------------------
def _layer_norm(x, g, b):
    mu = jnp.mean(x, axis=-1, keepdims=True)
    var = jnp.mean((x - mu) ** 2, axis=-1, keepdims=True)
    return (x - mu) * lax.rsqrt(var + LN_EPS) * g + b


def _gelu(x):
    # TODO(synk): HF RoBERTa uses exact erf-GELU; tanh approximation used here.
    c = 0.7978845608028654  # sqrt(2/pi)
    return 0.5 * x * (1.0 + jnp.tanh(c * (x + 0.044715 * x * x * x)))


# ----------------------------------------------------------------------------
# Fused kernel: one grid step per encoder layer; CRF decode on the last step
# ----------------------------------------------------------------------------
def fused_forward_kernel(emb_ref, mask_ref, embln_ref,
                         wqkv_ref, bqkv_ref, wo_ref, lvec_ref,
                         wi_ref, bi_ref, wo2_ref,
                         wc_ref, bc_ref, transT_ref, se_ref,
                         preds_ref, x_scratch):
    layer = pl.program_id(0)
    B, S, H = emb_ref.shape
    NLAB = wc_ref.shape[1]
    NH = NUM_HEADS
    D = H // NH
    BS = B * S

    mask = mask_ref[...]                                      # (B, S) f32
    bias_b = ((1.0 - mask) * NEG_INF).reshape(B, 1, S)        # additive key mask

    # ---- step 0: RoBERTa embeddings LayerNorm (embedding dropout: identity) --
    @pl.when(layer == 0)
    def _():
        x_scratch[...] = _layer_norm(emb_ref[...].reshape(BS, H),
                                     embln_ref[0:1], embln_ref[1:2])

    # ---- one post-LN encoder layer per grid step ----------------------------
    x = x_scratch[...]                                        # (BS, H) f32
    lv = lvec_ref[0]                                          # (6, H)

    # fused QKV projection (scale folded into Q weights/bias at prep time)
    qkv = (jnp.dot(x.astype(jnp.bfloat16), wqkv_ref[0],
                   preferred_element_type=jnp.float32)
           + bqkv_ref[0]).reshape(B, S, 3 * H)                # (B, S, 3H)

    # per-head attention (static lane slices of the fused projection)
    ctx_parts = []
    for h in range(NH):
        qh = qkv[:, :, h * D:(h + 1) * D].astype(jnp.bfloat16)
        kh = qkv[:, :, H + h * D:H + (h + 1) * D].astype(jnp.bfloat16)
        vh = qkv[:, :, 2 * H + h * D:2 * H + (h + 1) * D].astype(jnp.bfloat16)
        s = jnp.einsum('bqd,bkd->bqk', qh, kh,
                       preferred_element_type=jnp.float32) + bias_b
        s = s - jnp.max(s, axis=-1, keepdims=True)
        p = jnp.exp(s)
        p = p * pl.reciprocal(jnp.sum(p, axis=-1, keepdims=True), approx=True)
        ctx = jnp.einsum('bqk,bkd->bqd', p.astype(jnp.bfloat16), vh,
                         preferred_element_type=jnp.float32)  # (B, S, D)
        ctx_parts.append(ctx.reshape(BS, D))

    # heads reassembled -> single full-K output projection on the MXU
    ctx_cat = jnp.concatenate(ctx_parts, axis=-1)             # (BS, H)
    attn = jnp.dot(ctx_cat.astype(jnp.bfloat16), wo_ref[0],
                   preferred_element_type=jnp.float32) + lv[0:1]
    h1 = _layer_norm(x + attn, lv[1:2], lv[2:3])

    ff = _gelu(jnp.dot(h1.astype(jnp.bfloat16), wi_ref[0],
                       preferred_element_type=jnp.float32) + bi_ref[0])
    ff = jnp.dot(ff.astype(jnp.bfloat16), wo2_ref[0],
                 preferred_element_type=jnp.float32) + lv[3:4]
    x_new = _layer_norm(h1 + ff, lv[4:5], lv[5:6])
    x_scratch[...] = x_new

    # ---- last step: token classifier + CRF Viterbi decode (in VMEM/vregs) ---
    @pl.when(layer == pl.num_programs(0) - 1)
    def _():
        # classifier (nn.Dropout(0.1) is eval identity); bf16-in / f32-acc
        logits = jnp.dot(x_new.astype(jnp.bfloat16), wc_ref[...],
                         preferred_element_type=jnp.float32) + bc_ref[...]
        emis = logits.reshape(B, S, NLAB)

        transT = transT_ref[...]                              # (to, from)
        start = se_ref[0:1]                                   # (1, NLAB)
        end = se_ref[1:2]                                     # (1, NLAB)
        jio = lax.broadcasted_iota(jnp.int32, (B, NLAB, NLAB), 2).astype(jnp.float32)
        l_iota = lax.broadcasted_iota(jnp.int32, (B, NLAB), 1).astype(jnp.float32)

        # Viterbi forward recursion, fully unrolled (S static & small);
        # emissions / mask timesteps are static slices, backpointers stay in vregs.
        score = start + emis[:, 0, :]                         # (B, NLAB)
        hist = [None]                                         # hist[t] for t>=1
        for t in range(1, S):
            # cand[b, next, prev] = score[b, prev] + trans[prev, next]
            cand = score[:, None, :] + transT[None, :, :]     # (B, NLAB, NLAB)
            mx = jnp.max(cand, axis=-1, keepdims=True)
            # first-occurrence argmax over prev (torchcrf convention)
            hist.append(jnp.min(jnp.where(cand >= mx, jio, float(NLAB)), axis=-1))
            best = jnp.max(cand, axis=-1) + emis[:, t, :]
            mask_t = mask[:, t:t + 1]                         # (B, 1) static slice
            score = jnp.where(mask_t > 0.5, best, score)
        final = score + end                                   # (B, NLAB)

        fmax = jnp.max(final, axis=-1, keepdims=True)
        last_tag = jnp.min(jnp.where(final >= fmax, l_iota, float(NLAB)),
                           axis=-1, keepdims=True)            # (B, 1)
        seq_end = jnp.sum(mask, axis=-1, keepdims=True) - 1.0  # (B, 1)

        # backtracking (unrolled); collect per-timestep columns, one dense store
        cols = [None] * S
        nxt = last_tag
        for t in range(S - 1, -1, -1):
            if t == S - 1:
                from_hist = nxt
            else:
                from_hist = jnp.sum(jnp.where(l_iota == nxt, hist[t + 1], 0.0),
                                    axis=-1, keepdims=True)   # hist[t+1][b, nxt_b]
            tag_t = jnp.where(seq_end == float(t), last_tag, from_hist)
            cols[t] = jnp.where(seq_end >= float(t), tag_t, -1.0)
            nxt = tag_t
        preds_ref[...] = jnp.concatenate(cols, axis=-1).astype(jnp.int32)


# ----------------------------------------------------------------------------
# Wrapper: param repacking, embeddings glue, single pallas_call
# ----------------------------------------------------------------------------
def prepare_kernel_params(params):
    """Repack PyTorch-style per-layer params into stacked, MXU-friendly slabs."""
    scale = 1.0 / math.sqrt(HEAD_DIM)

    def stack(fn):
        return jnp.stack([fn(lp) for lp in params["layers"]], axis=0)

    # fused QKV weight/bias, attention scale folded into the Q columns
    wqkv = stack(lambda lp: jnp.concatenate(
        [lp["wq"] * scale, lp["wk"], lp["wv"]], axis=1))        # (L, H, 3H)
    bqkv = stack(lambda lp: jnp.concatenate(
        [lp["bq"] * scale, lp["bk"], lp["bv"]], axis=1))        # (L, 1, 3H)
    lvec = stack(lambda lp: jnp.stack(
        [lp["bo"][0], lp["ln1_g"][0], lp["ln1_b"][0],
         lp["bo2"][0], lp["ln2_g"][0], lp["ln2_b"][0]], axis=0))  # (L, 6, H)

    return dict(
        wqkv=wqkv.astype(jnp.bfloat16),
        bqkv=bqkv,
        wo=stack(lambda lp: lp["wo"]).astype(jnp.bfloat16),     # (L, H, H)
        lvec=lvec,
        wi=stack(lambda lp: lp["wi"]).astype(jnp.bfloat16),     # (L, H, I)
        bi=stack(lambda lp: lp["bi"]),                          # (L, 1, I)
        wo2=stack(lambda lp: lp["wo2"]).astype(jnp.bfloat16),   # (L, I, H)
        emb_ln=jnp.stack([params["emb_ln_g"][0], params["emb_ln_b"][0]], axis=0),
        wc=params["wc"].astype(jnp.bfloat16),                   # (H, NLAB)
        bc=params["bc"],
        crf_transT=params["crf_trans"].T,                       # (to, from)
        crf_se=jnp.concatenate([params["crf_start"], params["crf_end"]], axis=0),
    )


@jax.jit
def roberta_crf_forward(params, input_ids, attention_mask):
    """Inference branch of RoBertaCRFModel.forward (labels_mwe=None).

    Returns (B, S) int32 Viterbi tags, padded with -1 past each sequence end
    (torchcrf returns variable-length Python lists).
    """
    kp = prepare_kernel_params(params)
    mask_f = attention_mask.astype(jnp.float32)
    mask_i = attention_mask.astype(jnp.int32)
    B, S = input_ids.shape

    # RoBERTa embeddings (gathers stay in XLA glue).
    # NOTE: position ids built from attention_mask; HF uses (input_ids != pad).
    positions = jnp.cumsum(mask_i, axis=1) * mask_i + PAD_IDX
    emb = (params["word_emb"][input_ids]
           + params["pos_emb"][positions]
           + params["type_emb"][0][None, None, :]).astype(jnp.float32)

    grid_spec = pltpu.PrefetchScalarGridSpec(
        num_scalar_prefetch=0,
        grid=(NUM_LAYERS,),
        in_specs=[
            pl.BlockSpec((B, S, HIDDEN), lambda l: (0, 0, 0)),           # emb
            pl.BlockSpec((B, S), lambda l: (0, 0)),                      # mask
            pl.BlockSpec((2, HIDDEN), lambda l: (0, 0)),                 # emb LN
            pl.BlockSpec((1, HIDDEN, 3 * HIDDEN), lambda l: (l, 0, 0)),  # wqkv
            pl.BlockSpec((1, 1, 3 * HIDDEN), lambda l: (l, 0, 0)),       # bqkv
            pl.BlockSpec((1, HIDDEN, HIDDEN), lambda l: (l, 0, 0)),      # wo
            pl.BlockSpec((1, 6, HIDDEN), lambda l: (l, 0, 0)),           # lvec
            pl.BlockSpec((1, HIDDEN, INTERMEDIATE), lambda l: (l, 0, 0)),  # wi
            pl.BlockSpec((1, 1, INTERMEDIATE), lambda l: (l, 0, 0)),     # bi
            pl.BlockSpec((1, INTERMEDIATE, HIDDEN), lambda l: (l, 0, 0)),  # wo2
            pl.BlockSpec((HIDDEN, NUM_LABELS), lambda l: (0, 0)),        # wc
            pl.BlockSpec((1, NUM_LABELS), lambda l: (0, 0)),             # bc
            pl.BlockSpec((NUM_LABELS, NUM_LABELS), lambda l: (0, 0)),    # transT
            pl.BlockSpec((2, NUM_LABELS), lambda l: (0, 0)),             # start/end
        ],
        out_specs=pl.BlockSpec((B, S), lambda l: (0, 0)),
        scratch_shapes=[pltpu.VMEM((B * S, HIDDEN), jnp.float32)],       # resident x
    )

    return pl.pallas_call(
        fused_forward_kernel,
        out_shape=jax.ShapeDtypeStruct((B, S), jnp.int32),
        grid_spec=grid_spec,
        compiler_params=pltpu.CompilerParams(
            dimension_semantics=("arbitrary",),       # layer axis is sequential
            vmem_limit_bytes=64 * 1024 * 1024,
        ),
    )(emb, mask_f, kp["emb_ln"],
      kp["wqkv"], kp["bqkv"], kp["wo"], kp["lvec"],
      kp["wi"], kp["bi"], kp["wo2"],
      kp["wc"], kp["bc"], kp["crf_transT"], kp["crf_se"])


# ----------------------------------------------------------------------------
# Deterministic synthetic parameter initialization (PyTorch-like layout)
# ----------------------------------------------------------------------------
def init_params(key):
    ks = iter(jax.random.split(key, 64))
    nrm = lambda shape: 0.02 * jax.random.normal(next(ks), shape, jnp.float32)
    ones = lambda shape: jnp.ones(shape, jnp.float32)
    zeros = lambda shape: jnp.zeros(shape, jnp.float32)
    uni = lambda shape: jax.random.uniform(next(ks), shape, jnp.float32, -0.1, 0.1)

    params = dict(
        word_emb=nrm((VOCAB, HIDDEN)),
        pos_emb=nrm((MAX_POS, HIDDEN)),
        type_emb=nrm((1, HIDDEN)),
        emb_ln_g=ones((1, HIDDEN)), emb_ln_b=zeros((1, HIDDEN)),
        wc=nrm((HIDDEN, NUM_LABELS)), bc=zeros((1, NUM_LABELS)),
        crf_trans=uni((NUM_LABELS, NUM_LABELS)),
        crf_start=uni((1, NUM_LABELS)),
        crf_end=uni((1, NUM_LABELS)),
        layers=[],
    )
    for _ in range(NUM_LAYERS):
        params["layers"].append(dict(
            wq=nrm((HIDDEN, HIDDEN)), bq=zeros((1, HIDDEN)),
            wk=nrm((HIDDEN, HIDDEN)), bk=zeros((1, HIDDEN)),
            wv=nrm((HIDDEN, HIDDEN)), bv=zeros((1, HIDDEN)),
            wo=nrm((HIDDEN, HIDDEN)), bo=zeros((1, HIDDEN)),
            ln1_g=ones((1, HIDDEN)), ln1_b=zeros((1, HIDDEN)),
            wi=nrm((HIDDEN, INTERMEDIATE)), bi=zeros((1, INTERMEDIATE)),
            wo2=nrm((INTERMEDIATE, HIDDEN)), bo2=zeros((1, HIDDEN)),
            ln2_g=ones((1, HIDDEN)), ln2_b=zeros((1, HIDDEN)),
        ))
    return params


if __name__ == "__main__":
    key = jax.random.PRNGKey(0)
    pkey, ikey = jax.random.split(key)
    params = init_params(pkey)

    attention_mask = jnp.array([[1, 1, 1, 1, 1, 1, 1, 1],
                                [1, 1, 1, 1, 1, 1, 0, 0]], dtype=jnp.int32)
    input_ids = jax.random.randint(ikey, (BATCH, SEQ), 3, VOCAB, dtype=jnp.int32)
    input_ids = jnp.where(attention_mask == 1, input_ids, PAD_IDX)

    preds = roberta_crf_forward(params, input_ids, attention_mask)
    preds = jax.block_until_ready(preds)
    assert preds.shape == (BATCH, SEQ) and preds.dtype == jnp.int32
    print("KERNEL_OK")
</pallas_src>

<mosaic_0001>
module attributes {stable_mosaic.version = 11 : i64} {
  func.func @fused_forward_kernel(%arg0: i32, %arg1: memref<2x8x32xf32, #tpu.memory_space<vmem>>, %arg2: memref<2x8xf32, #tpu.memory_space<vmem>>, %arg3: memref<2x32xf32, #tpu.memory_space<vmem>>, %arg4: memref<1x32x96xbf16, #tpu.memory_space<vmem>>, %arg5: memref<1x1x96xf32, #tpu.memory_space<vmem>>, %arg6: memref<1x32x32xbf16, #tpu.memory_space<vmem>>, %arg7: memref<1x6x32xf32, #tpu.memory_space<vmem>>, %arg8: memref<1x32x64xbf16, #tpu.memory_space<vmem>>, %arg9: memref<1x1x64xf32, #tpu.memory_space<vmem>>, %arg10: memref<1x64x32xbf16, #tpu.memory_space<vmem>>, %arg11: memref<32x5xbf16, #tpu.memory_space<vmem>>, %arg12: memref<1x5xf32, #tpu.memory_space<vmem>>, %arg13: memref<5x5xf32, #tpu.memory_space<vmem>>, %arg14: memref<2x5xf32, #tpu.memory_space<vmem>>, %arg15: memref<2x8xi32, #tpu.memory_space<vmem>>, %arg16: memref<16x32xf32, #tpu.memory_space<vmem>>) attributes {dimension_semantics = [#tpu.dimension_semantics<arbitrary>], iteration_bounds = array<i64: 2>, scalar_prefetch = 0 : i64, scratch_operands = 1 : i64, tpu.core_type = #tpu.core_type<tc>, window_params = [{pipeline_mode = #tpu.pipeline_mode<synchronous>, transform_indices = @transform_0, window_bounds = array<i64: 2, 8, 32>}, {pipeline_mode = #tpu.pipeline_mode<synchronous>, transform_indices = @transform_1, window_bounds = array<i64: 2, 8>}, {pipeline_mode = #tpu.pipeline_mode<synchronous>, transform_indices = @transform_2, window_bounds = array<i64: 2, 32>}, {transform_indices = @transform_3, window_bounds = array<i64: 1, 32, 96>}, {transform_indices = @transform_4, window_bounds = array<i64: 1, 1, 96>}, {transform_indices = @transform_5, window_bounds = array<i64: 1, 32, 32>}, {transform_indices = @transform_6, window_bounds = array<i64: 1, 6, 32>}, {transform_indices = @transform_7, window_bounds = array<i64: 1, 32, 64>}, {transform_indices = @transform_8, window_bounds = array<i64: 1, 1, 64>}, {transform_indices = @transform_9, window_bounds = array<i64: 1, 64, 32>}, {pipeline_mode = #tpu.pipeline_mode<synchronous>, transform_indices = @transform_10, window_bounds = array<i64: 32, 5>}, {pipeline_mode = #tpu.pipeline_mode<synchronous>, transform_indices = @transform_11, window_bounds = array<i64: 1, 5>}, {pipeline_mode = #tpu.pipeline_mode<synchronous>, transform_indices = @transform_12, window_bounds = array<i64: 5, 5>}, {pipeline_mode = #tpu.pipeline_mode<synchronous>, transform_indices = @transform_13, window_bounds = array<i64: 2, 5>}, {pipeline_mode = #tpu.pipeline_mode<synchronous>, transform_indices = @transform_14, window_bounds = array<i64: 2, 8>}]} {
    %c0 = arith.constant 0 : index
    %c0_0 = arith.constant 0 : index
    %0 = vector.load %arg2[%c0, %c0_0] : memref<2x8xf32, #tpu.memory_space<vmem>>, vector<2x8xf32>
    %cst = arith.constant 1.000000e+00 : f32
    %1 = vector.broadcast %cst : f32 to vector<2x8xf32>
    %2 = arith.subf %1, %0 : vector<2x8xf32>
    %cst_1 = arith.constant -1.000000e+09 : f32
    %3 = vector.broadcast %cst_1 : f32 to vector<2x8xf32>
    %4 = arith.mulf %2, %3 : vector<2x8xf32>
    %5 = vector.shape_cast %4 : vector<2x8xf32> to vector<2x1x8xf32>
    %c0_i32 = arith.constant 0 : i32
    %6 = arith.cmpi eq, %arg0, %c0_i32 : i32
    %7 = arith.extui %6 : i1 to i32
    %c0_i32_2 = arith.constant 0 : i32
    %8 = arith.cmpi ne, %7, %c0_i32_2 : i32
    scf.if %8 {
      %c0_55 = arith.constant 0 : index
      %c0_56 = arith.constant 0 : index
      %c0_57 = arith.constant 0 : index
      %155 = vector.load %arg1[%c0_55, %c0_56, %c0_57] : memref<2x8x32xf32, #tpu.memory_space<vmem>>, vector<2x8x32xf32>
      %156 = vector.shape_cast %155 : vector<2x8x32xf32> to vector<16x32xf32>
      %c0_58 = arith.constant 0 : index
      %c0_59 = arith.constant 0 : index
      %157 = vector.load %arg3[%c0_58, %c0_59] : memref<2x32xf32, #tpu.memory_space<vmem>>, vector<1x32xf32>
      %c1 = arith.constant 1 : index
      %c0_60 = arith.constant 0 : index
      %158 = vector.load %arg3[%c1, %c0_60] : memref<2x32xf32, #tpu.memory_space<vmem>>, vector<1x32xf32>
      %cst_61 = arith.constant dense<0.000000e+00> : vector<16xf32>
      %159 = vector.multi_reduction <add>, %156, %cst_61 [1] : vector<16x32xf32> to vector<16xf32>
      %160 = vector.shape_cast %159 : vector<16xf32> to vector<16x1xf32>
      %cst_62 = arith.constant 3.200000e+01 : f32
      %161 = vector.broadcast %cst_62 : f32 to vector<16x1xf32>
      %162 = arith.divf %160, %161 : vector<16x1xf32>
      %163 = vector.broadcast %162 : vector<16x1xf32> to vector<16x32xf32>
      %164 = arith.subf %156, %163 : vector<16x32xf32>
      %165 = arith.mulf %164, %164 : vector<16x32xf32>
      %cst_63 = arith.constant dense<0.000000e+00> : vector<16xf32>
      %166 = vector.multi_reduction <add>, %165, %cst_63 [1] : vector<16x32xf32> to vector<16xf32>
      %167 = vector.shape_cast %166 : vector<16xf32> to vector<16x1xf32>
      %cst_64 = arith.constant 3.200000e+01 : f32
      %168 = vector.broadcast %cst_64 : f32 to vector<16x1xf32>
      %169 = arith.divf %167, %168 : vector<16x1xf32>
      %170 = vector.broadcast %162 : vector<16x1xf32> to vector<16x32xf32>
      %171 = arith.subf %156, %170 : vector<16x32xf32>
      %cst_65 = arith.constant 9.99999974E-6 : f32
      %172 = vector.broadcast %cst_65 : f32 to vector<16x1xf32>
      %173 = arith.addf %169, %172 : vector<16x1xf32>
      %174 = math.rsqrt %173 : vector<16x1xf32>
      %175 = vector.broadcast %174 : vector<16x1xf32> to vector<16x32xf32>
      %176 = arith.mulf %171, %175 : vector<16x32xf32>
      %177 = vector.broadcast %157 : vector<1x32xf32> to vector<16x32xf32>
      %178 = arith.mulf %176, %177 : vector<16x32xf32>
      %179 = vector.broadcast %158 : vector<1x32xf32> to vector<16x32xf32>
      %180 = arith.addf %178, %179 : vector<16x32xf32>
      %c0_66 = arith.constant 0 : index
      %c0_67 = arith.constant 0 : index
      %181 = vector.load %arg16[%c0_66, %c0_67] : memref<16x32xf32, #tpu.memory_space<vmem>>, vector<16x32xf32>
      tpu.vector_store %arg16[%c0_66, %c0_67], %180 {strides = array<i32>} : memref<16x32xf32, #tpu.memory_space<vmem>>, vector<16x32xf32>,
    } else {
    }
    %c0_3 = arith.constant 0 : index
    %c0_4 = arith.constant 0 : index
    %9 = vector.load %arg16[%c0_3, %c0_4] : memref<16x32xf32, #tpu.memory_space<vmem>>, vector<16x32xf32>
    %c0_5 = arith.constant 0 : index
    %c0_6 = arith.constant 0 : index
    %c0_7 = arith.constant 0 : index
    %10 = vector.load %arg7[%c0_5, %c0_6, %c0_7] : memref<1x6x32xf32, #tpu.memory_space<vmem>>, vector<1x6x32xf32>
    %11 = vector.shape_cast %10 : vector<1x6x32xf32> to vector<6x32xf32>
    %12 = arith.truncf %9 : vector<16x32xf32> to vector<16x32xbf16>
    %c0_8 = arith.constant 0 : index
    %c0_9 = arith.constant 0 : index
    %c0_10 = arith.constant 0 : index
    %13 = vector.load %arg4[%c0_8, %c0_9, %c0_10] : memref<1x32x96xbf16, #tpu.memory_space<vmem>>, vector<1x32x96xbf16>
    %14 = vector.shape_cast %13 : vector<1x32x96xbf16> to vector<32x96xbf16>
    %cst_11 = arith.constant dense<0.000000e+00> : vector<16x96xf32>
    %15 = tpu.matmul %12, %14, %cst_11 {dimension_numbers = #tpu.dot_dimension_numbers<[1], [0], [0], [1], [0, 0, 1, 1], [], []>} : vector<16x32xbf16>, vector<32x96xbf16>, vector<16x96xf32> -> vector<16x96xf32>
    %c0_12 = arith.constant 0 : index
    %c0_13 = arith.constant 0 : index
    %c0_14 = arith.constant 0 : index
    %16 = vector.load %arg5[%c0_12, %c0_13, %c0_14] : memref<1x1x96xf32, #tpu.memory_space<vmem>>, vector<1x1x96xf32>
    %17 = vector.shape_cast %16 : vector<1x1x96xf32> to vector<1x96xf32>
    %18 = vector.broadcast %17 : vector<1x96xf32> to vector<16x96xf32>
    %19 = arith.addf %15, %18 : vector<16x96xf32>
    %20 = vector.shape_cast %19 : vector<16x96xf32> to vector<2x8x96xf32>
    %21 = vector.extract_strided_slice %20 {offsets = [0, 0, 0], sizes = [2, 8, 16], strides = [1, 1, 1]} : vector<2x8x96xf32> to vector<2x8x16xf32>
    %22 = arith.truncf %21 : vector<2x8x16xf32> to vector<2x8x16xbf16>
    %23 = vector.extract_strided_slice %20 {offsets = [0, 0, 32], sizes = [2, 8, 16], strides = [1, 1, 1]} : vector<2x8x96xf32> to vector<2x8x16xf32>
    %24 = arith.truncf %23 : vector<2x8x16xf32> to vector<2x8x16xbf16>
    %25 = vector.extract_strided_slice %20 {offsets = [0, 0, 64], sizes = [2, 8, 16], strides = [1, 1, 1]} : vector<2x8x96xf32> to vector<2x8x16xf32>
    %26 = arith.truncf %25 : vector<2x8x16xf32> to vector<2x8x16xbf16>
    "tpu.trace_start"() <{level = 10 : i32, message = "bqd,bkd->bqk"}> : () -> ()
    %cst_15 = arith.constant dense<0.000000e+00> : vector<2x8x8xf32>
    %27 = tpu.matmul %22, %24, %cst_15 {dimension_numbers = #tpu.dot_dimension_numbers<[2], [2], [1], [1], [0, 0, 0, 1, 1, 1], [0], [0]>} : vector<2x8x16xbf16>, vector<2x8x16xbf16>, vector<2x8x8xf32> -> vector<2x8x8xf32>
    "tpu.trace_stop"() : () -> ()
    %28 = vector.broadcast %5 : vector<2x1x8xf32> to vector<2x8x8xf32>
    %29 = arith.addf %27, %28 : vector<2x8x8xf32>
    %cst_16 = arith.constant dense<0xFF800000> : vector<2x8xf32>
    %30 = vector.multi_reduction <maximumf>, %29, %cst_16 [2] : vector<2x8x8xf32> to vector<2x8xf32>
    %31 = vector.shape_cast %30 : vector<2x8xf32> to vector<2x8x1xf32>
    %32 = vector.broadcast %31 : vector<2x8x1xf32> to vector<2x8x8xf32>
    %33 = arith.subf %29, %32 : vector<2x8x8xf32>
    %34 = math.exp %33 : vector<2x8x8xf32>
    %cst_17 = arith.constant dense<0.000000e+00> : vector<2x8xf32>
    %35 = vector.multi_reduction <add>, %34, %cst_17 [2] : vector<2x8x8xf32> to vector<2x8xf32>
    %36 = vector.shape_cast %35 : vector<2x8xf32> to vector<2x8x1xf32>
    %37 = tpu.reciprocal %36 {approx = true} : vector<2x8x1xf32> -> vector<2x8x1xf32>
    %38 = vector.broadcast %37 : vector<2x8x1xf32> to vector<2x8x8xf32>
    %39 = arith.mulf %34, %38 : vector<2x8x8xf32>
    %40 = arith.truncf %39 : vector<2x8x8xf32> to vector<2x8x8xbf16>
    "tpu.trace_start"() <{level = 10 : i32, message = "bqk,bkd->bqd"}> : () -> ()
    %cst_18 = arith.constant dense<0.000000e+00> : vector<2x8x16xf32>
    %41 = tpu.matmul %40, %26, %cst_18 {dimension_numbers = #tpu.dot_dimension_numbers<[2], [1], [1], [2], [0, 0, 0, 1, 1, 2], [0], [0]>} : vector<2x8x8xbf16>, vector<2x8x16xbf16>, vector<2x8x16xf32> -> vector<2x8x16xf32>
    "tpu.trace_stop"() : () -> ()
    %42 = vector.shape_cast %41 : vector<2x8x16xf32> to vector<16x16xf32>
    %43 = vector.extract_strided_slice %20 {offsets = [0, 0, 16], sizes = [2, 8, 16], strides = [1, 1, 1]} : vector<2x8x96xf32> to vector<2x8x16xf32>
    %44 = arith.truncf %43 : vector<2x8x16xf32> to vector<2x8x16xbf16>
    %45 = vector.extract_strided_slice %20 {offsets = [0, 0, 48], sizes = [2, 8, 16], strides = [1, 1, 1]} : vector<2x8x96xf32> to vector<2x8x16xf32>
    %46 = arith.truncf %45 : vector<2x8x16xf32> to vector<2x8x16xbf16>
    %47 = vector.extract_strided_slice %20 {offsets = [0, 0, 80], sizes = [2, 8, 16], strides = [1, 1, 1]} : vector<2x8x96xf32> to vector<2x8x16xf32>
    %48 = arith.truncf %47 : vector<2x8x16xf32> to vector<2x8x16xbf16>
    "tpu.trace_start"() <{level = 10 : i32, message = "bqd,bkd->bqk"}> : () -> ()
    %cst_19 = arith.constant dense<0.000000e+00> : vector<2x8x8xf32>
    %49 = tpu.matmul %44, %46, %cst_19 {dimension_numbers = #tpu.dot_dimension_numbers<[2], [2], [1], [1], [0, 0, 0, 1, 1, 1], [0], [0]>} : vector<2x8x16xbf16>, vector<2x8x16xbf16>, vector<2x8x8xf32> -> vector<2x8x8xf32>
    "tpu.trace_stop"() : () -> ()
    %50 = vector.broadcast %5 : vector<2x1x8xf32> to vector<2x8x8xf32>
    %51 = arith.addf %49, %50 : vector<2x8x8xf32>
    %cst_20 = arith.constant dense<0xFF800000> : vector<2x8xf32>
    %52 = vector.multi_reduction <maximumf>, %51, %cst_20 [2] : vector<2x8x8xf32> to vector<2x8xf32>
    %53 = vector.shape_cast %52 : vector<2x8xf32> to vector<2x8x1xf32>
    %54 = vector.broadcast %53 : vector<2x8x1xf32> to vector<2x8x8xf32>
    %55 = arith.subf %51, %54 : vector<2x8x8xf32>
    %56 = math.exp %55 : vector<2x8x8xf32>
    %cst_21 = arith.constant dense<0.000000e+00> : vector<2x8xf32>
    %57 = vector.multi_reduction <add>, %56, %cst_21 [2] : vector<2x8x8xf32> to vector<2x8xf32>
    %58 = vector.shape_cast %57 : vector<2x8xf32> to vector<2x8x1xf32>
    %59 = tpu.reciprocal %58 {approx = true} : vector<2x8x1xf32> -> vector<2x8x1xf32>
    %60 = vector.broadcast %59 : vector<2x8x1xf32> to vector<2x8x8xf32>
    %61 = arith.mulf %56, %60 : vector<2x8x8xf32>
    %62 = arith.truncf %61 : vector<2x8x8xf32> to vector<2x8x8xbf16>
    "tpu.trace_start"() <{level = 10 : i32, message = "bqk,bkd->bqd"}> : () -> ()
    %cst_22 = arith.constant dense<0.000000e+00> : vector<2x8x16xf32>
    %63 = tpu.matmul %62, %48, %cst_22 {dimension_numbers = #tpu.dot_dimension_numbers<[2], [1], [1], [2], [0, 0, 0, 1, 1, 2], [0], [0]>} : vector<2x8x8xbf16>, vector<2x8x16xbf16>, vector<2x8x16xf32> -> vector<2x8x16xf32>
    "tpu.trace_stop"() : () -> ()
    %64 = vector.shape_cast %63 : vector<2x8x16xf32> to vector<16x16xf32>
    %65 = tpu.concatenate %42, %64 in 1 : vector<16x16xf32>, vector<16x16xf32> -> vector<16x32xf32>
    %66 = arith.truncf %65 : vector<16x32xf32> to vector<16x32xbf16>
    %c0_23 = arith.constant 0 : index
    %c0_24 = arith.constant 0 : index
    %c0_25 = arith.constant 0 : index
    %67 = vector.load %arg6[%c0_23, %c0_24, %c0_25] : memref<1x32x32xbf16, #tpu.memory_space<vmem>>, vector<1x32x32xbf16>
    %68 = vector.shape_cast %67 : vector<1x32x32xbf16> to vector<32x32xbf16>
    %cst_26 = arith.constant dense<0.000000e+00> : vector<16x32xf32>
    %69 = tpu.matmul %66, %68, %cst_26 {dimension_numbers = #tpu.dot_dimension_numbers<[1], [0], [0], [1], [0, 0, 1, 1], [], []>} : vector<16x32xbf16>, vector<32x32xbf16>, vector<16x32xf32> -> vector<16x32xf32>
    %70 = vector.extract_strided_slice %11 {offsets = [0, 0], sizes = [1, 32], strides = [1, 1]} : vector<6x32xf32> to vector<1x32xf32>
    %71 = vector.broadcast %70 : vector<1x32xf32> to vector<16x32xf32>
    %72 = arith.addf %69, %71 : vector<16x32xf32>
    %73 = arith.addf %9, %72 : vector<16x32xf32>
    %74 = vector.extract_strided_slice %11 {offsets = [1, 0], sizes = [1, 32], strides = [1, 1]} : vector<6x32xf32> to vector<1x32xf32>
    %75 = vector.extract_strided_slice %11 {offsets = [2, 0], sizes = [1, 32], strides = [1, 1]} : vector<6x32xf32> to vector<1x32xf32>
    %cst_27 = arith.constant dense<0.000000e+00> : vector<16xf32>
    %76 = vector.multi_reduction <add>, %73, %cst_27 [1] : vector<16x32xf32> to vector<16xf32>
    %77 = vector.shape_cast %76 : vector<16xf32> to vector<16x1xf32>
    %cst_28 = arith.constant 3.200000e+01 : f32
    %78 = vector.broadcast %cst_28 : f32 to vector<16x1xf32>
    %79 = arith.divf %77, %78 : vector<16x1xf32>
    %80 = vector.broadcast %79 : vector<16x1xf32> to vector<16x32xf32>
    %81 = arith.subf %73, %80 : vector<16x32xf32>
    %82 = arith.mulf %81, %81 : vector<16x32xf32>
    %cst_29 = arith.constant dense<0.000000e+00> : vector<16xf32>
    %83 = vector.multi_reduction <add>, %82, %cst_29 [1] : vector<16x32xf32> to vector<16xf32>
    %84 = vector.shape_cast %83 : vector<16xf32> to vector<16x1xf32>
    %cst_30 = arith.constant 3.200000e+01 : f32
    %85 = vector.broadcast %cst_30 : f32 to vector<16x1xf32>
    %86 = arith.divf %84, %85 : vector<16x1xf32>
    %87 = vector.broadcast %79 : vector<16x1xf32> to vector<16x32xf32>
    %88 = arith.subf %73, %87 : vector<16x32xf32>
    %cst_31 = arith.constant 9.99999974E-6 : f32
    %89 = vector.broadcast %cst_31 : f32 to vector<16x1xf32>
    %90 = arith.addf %86, %89 : vector<16x1xf32>
    %91 = math.rsqrt %90 : vector<16x1xf32>
    %92 = vector.broadcast %91 : vector<16x1xf32> to vector<16x32xf32>
    %93 = arith.mulf %88, %92 : vector<16x32xf32>
    %94 = vector.broadcast %74 : vector<1x32xf32> to vector<16x32xf32>
    %95 = arith.mulf %93, %94 : vector<16x32xf32>
    %96 = vector.broadcast %75 : vector<1x32xf32> to vector<16x32xf32>
    %97 = arith.addf %95, %96 : vector<16x32xf32>
    %98 = arith.truncf %97 : vector<16x32xf32> to vector<16x32xbf16>
    %c0_32 = arith.constant 0 : index
    %c0_33 = arith.constant 0 : index
    %c0_34 = arith.constant 0 : index
    %99 = vector.load %arg8[%c0_32, %c0_33, %c0_34] : memref<1x32x64xbf16, #tpu.memory_space<vmem>>, vector<1x32x64xbf16>
    %100 = vector.shape_cast %99 : vector<1x32x64xbf16> to vector<32x64xbf16>
    %cst_35 = arith.constant dense<0.000000e+00> : vector<16x64xf32>
    %101 = tpu.matmul %98, %100, %cst_35 {dimension_numbers = #tpu.dot_dimension_numbers<[1], [0], [0], [1], [0, 0, 1, 1], [], []>} : vector<16x32xbf16>, vector<32x64xbf16>, vector<16x64xf32> -> vector<16x64xf32>
    %c0_36 = arith.constant 0 : index
    %c0_37 = arith.constant 0 : index
    %c0_38 = arith.constant 0 : index
    %102 = vector.load %arg9[%c0_36, %c0_37, %c0_38] : memref<1x1x64xf32, #tpu.memory_space<vmem>>, vector<1x1x64xf32>
    %103 = vector.shape_cast %102 : vector<1x1x64xf32> to vector<1x64xf32>
    %104 = vector.broadcast %103 : vector<1x64xf32> to vector<16x64xf32>
    %105 = arith.addf %101, %104 : vector<16x64xf32>
    %cst_39 = arith.constant 5.000000e-01 : f32
    %106 = vector.broadcast %cst_39 : f32 to vector<16x64xf32>
    %107 = arith.mulf %106, %105 : vector<16x64xf32>
    %cst_40 = arith.constant 4.471500e-02 : f32
    %108 = vector.broadcast %cst_40 : f32 to vector<16x64xf32>
    %109 = arith.mulf %108, %105 : vector<16x64xf32>
    %110 = arith.mulf %109, %105 : vector<16x64xf32>
    %111 = arith.mulf %110, %105 : vector<16x64xf32>
    %112 = arith.addf %105, %111 : vector<16x64xf32>
    %cst_41 = arith.constant 0.797884583 : f32
    %113 = vector.broadcast %cst_41 : f32 to vector<16x64xf32>
    %114 = arith.mulf %113, %112 : vector<16x64xf32>
    %115 = math.tanh %114 : vector<16x64xf32>
    %cst_42 = arith.constant 1.000000e+00 : f32
    %116 = vector.broadcast %cst_42 : f32 to vector<16x64xf32>
    %117 = arith.addf %116, %115 : vector<16x64xf32>
    %118 = arith.mulf %107, %117 : vector<16x64xf32>
    %119 = arith.truncf %118 : vector<16x64xf32> to vector<16x64xbf16>
    %c0_43 = arith.constant 0 : index
    %c0_44 = arith.constant 0 : index
    %c0_45 = arith.constant 0 : index
    %120 = vector.load %arg10[%c0_43, %c0_44, %c0_45] : memref<1x64x32xbf16, #tpu.memory_space<vmem>>, vector<1x64x32xbf16>
    %121 = vector.shape_cast %120 : vector<1x64x32xbf16> to vector<64x32xbf16>
    %cst_46 = arith.constant dense<0.000000e+00> : vector<16x32xf32>
    %122 = tpu.matmul %119, %121, %cst_46 {dimension_numbers = #tpu.dot_dimension_numbers<[1], [0], [0], [1], [0, 0, 1, 1], [], []>} : vector<16x64xbf16>, vector<64x32xbf16>, vector<16x32xf32> -> vector<16x32xf32>
    %123 = vector.extract_strided_slice %11 {offsets = [3, 0], sizes = [1, 32], strides = [1, 1]} : vector<6x32xf32> to vector<1x32xf32>
    %124 = vector.broadcast %123 : vector<1x32xf32> to vector<16x32xf32>
    %125 = arith.addf %122, %124 : vector<16x32xf32>
    %126 = arith.addf %97, %125 : vector<16x32xf32>
    %127 = vector.extract_strided_slice %11 {offsets = [4, 0], sizes = [1, 32], strides = [1, 1]} : vector<6x32xf32> to vector<1x32xf32>
    %128 = vector.extract_strided_slice %11 {offsets = [5, 0], sizes = [1, 32], strides = [1, 1]} : vector<6x32xf32> to vector<1x32xf32>
    %cst_47 = arith.constant dense<0.000000e+00> : vector<16xf32>
    %129 = vector.multi_reduction <add>, %126, %cst_47 [1] : vector<16x32xf32> to vector<16xf32>
    %130 = vector.shape_cast %129 : vector<16xf32> to vector<16x1xf32>
    %cst_48 = arith.constant 3.200000e+01 : f32
    %131 = vector.broadcast %cst_48 : f32 to vector<16x1xf32>
    %132 = arith.divf %130, %131 : vector<16x1xf32>
    %133 = vector.broadcast %132 : vector<16x1xf32> to vector<16x32xf32>
    %134 = arith.subf %126, %133 : vector<16x32xf32>
    %135 = arith.mulf %134, %134 : vector<16x32xf32>
    %cst_49 = arith.constant dense<0.000000e+00> : vector<16xf32>
    %136 = vector.multi_reduction <add>, %135, %cst_49 [1] : vector<16x32xf32> to vector<16xf32>
    %137 = vector.shape_cast %136 : vector<16xf32> to vector<16x1xf32>
    %cst_50 = arith.constant 3.200000e+01 : f32
    %138 = vector.broadcast %cst_50 : f32 to vector<16x1xf32>
    %139 = arith.divf %137, %138 : vector<16x1xf32>
    %140 = vector.broadcast %132 : vector<16x1xf32> to vector<16x32xf32>
    %141 = arith.subf %126, %140 : vector<16x32xf32>
    %cst_51 = arith.constant 9.99999974E-6 : f32
    %142 = vector.broadcast %cst_51 : f32 to vector<16x1xf32>
    %143 = arith.addf %139, %142 : vector<16x1xf32>
    %144 = math.rsqrt %143 : vector<16x1xf32>
    %145 = vector.broadcast %144 : vector<16x1xf32> to vector<16x32xf32>
    %146 = arith.mulf %141, %145 : vector<16x32xf32>
    %147 = vector.broadcast %127 : vector<1x32xf32> to vector<16x32xf32>
    %148 = arith.mulf %146, %147 : vector<16x32xf32>
    %149 = vector.broadcast %128 : vector<1x32xf32> to vector<16x32xf32>
    %150 = arith.addf %148, %149 : vector<16x32xf32>
    %c0_52 = arith.constant 0 : index
    %c0_53 = arith.constant 0 : index
    %151 = vector.load %arg16[%c0_52, %c0_53] : memref<16x32xf32, #tpu.memory_space<vmem>>, vector<16x32xf32>
    tpu.vector_store %arg16[%c0_52, %c0_53], %150 {strides = array<i32>} : memref<16x32xf32, #tpu.memory_space<vmem>>, vector<16x32xf32>,
    %c1_i32 = arith.constant 1 : i32
    %152 = arith.cmpi eq, %arg0, %c1_i32 : i32
    %153 = arith.extui %152 : i1 to i32
    %c0_i32_54 = arith.constant 0 : i32
    %154 = arith.cmpi ne, %153, %c0_i32_54 : i32
    scf.if %154 {
      %155 = arith.truncf %150 : vector<16x32xf32> to vector<16x32xbf16>
      %c0_55 = arith.constant 0 : index
      %c0_56 = arith.constant 0 : index
      %156 = vector.load %arg11[%c0_55, %c0_56] : memref<32x5xbf16, #tpu.memory_space<vmem>>, vector<32x5xbf16>
      %cst_57 = arith.constant dense<0.000000e+00> : vector<16x5xf32>
      %157 = tpu.matmul %155, %156, %cst_57 {dimension_numbers = #tpu.dot_dimension_numbers<[1], [0], [0], [1], [0, 0, 1, 1], [], []>} : vector<16x32xbf16>, vector<32x5xbf16>, vector<16x5xf32> -> vector<16x5xf32>
      %c0_58 = arith.constant 0 : index
      %c0_59 = arith.constant 0 : index
      %158 = vector.load %arg12[%c0_58, %c0_59] : memref<1x5xf32, #tpu.memory_space<vmem>>, vector<1x5xf32>
      %159 = vector.broadcast %158 : vector<1x5xf32> to vector<16x5xf32>
      %160 = arith.addf %157, %159 : vector<16x5xf32>
      %161 = vector.shape_cast %160 : vector<16x5xf32> to vector<2x8x5xf32>
      %c0_60 = arith.constant 0 : index
      %c0_61 = arith.constant 0 : index
      %162 = vector.load %arg13[%c0_60, %c0_61] : memref<5x5xf32, #tpu.memory_space<vmem>>, vector<5x5xf32>
      %c0_62 = arith.constant 0 : index
      %c0_63 = arith.constant 0 : index
      %163 = vector.load %arg14[%c0_62, %c0_63] : memref<2x5xf32, #tpu.memory_space<vmem>>, vector<1x5xf32>
      %c1 = arith.constant 1 : index
      %c0_64 = arith.constant 0 : index
      %164 = vector.load %arg14[%c1, %c0_64] : memref<2x5xf32, #tpu.memory_space<vmem>>, vector<1x5xf32>
      %165 = tpu.iota {dimensions = array<i32: 2>} : vector<2x5x5xi32>
      %166 = arith.sitofp %165 : vector<2x5x5xi32> to vector<2x5x5xf32>
      %167 = tpu.iota {dimensions = array<i32: 1>} : vector<2x5xi32>
      %168 = arith.sitofp %167 : vector<2x5xi32> to vector<2x5xf32>
      %169 = vector.extract_strided_slice %161 {offsets = [0, 0, 0], sizes = [2, 1, 5], strides = [1, 1, 1]} : vector<2x8x5xf32> to vector<2x1x5xf32>
      %170 = vector.shape_cast %169 : vector<2x1x5xf32> to vector<2x5xf32>
      %171 = vector.broadcast %163 : vector<1x5xf32> to vector<2x5xf32>
      %172 = arith.addf %171, %170 : vector<2x5xf32>
      %173 = vector.shape_cast %172 : vector<2x5xf32> to vector<2x1x5xf32>
      %174 = vector.shape_cast %162 : vector<5x5xf32> to vector<1x5x5xf32>
      %175 = vector.broadcast %173 : vector<2x1x5xf32> to vector<2x5x5xf32>
      %176 = vector.broadcast %174 : vector<1x5x5xf32> to vector<2x5x5xf32>
      %177 = arith.addf %175, %176 : vector<2x5x5xf32>
      %cst_65 = arith.constant dense<0xFF800000> : vector<2x5xf32>
      %178 = vector.multi_reduction <maximumf>, %177, %cst_65 [2] : vector<2x5x5xf32> to vector<2x5xf32>
      %179 = vector.shape_cast %178 : vector<2x5xf32> to vector<2x5x1xf32>
      %180 = vector.broadcast %179 : vector<2x5x1xf32> to vector<2x5x5xf32>
      %181 = arith.cmpf oge, %177, %180 : vector<2x5x5xf32>
      %cst_66 = arith.constant 5.000000e+00 : f32
      %182 = vector.broadcast %cst_66 : f32 to vector<2x5x5xf32>
      %183 = arith.select %181, %166, %182 : vector<2x5x5xi1>, vector<2x5x5xf32>
      %cst_67 = arith.constant dense<0x7F800000> : vector<2x5xf32>
      %184 = vector.multi_reduction <minimumf>, %183, %cst_67 [2] : vector<2x5x5xf32> to vector<2x5xf32>
      %cst_68 = arith.constant dense<0xFF800000> : vector<2x5xf32>
      %185 = vector.multi_reduction <maximumf>, %177, %cst_68 [2] : vector<2x5x5xf32> to vector<2x5xf32>
      %186 = vector.extract_strided_slice %161 {offsets = [0, 1, 0], sizes = [2, 1, 5], strides = [1, 1, 1]} : vector<2x8x5xf32> to vector<2x1x5xf32>
      %187 = vector.shape_cast %186 : vector<2x1x5xf32> to vector<2x5xf32>
      %188 = arith.addf %185, %187 : vector<2x5xf32>
      %189 = vector.extract_strided_slice %0 {offsets = [0, 1], sizes = [2, 1], strides = [1, 1]} : vector<2x8xf32> to vector<2x1xf32>
      %cst_69 = arith.constant 5.000000e-01 : f32
      %190 = vector.broadcast %cst_69 : f32 to vector<2x1xf32>
      %191 = arith.cmpf ogt, %189, %190 : vector<2x1xf32>
      %192 = vector.shape_cast %191 : vector<2x1xi1> to vector<2x1xi1>
      %193 = vector.broadcast %192 : vector<2x1xi1> to vector<2x5xi1>
      %194 = arith.select %193, %188, %172 : vector<2x5xi1>, vector<2x5xf32>
      %195 = vector.shape_cast %194 : vector<2x5xf32> to vector<2x1x5xf32>
      %196 = vector.shape_cast %162 : vector<5x5xf32> to vector<1x5x5xf32>
      %197 = vector.broadcast %195 : vector<2x1x5xf32> to vector<2x5x5xf32>
      %198 = vector.broadcast %196 : vector<1x5x5xf32> to vector<2x5x5xf32>
      %199 = arith.addf %197, %198 : vector<2x5x5xf32>
      %cst_70 = arith.constant dense<0xFF800000> : vector<2x5xf32>
      %200 = vector.multi_reduction <maximumf>, %199, %cst_70 [2] : vector<2x5x5xf32> to vector<2x5xf32>
      %201 = vector.shape_cast %200 : vector<2x5xf32> to vector<2x5x1xf32>
      %202 = vector.broadcast %201 : vector<2x5x1xf32> to vector<2x5x5xf32>
      %203 = arith.cmpf oge, %199, %202 : vector<2x5x5xf32>
      %cst_71 = arith.constant 5.000000e+00 : f32
      %204 = vector.broadcast %cst_71 : f32 to vector<2x5x5xf32>
      %205 = arith.select %203, %166, %204 : vector<2x5x5xi1>, vector<2x5x5xf32>
      %cst_72 = arith.constant dense<0x7F800000> : vector<2x5xf32>
      %206 = vector.multi_reduction <minimumf>, %205, %cst_72 [2] : vector<2x5x5xf32> to vector<2x5xf32>
      %cst_73 = arith.constant dense<0xFF800000> : vector<2x5xf32>
      %207 = vector.multi_reduction <maximumf>, %199, %cst_73 [2] : vector<2x5x5xf32> to vector<2x5xf32>
      %208 = vector.extract_strided_slice %161 {offsets = [0, 2, 0], sizes = [2, 1, 5], strides = [1, 1, 1]} : vector<2x8x5xf32> to vector<2x1x5xf32>
      %209 = vector.shape_cast %208 : vector<2x1x5xf32> to vector<2x5xf32>
      %210 = arith.addf %207, %209 : vector<2x5xf32>
      %211 = vector.extract_strided_slice %0 {offsets = [0, 2], sizes = [2, 1], strides = [1, 1]} : vector<2x8xf32> to vector<2x1xf32>
      %cst_74 = arith.constant 5.000000e-01 : f32
      %212 = vector.broadcast %cst_74 : f32 to vector<2x1xf32>
      %213 = arith.cmpf ogt, %211, %212 : vector<2x1xf32>
      %214 = vector.shape_cast %213 : vector<2x1xi1> to vector<2x1xi1>
      %215 = vector.broadcast %214 : vector<2x1xi1> to vector<2x5xi1>
      %216 = arith.select %215, %210, %194 : vector<2x5xi1>, vector<2x5xf32>
      %217 = vector.shape_cast %216 : vector<2x5xf32> to vector<2x1x5xf32>
      %218 = vector.shape_cast %162 : vector<5x5xf32> to vector<1x5x5xf32>
      %219 = vector.broadcast %217 : vector<2x1x5xf32> to vector<2x5x5xf32>
      %220 = vector.broadcast %218 : vector<1x5x5xf32> to vector<2x5x5xf32>
      %221 = arith.addf %219, %220 : vector<2x5x5xf32>
      %cst_75 = arith.constant dense<0xFF800000> : vector<2x5xf32>
      %222 = vector.multi_reduction <maximumf>, %221, %cst_75 [2] : vector<2x5x5xf32> to vector<2x5xf32>
      %223 = vector.shape_cast %222 : vector<2x5xf32> to vector<2x5x1xf32>
      %224 = vector.broadcast %223 : vector<2x5x1xf32> to vector<2x5x5xf32>
      %225 = arith.cmpf oge, %221, %224 : vector<2x5x5xf32>
      %cst_76 = arith.constant 5.000000e+00 : f32
      %226 = vector.broadcast %cst_76 : f32 to vector<2x5x5xf32>
      %227 = arith.select %225, %166, %226 : vector<2x5x5xi1>, vector<2x5x5xf32>
      %cst_77 = arith.constant dense<0x7F800000> : vector<2x5xf32>
      %228 = vector.multi_reduction <minimumf>, %227, %cst_77 [2] : vector<2x5x5xf32> to vector<2x5xf32>
      %cst_78 = arith.constant dense<0xFF800000> : vector<2x5xf32>
      %229 = vector.multi_reduction <maximumf>, %221, %cst_78 [2] : vector<2x5x5xf32> to vector<2x5xf32>
      %230 = vector.extract_strided_slice %161 {offsets = [0, 3, 0], sizes = [2, 1, 5], strides = [1, 1, 1]} : vector<2x8x5xf32> to vector<2x1x5xf32>
      %231 = vector.shape_cast %230 : vector<2x1x5xf32> to vector<2x5xf32>
      %232 = arith.addf %229, %231 : vector<2x5xf32>
      %233 = vector.extract_strided_slice %0 {offsets = [0, 3], sizes = [2, 1], strides = [1, 1]} : vector<2x8xf32> to vector<2x1xf32>
      %cst_79 = arith.constant 5.000000e-01 : f32
      %234 = vector.broadcast %cst_79 : f32 to vector<2x1xf32>
      %235 = arith.cmpf ogt, %233, %234 : vector<2x1xf32>
      %236 = vector.shape_cast %235 : vector<2x1xi1> to vector<2x1xi1>
      %237 = vector.broadcast %236 : vector<2x1xi1> to vector<2x5xi1>
      %238 = arith.select %237, %232, %216 : vector<2x5xi1>, vector<2x5xf32>
      %239 = vector.shape_cast %238 : vector<2x5xf32> to vector<2x1x5xf32>
      %240 = vector.shape_cast %162 : vector<5x5xf32> to vector<1x5x5xf32>
      %241 = vector.broadcast %239 : vector<2x1x5xf32> to vector<2x5x5xf32>
      %242 = vector.broadcast %240 : vector<1x5x5xf32> to vector<2x5x5xf32>
      %243 = arith.addf %241, %242 : vector<2x5x5xf32>
      %cst_80 = arith.constant dense<0xFF800000> : vector<2x5xf32>
      %244 = vector.multi_reduction <maximumf>, %243, %cst_80 [2] : vector<2x5x5xf32> to vector<2x5xf32>
      %245 = vector.shape_cast %244 : vector<2x5xf32> to vector<2x5x1xf32>
      %246 = vector.broadcast %245 : vector<2x5x1xf32> to vector<2x5x5xf32>
      %247 = arith.cmpf oge, %243, %246 : vector<2x5x5xf32>
      %cst_81 = arith.constant 5.000000e+00 : f32
      %248 = vector.broadcast %cst_81 : f32 to vector<2x5x5xf32>
      %249 = arith.select %247, %166, %248 : vector<2x5x5xi1>, vector<2x5x5xf32>
      %cst_82 = arith.constant dense<0x7F800000> : vector<2x5xf32>
      %250 = vector.multi_reduction <minimumf>, %249, %cst_82 [2] : vector<2x5x5xf32> to vector<2x5xf32>
      %cst_83 = arith.constant dense<0xFF800000> : vector<2x5xf32>
      %251 = vector.multi_reduction <maximumf>, %243, %cst_83 [2] : vector<2x5x5xf32> to vector<2x5xf32>
      %252 = vector.extract_strided_slice %161 {offsets = [0, 4, 0], sizes = [2, 1, 5], strides = [1, 1, 1]} : vector<2x8x5xf32> to vector<2x1x5xf32>
      %253 = vector.shape_cast %252 : vector<2x1x5xf32> to vector<2x5xf32>
      %254 = arith.addf %251, %253 : vector<2x5xf32>
      %255 = vector.extract_strided_slice %0 {offsets = [0, 4], sizes = [2, 1], strides = [1, 1]} : vector<2x8xf32> to vector<2x1xf32>
      %cst_84 = arith.constant 5.000000e-01 : f32
      %256 = vector.broadcast %cst_84 : f32 to vector<2x1xf32>
      %257 = arith.cmpf ogt, %255, %256 : vector<2x1xf32>
      %258 = vector.shape_cast %257 : vector<2x1xi1> to vector<2x1xi1>
      %259 = vector.broadcast %258 : vector<2x1xi1> to vector<2x5xi1>
      %260 = arith.select %259, %254, %238 : vector<2x5xi1>, vector<2x5xf32>
      %261 = vector.shape_cast %260 : vector<2x5xf32> to vector<2x1x5xf32>
      %262 = vector.shape_cast %162 : vector<5x5xf32> to vector<1x5x5xf32>
      %263 = vector.broadcast %261 : vector<2x1x5xf32> to vector<2x5x5xf32>
      %264 = vector.broadcast %262 : vector<1x5x5xf32> to vector<2x5x5xf32>
      %265 = arith.addf %263, %264 : vector<2x5x5xf32>
      %cst_85 = arith.constant dense<0xFF800000> : vector<2x5xf32>
      %266 = vector.multi_reduction <maximumf>, %265, %cst_85 [2] : vector<2x5x5xf32> to vector<2x5xf32>
      %267 = vector.shape_cast %266 : vector<2x5xf32> to vector<2x5x1xf32>
      %268 = vector.broadcast %267 : vector<2x5x1xf32> to vector<2x5x5xf32>
      %269 = arith.cmpf oge, %265, %268 : vector<2x5x5xf32>
      %cst_86 = arith.constant 5.000000e+00 : f32
      %270 = vector.broadcast %cst_86 : f32 to vector<2x5x5xf32>
      %271 = arith.select %269, %166, %270 : vector<2x5x5xi1>, vector<2x5x5xf32>
      %cst_87 = arith.constant dense<0x7F800000> : vector<2x5xf32>
      %272 = vector.multi_reduction <minimumf>, %271, %cst_87 [2] : vector<2x5x5xf32> to vector<2x5xf32>
      %cst_88 = arith.constant dense<0xFF800000> : vector<2x5xf32>
      %273 = vector.multi_reduction <maximumf>, %265, %cst_88 [2] : vector<2x5x5xf32> to vector<2x5xf32>
      %274 = vector.extract_strided_slice %161 {offsets = [0, 5, 0], sizes = [2, 1, 5], strides = [1, 1, 1]} : vector<2x8x5xf32> to vector<2x1x5xf32>
      %275 = vector.shape_cast %274 : vector<2x1x5xf32> to vector<2x5xf32>
      %276 = arith.addf %273, %275 : vector<2x5xf32>
      %277 = vector.extract_strided_slice %0 {offsets = [0, 5], sizes = [2, 1], strides = [1, 1]} : vector<2x8xf32> to vector<2x1xf32>
      %cst_89 = arith.constant 5.000000e-01 : f32
      %278 = vector.broadcast %cst_89 : f32 to vector<2x1xf32>
      %279 = arith.cmpf ogt, %277, %278 : vector<2x1xf32>
      %280 = vector.shape_cast %279 : vector<2x1xi1> to vector<2x1xi1>
      %281 = vector.broadcast %280 : vector<2x1xi1> to vector<2x5xi1>
      %282 = arith.select %281, %276, %260 : vector<2x5xi1>, vector<2x5xf32>
      %283 = vector.shape_cast %282 : vector<2x5xf32> to vector<2x1x5xf32>
      %284 = vector.shape_cast %162 : vector<5x5xf32> to vector<1x5x5xf32>
      %285 = vector.broadcast %283 : vector<2x1x5xf32> to vector<2x5x5xf32>
      %286 = vector.broadcast %284 : vector<1x5x5xf32> to vector<2x5x5xf32>
      %287 = arith.addf %285, %286 : vector<2x5x5xf32>
      %cst_90 = arith.constant dense<0xFF800000> : vector<2x5xf32>
      %288 = vector.multi_reduction <maximumf>, %287, %cst_90 [2] : vector<2x5x5xf32> to vector<2x5xf32>
      %289 = vector.shape_cast %288 : vector<2x5xf32> to vector<2x5x1xf32>
      %290 = vector.broadcast %289 : vector<2x5x1xf32> to vector<2x5x5xf32>
      %291 = arith.cmpf oge, %287, %290 : vector<2x5x5xf32>
      %cst_91 = arith.constant 5.000000e+00 : f32
      %292 = vector.broadcast %cst_91 : f32 to vector<2x5x5xf32>
      %293 = arith.select %291, %166, %292 : vector<2x5x5xi1>, vector<2x5x5xf32>
      %cst_92 = arith.constant dense<0x7F800000> : vector<2x5xf32>
      %294 = vector.multi_reduction <minimumf>, %293, %cst_92 [2] : vector<2x5x5xf32> to vector<2x5xf32>
      %cst_93 = arith.constant dense<0xFF800000> : vector<2x5xf32>
      %295 = vector.multi_reduction <maximumf>, %287, %cst_93 [2] : vector<2x5x5xf32> to vector<2x5xf32>
      %296 = vector.extract_strided_slice %161 {offsets = [0, 6, 0], sizes = [2, 1, 5], strides = [1, 1, 1]} : vector<2x8x5xf32> to vector<2x1x5xf32>
      %297 = vector.shape_cast %296 : vector<2x1x5xf32> to vector<2x5xf32>
      %298 = arith.addf %295, %297 : vector<2x5xf32>
      %299 = vector.extract_strided_slice %0 {offsets = [0, 6], sizes = [2, 1], strides = [1, 1]} : vector<2x8xf32> to vector<2x1xf32>
      %cst_94 = arith.constant 5.000000e-01 : f32
      %300 = vector.broadcast %cst_94 : f32 to vector<2x1xf32>
      %301 = arith.cmpf ogt, %299, %300 : vector<2x1xf32>
      %302 = vector.shape_cast %301 : vector<2x1xi1> to vector<2x1xi1>
      %303 = vector.broadcast %302 : vector<2x1xi1> to vector<2x5xi1>
      %304 = arith.select %303, %298, %282 : vector<2x5xi1>, vector<2x5xf32>
      %305 = vector.shape_cast %304 : vector<2x5xf32> to vector<2x1x5xf32>
      %306 = vector.shape_cast %162 : vector<5x5xf32> to vector<1x5x5xf32>
      %307 = vector.broadcast %305 : vector<2x1x5xf32> to vector<2x5x5xf32>
      %308 = vector.broadcast %306 : vector<1x5x5xf32> to vector<2x5x5xf32>
      %309 = arith.addf %307, %308 : vector<2x5x5xf32>
      %cst_95 = arith.constant dense<0xFF800000> : vector<2x5xf32>
      %310 = vector.multi_reduction <maximumf>, %309, %cst_95 [2] : vector<2x5x5xf32> to vector<2x5xf32>
      %311 = vector.shape_cast %310 : vector<2x5xf32> to vector<2x5x1xf32>
      %312 = vector.broadcast %311 : vector<2x5x1xf32> to vector<2x5x5xf32>
      %313 = arith.cmpf oge, %309, %312 : vector<2x5x5xf32>
      %cst_96 = arith.constant 5.000000e+00 : f32
      %314 = vector.broadcast %cst_96 : f32 to vector<2x5x5xf32>
      %315 = arith.select %313, %166, %314 : vector<2x5x5xi1>, vector<2x5x5xf32>
      %cst_97 = arith.constant dense<0x7F800000> : vector<2x5xf32>
      %316 = vector.multi_reduction <minimumf>, %315, %cst_97 [2] : vector<2x5x5xf32> to vector<2x5xf32>
      %cst_98 = arith.constant dense<0xFF800000> : vector<2x5xf32>
      %317 = vector.multi_reduction <maximumf>, %309, %cst_98 [2] : vector<2x5x5xf32> to vector<2x5xf32>
      %318 = vector.extract_strided_slice %161 {offsets = [0, 7, 0], sizes = [2, 1, 5], strides = [1, 1, 1]} : vector<2x8x5xf32> to vector<2x1x5xf32>
      %319 = vector.shape_cast %318 : vector<2x1x5xf32> to vector<2x5xf32>
      %320 = arith.addf %317, %319 : vector<2x5xf32>
      %321 = vector.extract_strided_slice %0 {offsets = [0, 7], sizes = [2, 1], strides = [1, 1]} : vector<2x8xf32> to vector<2x1xf32>
      %cst_99 = arith.constant 5.000000e-01 : f32
      %322 = vector.broadcast %cst_99 : f32 to vector<2x1xf32>
      %323 = arith.cmpf ogt, %321, %322 : vector<2x1xf32>
      %324 = vector.shape_cast %323 : vector<2x1xi1> to vector<2x1xi1>
      %325 = vector.broadcast %324 : vector<2x1xi1> to vector<2x5xi1>
      %326 = arith.select %325, %320, %304 : vector<2x5xi1>, vector<2x5xf32>
      %327 = vector.broadcast %164 : vector<1x5xf32> to vector<2x5xf32>
      %328 = arith.addf %326, %327 : vector<2x5xf32>
      %cst_100 = arith.constant dense<0xFF800000> : vector<2xf32>
      %329 = vector.multi_reduction <maximumf>, %328, %cst_100 [1] : vector<2x5xf32> to vector<2xf32>
      %330 = vector.shape_cast %329 : vector<2xf32> to vector<2x1xf32>
      %331 = vector.broadcast %330 : vector<2x1xf32> to vector<2x5xf32>
      %332 = arith.cmpf oge, %328, %331 : vector<2x5xf32>
      %cst_101 = arith.constant 5.000000e+00 : f32
      %333 = vector.broadcast %cst_101 : f32 to vector<2x5xf32>
      %334 = arith.select %332, %168, %333 : vector<2x5xi1>, vector<2x5xf32>
      %cst_102 = arith.constant dense<0x7F800000> : vector<2xf32>
      %335 = vector.multi_reduction <minimumf>, %334, %cst_102 [1] : vector<2x5xf32> to vector<2xf32>
      %336 = vector.shape_cast %335 : vector<2xf32> to vector<2x1xf32>
      %cst_103 = arith.constant dense<0.000000e+00> : vector<2xf32>
      %337 = vector.multi_reduction <add>, %0, %cst_103 [1] : vector<2x8xf32> to vector<2xf32>
      %338 = vector.shape_cast %337 : vector<2xf32> to vector<2x1xf32>
      %cst_104 = arith.constant 1.000000e+00 : f32
      %339 = vector.broadcast %cst_104 : f32 to vector<2x1xf32>
      %340 = arith.subf %338, %339 : vector<2x1xf32>
      %cst_105 = arith.constant 7.000000e+00 : f32
      %341 = vector.broadcast %cst_105 : f32 to vector<2x1xf32>
      %342 = arith.cmpf oeq, %340, %341 : vector<2x1xf32>
      %343 = arith.select %342, %336, %336 : vector<2x1xi1>, vector<2x1xf32>
      %cst_106 = arith.constant 7.000000e+00 : f32
      %344 = vector.broadcast %cst_106 : f32 to vector<2x1xf32>
      %345 = arith.cmpf oge, %340, %344 : vector<2x1xf32>
      %cst_107 = arith.constant -1.000000e+00 : f32
      %346 = vector.broadcast %cst_107 : f32 to vector<2x1xf32>
      %347 = arith.select %345, %343, %346 : vector<2x1xi1>, vector<2x1xf32>
      %348 = vector.broadcast %343 : vector<2x1xf32> to vector<2x5xf32>
      %349 = arith.cmpf oeq, %168, %348 : vector<2x5xf32>
      %cst_108 = arith.constant 0.000000e+00 : f32
      %350 = vector.broadcast %cst_108 : f32 to vector<2x5xf32>
      %351 = arith.select %349, %316, %350 : vector<2x5xi1>, vector<2x5xf32>
      %cst_109 = arith.constant dense<0.000000e+00> : vector<2xf32>
      %352 = vector.multi_reduction <add>, %351, %cst_109 [1] : vector<2x5xf32> to vector<2xf32>
      %353 = vector.shape_cast %352 : vector<2xf32> to vector<2x1xf32>
      %cst_110 = arith.constant 6.000000e+00 : f32
      %354 = vector.broadcast %cst_110 : f32 to vector<2x1xf32>
      %355 = arith.cmpf oeq, %340, %354 : vector<2x1xf32>
      %356 = arith.select %355, %336, %353 : vector<2x1xi1>, vector<2x1xf32>
      %cst_111 = arith.constant 6.000000e+00 : f32
      %357 = vector.broadcast %cst_111 : f32 to vector<2x1xf32>
      %358 = arith.cmpf oge, %340, %357 : vector<2x1xf32>
      %cst_112 = arith.constant -1.000000e+00 : f32
      %359 = vector.broadcast %cst_112 : f32 to vector<2x1xf32>
      %360 = arith.select %358, %356, %359 : vector<2x1xi1>, vector<2x1xf32>
      %361 = vector.broadcast %356 : vector<2x1xf32> to vector<2x5xf32>
      %362 = arith.cmpf oeq, %168, %361 : vector<2x5xf32>
      %cst_113 = arith.constant 0.000000e+00 : f32
      %363 = vector.broadcast %cst_113 : f32 to vector<2x5xf32>
      %364 = arith.select %362, %294, %363 : vector<2x5xi1>, vector<2x5xf32>
      %cst_114 = arith.constant dense<0.000000e+00> : vector<2xf32>
      %365 = vector.multi_reduction <add>, %364, %cst_114 [1] : vector<2x5xf32> to vector<2xf32>
      %366 = vector.shape_cast %365 : vector<2xf32> to vector<2x1xf32>
      %cst_115 = arith.constant 5.000000e+00 : f32
      %367 = vector.broadcast %cst_115 : f32 to vector<2x1xf32>
      %368 = arith.cmpf oeq, %340, %367 : vector<2x1xf32>
      %369 = arith.select %368, %336, %366 : vector<2x1xi1>, vector<2x1xf32>
      %cst_116 = arith.constant 5.000000e+00 : f32
      %370 = vector.broadcast %cst_116 : f32 to vector<2x1xf32>
      %371 = arith.cmpf oge, %340, %370 : vector<2x1xf32>
      %cst_117 = arith.constant -1.000000e+00 : f32
      %372 = vector.broadcast %cst_117 : f32 to vector<2x1xf32>
      %373 = arith.select %371, %369, %372 : vector<2x1xi1>, vector<2x1xf32>
      %374 = vector.broadcast %369 : vector<2x1xf32> to vector<2x5xf32>
      %375 = arith.cmpf oeq, %168, %374 : vector<2x5xf32>
      %cst_118 = arith.constant 0.000000e+00 : f32
      %376 = vector.broadcast %cst_118 : f32 to vector<2x5xf32>
      %377 = arith.select %375, %272, %376 : vector<2x5xi1>, vector<2x5xf32>
      %cst_119 = arith.constant dense<0.000000e+00> : vector<2xf32>
      %378 = vector.multi_reduction <add>, %377, %cst_119 [1] : vector<2x5xf32> to vector<2xf32>
      %379 = vector.shape_cast %378 : vector<2xf32> to vector<2x1xf32>
      %cst_120 = arith.constant 4.000000e+00 : f32
      %380 = vector.broadcast %cst_120 : f32 to vector<2x1xf32>
      %381 = arith.cmpf oeq, %340, %380 : vector<2x1xf32>
      %382 = arith.select %381, %336, %379 : vector<2x1xi1>, vector<2x1xf32>
      %cst_121 = arith.constant 4.000000e+00 : f32
      %383 = vector.broadcast %cst_121 : f32 to vector<2x1xf32>
      %384 = arith.cmpf oge, %340, %383 : vector<2x1xf32>
      %cst_122 = arith.constant -1.000000e+00 : f32
      %385 = vector.broadcast %cst_122 : f32 to vector<2x1xf32>
      %386 = arith.select %384, %382, %385 : vector<2x1xi1>, vector<2x1xf32>
      %387 = vector.broadcast %382 : vector<2x1xf32> to vector<2x5xf32>
      %388 = arith.cmpf oeq, %168, %387 : vector<2x5xf32>
      %cst_123 = arith.constant 0.000000e+00 : f32
      %389 = vector.broadcast %cst_123 : f32 to vector<2x5xf32>
      %390 = arith.select %388, %250, %389 : vector<2x5xi1>, vector<2x5xf32>
      %cst_124 = arith.constant dense<0.000000e+00> : vector<2xf32>
      %391 = vector.multi_reduction <add>, %390, %cst_124 [1] : vector<2x5xf32> to vector<2xf32>
      %392 = vector.shape_cast %391 : vector<2xf32> to vector<2x1xf32>
      %cst_125 = arith.constant 3.000000e+00 : f32
      %393 = vector.broadcast %cst_125 : f32 to vector<2x1xf32>
      %394 = arith.cmpf oeq, %340, %393 : vector<2x1xf32>
      %395 = arith.select %394, %336, %392 : vector<2x1xi1>, vector<2x1xf32>
      %cst_126 = arith.constant 3.000000e+00 : f32
      %396 = vector.broadcast %cst_126 : f32 to vector<2x1xf32>
      %397 = arith.cmpf oge, %340, %396 : vector<2x1xf32>
      %cst_127 = arith.constant -1.000000e+00 : f32
      %398 = vector.broadcast %cst_127 : f32 to vector<2x1xf32>
      %399 = arith.select %397, %395, %398 : vector<2x1xi1>, vector<2x1xf32>
      %400 = vector.broadcast %395 : vector<2x1xf32> to vector<2x5xf32>
      %401 = arith.cmpf oeq, %168, %400 : vector<2x5xf32>
      %cst_128 = arith.constant 0.000000e+00 : f32
      %402 = vector.broadcast %cst_128 : f32 to vector<2x5xf32>
      %403 = arith.select %401, %228, %402 : vector<2x5xi1>, vector<2x5xf32>
      %cst_129 = arith.constant dense<0.000000e+00> : vector<2xf32>
      %404 = vector.multi_reduction <add>, %403, %cst_129 [1] : vector<2x5xf32> to vector<2xf32>
      %405 = vector.shape_cast %404 : vector<2xf32> to vector<2x1xf32>
      %cst_130 = arith.constant 2.000000e+00 : f32
      %406 = vector.broadcast %cst_130 : f32 to vector<2x1xf32>
      %407 = arith.cmpf oeq, %340, %406 : vector<2x1xf32>
      %408 = arith.select %407, %336, %405 : vector<2x1xi1>, vector<2x1xf32>
      %cst_131 = arith.constant 2.000000e+00 : f32
      %409 = vector.broadcast %cst_131 : f32 to vector<2x1xf32>
      %410 = arith.cmpf oge, %340, %409 : vector<2x1xf32>
      %cst_132 = arith.constant -1.000000e+00 : f32
      %411 = vector.broadcast %cst_132 : f32 to vector<2x1xf32>
      %412 = arith.select %410, %408, %411 : vector<2x1xi1>, vector<2x1xf32>
      %413 = vector.broadcast %408 : vector<2x1xf32> to vector<2x5xf32>
      %414 = arith.cmpf oeq, %168, %413 : vector<2x5xf32>
      %cst_133 = arith.constant 0.000000e+00 : f32
      %415 = vector.broadcast %cst_133 : f32 to vector<2x5xf32>
      %416 = arith.select %414, %206, %415 : vector<2x5xi1>, vector<2x5xf32>
      %cst_134 = arith.constant dense<0.000000e+00> : vector<2xf32>
      %417 = vector.multi_reduction <add>, %416, %cst_134 [1] : vector<2x5xf32> to vector<2xf32>
      %418 = vector.shape_cast %417 : vector<2xf32> to vector<2x1xf32>
      %cst_135 = arith.constant 1.000000e+00 : f32
      %419 = vector.broadcast %cst_135 : f32 to vector<2x1xf32>
      %420 = arith.cmpf oeq, %340, %419 : vector<2x1xf32>
      %421 = arith.select %420, %336, %418 : vector<2x1xi1>, vector<2x1xf32>
      %cst_136 = arith.constant 1.000000e+00 : f32
      %422 = vector.broadcast %cst_136 : f32 to vector<2x1xf32>
      %423 = arith.cmpf oge, %340, %422 : vector<2x1xf32>
      %cst_137 = arith.constant -1.000000e+00 : f32
      %424 = vector.broadcast %cst_137 : f32 to vector<2x1xf32>
      %425 = arith.select %423, %421, %424 : vector<2x1xi1>, vector<2x1xf32>
      %426 = vector.broadcast %421 : vector<2x1xf32> to vector<2x5xf32>
      %427 = arith.cmpf oeq, %168, %426 : vector<2x5xf32>
      %cst_138 = arith.constant 0.000000e+00 : f32
      %428 = vector.broadcast %cst_138 : f32 to vector<2x5xf32>
      %429 = arith.select %427, %184, %428 : vector<2x5xi1>, vector<2x5xf32>
      %cst_139 = arith.constant dense<0.000000e+00> : vector<2xf32>
      %430 = vector.multi_reduction <add>, %429, %cst_139 [1] : vector<2x5xf32> to vector<2xf32>
      %431 = vector.shape_cast %430 : vector<2xf32> to vector<2x1xf32>
      %cst_140 = arith.constant 0.000000e+00 : f32
      %432 = vector.broadcast %cst_140 : f32 to vector<2x1xf32>
      %433 = arith.cmpf oeq, %340, %432 : vector<2x1xf32>
      %434 = arith.select %433, %336, %431 : vector<2x1xi1>, vector<2x1xf32>
      %cst_141 = arith.constant 0.000000e+00 : f32
      %435 = vector.broadcast %cst_141 : f32 to vector<2x1xf32>
      %436 = arith.cmpf oge, %340, %435 : vector<2x1xf32>
      %cst_142 = arith.constant -1.000000e+00 : f32
      %437 = vector.broadcast %cst_142 : f32 to vector<2x1xf32>
      %438 = arith.select %436, %434, %437 : vector<2x1xi1>, vector<2x1xf32>
      %439 = tpu.concatenate %438, %425, %412, %399, %386, %373, %360, %347 in 1 : vector<2x1xf32>, vector<2x1xf32>, vector<2x1xf32>, vector<2x1xf32>, vector<2x1xf32>, vector<2x1xf32>, vector<2x1xf32>, vector<2x1xf32> -> vector<2x8xf32>
      %440 = arith.fptosi %439 : vector<2x8xf32> to vector<2x8xi32>
      %c0_143 = arith.constant 0 : index
      %c0_144 = arith.constant 0 : index
      %441 = vector.load %arg15[%c0_143, %c0_144] : memref<2x8xi32, #tpu.memory_space<vmem>>, vector<2x8xi32>
      tpu.vector_store %arg15[%c0_143, %c0_144], %440 {strides = array<i32>} : memref<2x8xi32, #tpu.memory_space<vmem>>, vector<2x8xi32>,
    } else {
    }
    return
  }
  func.func @transform_0(%arg0: i32) -> (i32, i32, i32) {
    %c0_i32 = arith.constant 0 : i32
    %c0_i32_0 = arith.constant 0 : i32
    %c0_i32_1 = arith.constant 0 : i32
    %c0_i32_2 = arith.constant 0 : i32
    return %c0_i32, %c0_i32_0, %c0_i32_1 : i32, i32, i32
  }
  func.func @transform_1(%arg0: i32) -> (i32, i32) {
    %c0_i32 = arith.constant 0 : i32
    %c0_i32_0 = arith.constant 0 : i32
    %c0_i32_1 = arith.constant 0 : i32
    return %c0_i32, %c0_i32_0 : i32, i32
  }
  func.func @transform_2(%arg0: i32) -> (i32, i32) {
    %c0_i32 = arith.constant 0 : i32
    %c0_i32_0 = arith.constant 0 : i32
    %c0_i32_1 = arith.constant 0 : i32
    return %c0_i32, %c0_i32_0 : i32, i32
  }
  func.func @transform_3(%arg0: i32) -> (i32, i32, i32) {
    %c0_i32 = arith.constant 0 : i32
    %c0_i32_0 = arith.constant 0 : i32
    %c0_i32_1 = arith.constant 0 : i32
    return %arg0, %c0_i32, %c0_i32_0 : i32, i32, i32
  }
  func.func @transform_4(%arg0: i32) -> (i32, i32, i32) {
    %c0_i32 = arith.constant 0 : i32
    %c0_i32_0 = arith.constant 0 : i32
    %c0_i32_1 = arith.constant 0 : i32
    return %arg0, %c0_i32, %c0_i32_0 : i32, i32, i32
  }
  func.func @transform_5(%arg0: i32) -> (i32, i32, i32) {
    %c0_i32 = arith.constant 0 : i32
    %c0_i32_0 = arith.constant 0 : i32
    %c0_i32_1 = arith.constant 0 : i32
    return %arg0, %c0_i32, %c0_i32_0 : i32, i32, i32
  }
  func.func @transform_6(%arg0: i32) -> (i32, i32, i32) {
    %c0_i32 = arith.constant 0 : i32
    %c0_i32_0 = arith.constant 0 : i32
    %c0_i32_1 = arith.constant 0 : i32
    return %arg0, %c0_i32, %c0_i32_0 : i32, i32, i32
  }
  func.func @transform_7(%arg0: i32) -> (i32, i32, i32) {
    %c0_i32 = arith.constant 0 : i32
    %c0_i32_0 = arith.constant 0 : i32
    %c0_i32_1 = arith.constant 0 : i32
    return %arg0, %c0_i32, %c0_i32_0 : i32, i32, i32
  }
  func.func @transform_8(%arg0: i32) -> (i32, i32, i32) {
    %c0_i32 = arith.constant 0 : i32
    %c0_i32_0 = arith.constant 0 : i32
    %c0_i32_1 = arith.constant 0 : i32
    return %arg0, %c0_i32, %c0_i32_0 : i32, i32, i32
  }
  func.func @transform_9(%arg0: i32) -> (i32, i32, i32) {
    %c0_i32 = arith.constant 0 : i32
    %c0_i32_0 = arith.constant 0 : i32
    %c0_i32_1 = arith.constant 0 : i32
    return %arg0, %c0_i32, %c0_i32_0 : i32, i32, i32
  }
  func.func @transform_10(%arg0: i32) -> (i32, i32) {
    %c0_i32 = arith.constant 0 : i32
    %c0_i32_0 = arith.constant 0 : i32
    %c0_i32_1 = arith.constant 0 : i32
    return %c0_i32, %c0_i32_0 : i32, i32
  }
  func.func @transform_11(%arg0: i32) -> (i32, i32) {
    %c0_i32 = arith.constant 0 : i32
    %c0_i32_0 = arith.constant 0 : i32
    %c0_i32_1 = arith.constant 0 : i32
    return %c0_i32, %c0_i32_0 : i32, i32
  }
  func.func @transform_12(%arg0: i32) -> (i32, i32) {
    %c0_i32 = arith.constant 0 : i32
    %c0_i32_0 = arith.constant 0 : i32
    %c0_i32_1 = arith.constant 0 : i32
    return %c0_i32, %c0_i32_0 : i32, i32
  }
  func.func @transform_13(%arg0: i32) -> (i32, i32) {
    %c0_i32 = arith.constant 0 : i32
    %c0_i32_0 = arith.constant 0 : i32
    %c0_i32_1 = arith.constant 0 : i32
    return %c0_i32, %c0_i32_0 : i32, i32
  }
  func.func @transform_14(%arg0: i32) -> (i32, i32) {
    %c0_i32 = arith.constant 0 : i32
    %c0_i32_0 = arith.constant 0 : i32
    %c0_i32_1 = arith.constant 0 : i32
    return %c0_i32, %c0_i32_0 : i32, i32
  }
}

</mosaic_0001>

<bundles_post_ra>
// kernel: roberta_crf_forward.1
= control target key start
LH: loop header
LB: loop body
LE: loop exit
PB: predicated region body
PF: predicated region fallthrough
CT: control target
= control target key end

     0   :  { %s5051_s0 = inlined_call_operand.hbm [shape: f32[2,8,32], index: 0, kind: input, shape index: {}]   ;;  %s5052_s1 = inlined_call_operand.hbm [shape: f32[2,8], index: 1, kind: input, shape index: {}]   ;;  %s5053_s2 = inlined_call_operand.hbm [shape: f32[2,32], index: 2, kind: input, shape index: {}]   ;;  %s5054_s3 = inlined_call_operand.hbm [shape: bf16[2,32,96], index: 3, kind: input, shape index: {}]   ;;  %s5055_s4 = inlined_call_operand.hbm [shape: f32[2,1,96], index: 4, kind: input, shape index: {}]   ;;  %s5056_s5 = inlined_call_operand.hbm [shape: bf16[2,32,32], index: 5, kind: input, shape index: {}]   ;;  %s5057_s6 = inlined_call_operand.hbm [shape: f32[2,6,32], index: 6, kind: input, shape index: {}]   ;;  %s5058_s7 = inlined_call_operand.hbm [shape: bf16[2,32,64], index: 7, kind: input, shape index: {}]   ;;  %s5059_s8 = inlined_call_operand.hbm [shape: f32[2,1,64], index: 8, kind: input, shape index: {}]   ;;  %s5060_s9 = inlined_call_operand.hbm [shape: bf16[2,64,32], index: 9, kind: input, shape index: {}]   ;;  %s5061_s10 = inlined_call_operand.hbm [shape: bf16[32,5], index: 10, kind: input, shape index: {}]   ;;  %s5062_s11 = inlined_call_operand.hbm [shape: f32[1,5], index: 11, kind: input, shape index: {}]   ;;  %s5063_s12 = inlined_call_operand.hbm [shape: f32[5,5], index: 12, kind: input, shape index: {}]   ;;  %s5064_s13 = inlined_call_operand.hbm [shape: f32[2,5], index: 13, kind: input, shape index: {}]   ;;  %s5065_s14 = inlined_call_operand.hbm [shape: s32[2,8], index: 14, kind: output, shape index: {}]  }
   0x1   :  { %5096 = sst [smem:[#allocation44_spill]] %s5052_s1 }
   0x2   :  { %5097 = sst [smem:[#allocation45_spill]] %s5054_s3 }
   0x3   :  { %5098 = sst [smem:[#allocation46_spill]] %s5056_s5 }
   0x4   :  { %5099 = sst [smem:[#allocation47_spill]] %s5058_s7 }
   0x5   :  { %5100 = sst [smem:[#allocation48_spill]] %s5059_s8 }
   0x6   :  { %5101 = sst [smem:[#allocation49_spill]] %s5060_s9 }
   0x7   :  { %5102 = sst [smem:[#allocation50_spill]] %s5061_s10 }
   0x8   :  { %5103 = sst [smem:[#allocation51_spill]] %s5062_s11 }
   0x9   :  { %5104 = sst [smem:[#allocation52_spill]] %s5065_s14 }
   0xa   :  { %19 = vsyncpa [#allocation4], 0 }
   0xb   :  { %20 = vsyncpa [#allocation7], 0 }
   0xc   :  { %21 = vsyncpa [#allocation10], 0 }
   0xd   :  { %23 = vsyncpa [#allocation10 + $0x1], 0 }
   0xe   :  { %24 = vsyncpa [#allocation13], 0 }
   0xf   :  { %26 = vsyncpa [#allocation13 + $0x1], 0 }
  0x10   :  { %27 = vsyncpa [#allocation16], 0 }
  0x11   :  { %29 = vsyncpa [#allocation16 + $0x1], 0 }
  0x12   :  { %30 = vsyncpa [#allocation19], 0 }
  0x13   :  { %32 = vsyncpa [#allocation19 + $0x1], 0 }
  0x14   :  { %33 = vsyncpa [#allocation22], 0 }
  0x15   :  { %34 = vsyncpa [#allocation25], 0 }
  0x16   :  { %35 = vsyncpa [#allocation5], 0  ;;  %s3937_s29 = smov 0   ;;  %s3939_s30 = smov 0  }
  0x17   :  { %s3941_s15 = smov 0   ;;  %s3943_s16 = smov 0  }
  0x18 LB: > { %5105 = sst [smem:[#allocation37_spill]] %s3814_s30  ;;  %s3824_s17 = smov [#allocation6]   ;;  %s3822_s16 = sphi %s3943_s16, %s5159_s16   ;;  %s3818_s15 = sphi %s3941_s15, %s5162_s15   ;;  %s3814_s30 = sphi %s3939_s30, %s5161_s30   ;;  %s3810_s29 = sphi %s3937_s29, %s5160_s29  }
  0x19   : > { %5106 = sst [smem:[#allocation38_spill]] %s3818_s15  ;;  %s422_s18 = sshll.u32 %s3824_s17, 4  ;;  %s423_s18 = int_to_ptr.vmem [resolvable:$true] %s422_s18 }
  0x1a   : > { %s3958_s19 = sadd.s32 4294967295, %s3822_s16   ;;  %p2880_p0 = scmp.ge.s32.totalorder %s3822_s16, 1 }
  0x1b   : > { %5107 = sst [smem:[#allocation39_spill]] %s3958_s19  ;;  %p5068_p1 = scmp.eq.s32.totalorder %s3958_s19, 0 }
  0x1c   : > { %p396_p2 = scmp.lt.s32.totalorder %s3822_s16, 3  ;;  %s3825_s21 = smov [#allocation20]  }
  0x1d   : > { %s443_s22 = sshll.u32 %s3825_s21, 4  ;;  %s3826_s24 = smov [#allocation21]   ;;  %s3970_s22 = int_to_ptr.vmem [resolvable:$true] %s443_s22 }
  0x1e   : > { %p3964_p4 = pnand %p2880_p0, %p396_p2  ;;  %s457_s25 = sshll.u32 %s3826_s24, 4  ;;  %s3978_s25 = int_to_ptr.vmem [resolvable:$true] %s457_s25 }
  0x1f   : > { %s5111_s1 = sld [smem:[#allocation44_spill]] }
  0x20   : > { %s5108_s20 = scalar_select %p3964_p4, 1, 0 }
  0x21   : > { %p3134_p5 = pneg %p3964_p4 }
  0x22   : > { %5109 = sst [smem:[#allocation40_spill]] %s5108_s20 }
  0x23   : > { %p3974_p6 = pnand %p3134_p5, %p5068_p1 }
  0x25   : > { %s5110_s23 = scalar_select %p3974_p6, 1, 0 }
  0x26   : > { %s3320_s28 = scalar_lea.hbm %s5111_s1, 32  ;;  %p3988_p8 = pneg %p3974_p6 }
  0x27   : > { %p3321_p7 = scmp.ne.s32.totalorder %s5111_s1, %s3320_s28  ;;  %p3327_p11 = scmp.lt.u32.totalorder %s3320_s28, %s5111_s1 }
  0x28   : > { %s5112_s21 = scalar_select %p3988_p8, 1, 0 }
  0x29   : > { %p3323_p9 = pnand %p3988_p8, %p3321_p7 }
  0x2b   : > { %p3324_p10 = pneg %p3323_p9 }
  0x2d   : > { %p3329_p12 = pnand %p3327_p11, %p3324_p10 }
  0x2f   : > { %3332 = shalt.err (!%p3329_p12)
}
  0x30   : > { %s3333_s26 = scalar_lea.vmem %s423_s18, 32  ;;  %p3341_p5 = scmp.lt.s32.totalorder %s423_s18, %s423_s18 }
  0x31   : > { %p3334_p13 = scmp.ne.s32.totalorder %s423_s18, %s3333_s26  ;;  %p3342_p3 = scmp.lt.s32.totalorder %s3333_s26, %s3333_s26 }
  0x33   : > { %p3336_p0 = pnand %p3334_p13, %p3988_p8  ;;  %p3343_p1 = por %p3342_p3, %p3341_p5 }
  0x35   : > { %p3337_p2 = pneg %p3336_p0 }
  0x37   : > { %p3344_p4 = pnand %p3343_p1, %p3337_p2 }
  0x39   : > { %3347 = shalt.err (!%p3344_p4)
}
  0x3a   : > { %3140 = dma.hbm_to_vmem [thread:$0]  (!%p3974_p6), %s5111_s1, 32, %s423_s18, [#allocation7]  }
  0x3b   : > { %s5113_s10 = sld [smem:[#allocation50_spill]] }
  0x41   : > { %s3348_s17 = scalar_lea.hbm %s5113_s10, 256 }
  0x42   : > { %p3349_p7 = scmp.ne.s32.totalorder %s5113_s10, %s3348_s17  ;;  %p3355_p1 = scmp.lt.u32.totalorder %s3348_s17, %s5113_s10 }
  0x44   : > { %p3351_p9 = pnand %p3349_p7, %p3988_p8 }
  0x46   : > { %p3352_p3 = pneg %p3351_p9 }
  0x48   : > { %p3357_p4 = pnand %p3355_p1, %p3352_p3 }
  0x4a   : > { %3360 = shalt.err (!%p3357_p4)
}
  0x4b   : > { %s3361_s18 = scalar_lea.vmem %s3970_s22, 256  ;;  %p3369_p13 = scmp.lt.s32.totalorder %s3970_s22, %s3970_s22 }
  0x4c   : > { %p3362_p10 = scmp.ne.s32.totalorder %s3970_s22, %s3361_s18  ;;  %p3370_p0 = scmp.lt.s32.totalorder %s3361_s18, %s3361_s18 }
  0x4e   : > { %p3364_p11 = pnand %p3362_p10, %p3988_p8  ;;  %p3371_p2 = por %p3370_p0, %p3369_p13 }
  0x50   : > { %p3365_p12 = pneg %p3364_p11 }
  0x52   : > { %p3372_p5 = pnand %p3371_p2, %p3365_p12 }
  0x54   : > { %3375 = shalt.err (!%p3372_p5)
}
  0x55   : > { %s5072_s9 = smov 64   ;;  %s5074_s8 = smov 4  }
  0x56   : > { %3146 = dma.hbm_to_vmem [thread:$0]  (!%p3974_p6), %s5113_s10, 256, %s3970_s22, [#allocation19], %s5072_s9, %s5072_s9, %s5074_s8  }
  0x57   : > { %s5114_s11 = sld [smem:[#allocation51_spill]] }
  0x5d   : > { %s3376_s17 = scalar_lea.hbm %s5114_s11, 16 }
  0x5e   : > { %p3377_p7 = scmp.ne.s32.totalorder %s5114_s11, %s3376_s17  ;;  %p3383_p1 = scmp.lt.u32.totalorder %s3376_s17, %s5114_s11 }
  0x60   : > { %p3379_p9 = pnand %p3377_p7, %p3988_p8 }
  0x62   : > { %p3380_p3 = pneg %p3379_p9 }
  0x64   : > { %p3385_p4 = pnand %p3383_p1, %p3380_p3 }
  0x66   : > { %3388 = shalt.err (!%p3385_p4)
}
  0x67   : > { %s3389_s22 = scalar_lea.vmem %s3978_s25, 16  ;;  %s3396_s14 = scalar_lea.vmem %s3978_s25, 32 }
  0x68   : > { %p3390_p10 = scmp.ne.s32.totalorder %s3978_s25, %s3389_s22  ;;  %p3397_p13 = scmp.lt.s32.totalorder %s3978_s25, %s3978_s25 }
  0x69   : > { %p3398_p0 = scmp.lt.s32.totalorder %s3396_s14, %s3389_s22 }
  0x6a   : > { %p3392_p11 = pnand %p3390_p10, %p3988_p8 }
  0x6b   : > { %p3399_p2 = por %p3398_p0, %p3397_p13 }
  0x6c   : > { %p3393_p12 = pneg %p3392_p11 }
  0x6e   : > { %p3400_p5 = pnand %p3399_p2, %p3393_p12 }
  0x70   : > { %3403 = shalt.err (!%p3400_p5)
}
  0x71   : > { %3149 = dma.hbm_to_vmem [thread:$0]  (!%p3974_p6), %s5114_s11, 16, %s3978_s25, [#allocation22]  }
  0x72   : > { %s4055_s20 = sadd.s32 1, %s3822_s16   ;;  %s111_s17 = sadd.s32 1, %s3818_s15 }
  0x73   : > { %5115 = sst [smem:[#allocation41_spill]] %s4055_s20  ;;  %s108_s28 = ssub.s32 %s3822_s16, %s4055_s20 }
  0x74   : > { %p109_p7 = scmp.eq.s32.totalorder %s108_s28, 0  ;;  %p118_p9 = scmp.ne.s32.totalorder %s3818_s15, %s3814_s30 }
  0x75   : > { %p119_p3 = scmp.eq.s32.totalorder %s3822_s16, 0  ;;  %p124_p1 = scmp.ne.s32.totalorder %s3814_s30, %s3810_s29 }
  0x76   : > { %s4066_s24 = scalar_select %p109_p7, %s3818_s15, %s111_s17  }
  0x77   : > { %p120_p4 = por %p119_p3, %p118_p9  ;;  %p5117_p10 = scmp.eq.s32.totalorder %s3958_s19, 0 }
  0x78   : > { %5116 = sst [smem:[#allocation42_spill]] %s4066_s24  ;;  %p3185_p12 = scmp.lt.s32.totalorder %s3822_s16, 2 }
  0x79   : > { %p4070_p11 = por %p5117_p10, %p124_p1  ;;  %s4076_s18 = sand.u32 1, %s3822_s16  }
  0x7a   : > { %s4079_s25 = sand.u32 1, %s3818_s15   ;;  %s4085_s14 = sshll.u32 %s3822_s16, 8 }
  0x7b   : > { %s5118_s26 = scalar_select %p4070_p11, 1, 0 }
  0x7c   : > { %s4082_s22 = sshll.u32 %s4079_s25, 4  ;;  %s5120_s3 = sld [smem:[#allocation45_spill]] }
  0x7d   : > { %5119 = sst [smem:[#allocation43_spill]] %s5118_s26  ;;  %s494_s28 = scalar_lea.vmem [#allocation9], %s4082_s22 }
  0x7e   : > { %s501_s17 = sshll.u32 %s494_s28, 4  ;;  %p4094_p13 = pnand %p3185_p12, %p120_p4  ;;  %s4098_s17 = int_to_ptr.vmem [resolvable:$true] %s501_s17 }
  0x80   : > { %s5121_s9 = scalar_select %p4094_p13, 1, 0 }
  0x81   : > { %p4105_p2 = pneg %p4094_p13 }
  0x82   : > { %s4091_s27 = scalar_lea.hbm %s5120_s3, %s4085_s14  ;;  %s3409_s11 = scalar_lea.hbm %s5120_s3, 512 }
  0x83   : > { %s3404_s10 = scalar_lea.hbm %s4091_s27, 256  ;;  %p3410_p9 = scmp.lt.u32.totalorder %s4091_s27, %s5120_s3 }
  0x84   : > { %p3405_p0 = scmp.ne.s32.totalorder %s4091_s27, %s3404_s10  ;;  %p3411_p3 = scmp.lt.u32.totalorder %s3409_s11, %s3404_s10 }
  0x85   : > { %s5122_s29 = scalar_select %p4105_p2, 1, 0 }
  0x86   : > { %p3407_p5 = pnand %p4105_p2, %p3405_p0  ;;  %p3412_p1 = por %p3411_p3, %p3410_p9 }
  0x87   : > { %p3413_p4 = scmp.lt.u32.totalorder %s3404_s10, %s4091_s27 }
  0x88   : > { %p3408_p7 = pneg %p3407_p5 }
  0x89   : > { %p3414_p10 = por %p3413_p4, %p3412_p1 }
  0x8b   : > { %p3415_p12 = pnand %p3414_p10, %p3408_p7 }
  0x8d   : > { %3418 = shalt.err (!%p3415_p12)
}
  0x8e   : > { %s3419_s8 = scalar_lea.vmem %s4098_s17, 256  ;;  %s3829_s1 = smov [#allocation9]  }
  0x8f   : > { %p3420_p0 = scmp.ne.s32.totalorder %s4098_s17, %s3419_s8  ;;  %s3424_s28 = sshll.u32 %s3829_s1, 4  ;;  %s3425_s28 = int_to_ptr.vmem [resolvable:$false] %s3424_s28 }
  0x90   : > { %s3426_s15 = scalar_lea.vmem %s3425_s28, 512  ;;  %p3427_p6 = scmp.lt.s32.totalorder %s4098_s17, %s3425_s28 }
  0x91   : > { %p3422_p5 = pnand %p3420_p0, %p4105_p2  ;;  %p3428_p8 = scmp.lt.s32.totalorder %s3426_s15, %s3419_s8 }
  0x93   : > { %p3423_p11 = pneg %p3422_p5  ;;  %p3429_p9 = por %p3428_p8, %p3427_p6 }
  0x95   : > { %p3430_p3 = pnand %p3429_p9, %p3423_p11 }
  0x97   : > { %3433 = shalt.err (!%p3430_p3)
}
  0x98   : > { %s5123_s10 = smov 4   ;;  %s5124_s11 = smov 64  }
  0x99   : > { %s5125_s24 = scalar_lea.sflag [#allocation10], %s4076_s18  ;;  %s5126_s5 = sld [smem:[#allocation46_spill]] }
  0x9a   : > { %3159 = dma.hbm_to_vmem [thread:$0]  (!%p4094_p13), %s4091_s27, 256, %s4098_s17, %s5125_s24, %s5124_s11, %s5124_s11, %s5123_s10  }
  0x9b   : > { %s532_s15 = scalar_lea.vmem [#allocation12], %s4082_s22  ;;  %s5090_s20 = scalar_lea.sflag [#allocation13], %s4076_s18 }
  0x9c   : > { %s539_s3 = sshll.u32 %s532_s15, 4  ;;  %s4140_s3 = int_to_ptr.vmem [resolvable:$true] %s539_s3 }
  0x9f   : > { %s4137_s8 = scalar_lea.hbm %s5126_s5, %s4085_s14  ;;  %s3439_s24 = scalar_lea.hbm %s5126_s5, 512 }
  0xa0   : > { %s3434_s26 = scalar_lea.hbm %s4137_s8, 256  ;;  %p3440_p7 = scmp.lt.u32.totalorder %s4137_s8, %s5126_s5 }
  0xa1   : > { %p3435_p6 = scmp.ne.s32.totalorder %s4137_s8, %s3434_s26  ;;  %p3441_p1 = scmp.lt.u32.totalorder %s3439_s24, %s3434_s26 }
  0xa2   : > { %p3443_p10 = scmp.lt.u32.totalorder %s3434_s26, %s4137_s8 }
  0xa3   : > { %p3437_p8 = pnand %p3435_p6, %p4105_p2  ;;  %p3442_p4 = por %p3441_p1, %p3440_p7 }
  0xa5   : > { %p3438_p11 = pneg %p3437_p8  ;;  %p3444_p12 = por %p3443_p10, %p3442_p4 }
  0xa7   : > { %p3445_p0 = pnand %p3444_p12, %p3438_p11 }
  0xa9   : > { %3448 = shalt.err (!%p3445_p0)
}
  0xaa   : > { %s3449_s15 = scalar_lea.vmem %s4140_s3, 256  ;;  %s3830_s27 = smov [#allocation12]  }
  0xab   : > { %p3450_p5 = scmp.ne.s32.totalorder %s4140_s3, %s3449_s15  ;;  %s3454_s17 = sshll.u32 %s3830_s27, 4  ;;  %s3455_s17 = int_to_ptr.vmem [resolvable:$false] %s3454_s17 }
  0xac   : > { %s3456_s1 = scalar_lea.vmem %s3455_s17, 512  ;;  %p3457_p6 = scmp.lt.s32.totalorder %s4140_s3, %s3455_s17 }
  0xad   : > { %p3452_p9 = pnand %p3450_p5, %p4105_p2  ;;  %p3458_p8 = scmp.lt.s32.totalorder %s3456_s1, %s3449_s15 }
  0xaf   : > { %p3453_p3 = pneg %p3452_p9  ;;  %p3459_p7 = por %p3458_p8, %p3457_p6 }
  0xb1   : > { %p3460_p1 = pnand %p3459_p7, %p3453_p3 }
  0xb3   : > { %3463 = shalt.err (!%p3460_p1)
}
  0xb4   : > { %3165 = dma.hbm_to_vmem [thread:$0]  (!%p4094_p13), %s4137_s8, 256, %s4140_s3, %s5090_s20, %s5124_s11, %s5124_s11, %s5123_s10  }
  0xb5   : > { %s5127_s7 = sld [smem:[#allocation47_spill]]  ;;  %s571_s15 = scalar_lea.vmem [#allocation15], %s4082_s22 }
  0xb6   : > { %s578_s27 = sshll.u32 %s571_s15, 4  ;;  %s3831_s17 = smov [#allocation3]   ;;  %s4176_s27 = int_to_ptr.vmem [resolvable:$true] %s578_s27 }
  0xb7   : > { %s4178_s1 = sshll.u32 %s3831_s17, 4  ;;  %s5089_s5 = scalar_lea.sflag [#allocation16], %s4076_s18  ;;  %s409_s1 = int_to_ptr.vmem [resolvable:$true] %s4178_s1 }
  0xbb   : > { %s4173_s28 = scalar_lea.hbm %s5127_s7, %s4085_s14  ;;  %s3469_s8 = scalar_lea.hbm %s5127_s7, 512 }
  0xbc   : > { %s3464_s30 = scalar_lea.hbm %s4173_s28, 256  ;;  %p3470_p12 = scmp.lt.u32.totalorder %s4173_s28, %s5127_s7 }
  0xbd   : > { %p3465_p11 = scmp.ne.s32.totalorder %s4173_s28, %s3464_s30  ;;  %p3471_p0 = scmp.lt.u32.totalorder %s3469_s8, %s3464_s30 }
  0xbe   : > { %p3473_p9 = scmp.lt.u32.totalorder %s3464_s30, %s4173_s28 }
  0xbf   : > { %p3467_p4 = pnand %p3465_p11, %p4105_p2  ;;  %p3472_p5 = por %p3471_p0, %p3470_p12 }
  0xc1   : > { %p3468_p10 = pneg %p3467_p4  ;;  %p3474_p3 = por %p3473_p9, %p3472_p5 }
  0xc3   : > { %p3475_p6 = pnand %p3474_p3, %p3468_p10 }
  0xc5   : > { %3478 = shalt.err (!%p3475_p6)
}
  0xc6   : > { %s3479_s22 = scalar_lea.vmem %s4176_s27, 256  ;;  %s3832_s15 = smov [#allocation15]  }
  0xc7   : > { %p3480_p8 = scmp.ne.s32.totalorder %s4176_s27, %s3479_s22  ;;  %s3484_s17 = sshll.u32 %s3832_s15, 4  ;;  %s3485_s17 = int_to_ptr.vmem [resolvable:$false] %s3484_s17 }
  0xc8   : > { %s3486_s3 = scalar_lea.vmem %s3485_s17, 512  ;;  %p3487_p11 = scmp.lt.s32.totalorder %s4176_s27, %s3485_s17 }
  0xc9   : > { %p3482_p7 = pnand %p3480_p8, %p4105_p2  ;;  %p3488_p4 = scmp.lt.s32.totalorder %s3486_s3, %s3479_s22 }
  0xcb   : > { %p3483_p1 = pneg %p3482_p7  ;;  %p3489_p12 = por %p3488_p4, %p3487_p11 }
  0xcd   : > { %p3490_p0 = pnand %p3489_p12, %p3483_p1 }
  0xcf   : > { %3493 = shalt.err (!%p3490_p0)
}
  0xd0   : > { %3171 = dma.hbm_to_vmem [thread:$0]  (!%p4094_p13), %s4173_s28, 256, %s4176_s27, %s5089_s5, %s5124_s11, %s5124_s11, %s5123_s10  }
  0xd1   : > { %s3494_s8 = scalar_lea.hbm %s5051_s0, 256  ;;  %p5128_p5 = scmp.ne.s32.totalorder %s5112_s21, 0 }
  0xd2   : > { %p3495_p10 = scmp.ne.s32.totalorder %s5051_s0, %s3494_s8  ;;  %p3501_p6 = scmp.lt.u32.totalorder %s3494_s8, %s5051_s0 }
  0xd4   : > { %p3497_p9 = pnand %p3495_p10, %p5128_p5 }
  0xd6   : > { %p3498_p3 = pneg %p3497_p9 }
  0xd8   : > { %p3503_p8 = pnand %p3501_p6, %p3498_p3 }
  0xda   : > { %3506 = shalt.err (!%p3503_p8)
}
  0xdb   : > { %s3507_s17 = scalar_lea.vmem %s409_s1, 256  ;;  %p3515_p4 = scmp.lt.s32.totalorder %s409_s1, %s409_s1 }
  0xdc   : > { %p3508_p7 = scmp.ne.s32.totalorder %s409_s1, %s3507_s17  ;;  %p3516_p12 = scmp.lt.s32.totalorder %s3507_s17, %s3507_s17 }
  0xde   : > { %p3510_p1 = pnand %p3508_p7, %p5128_p5  ;;  %p3517_p0 = por %p3516_p12, %p3515_p4 }
  0xe0   : > { %p3511_p11 = pneg %p3510_p1 }
  0xe2   : > { %p3518_p13 = pnand %p3517_p0, %p3511_p11 }
  0xe4   : > { %3521 = shalt.err (!%p3518_p13)
}
  0xe5   : > { %s3833_s28 = smov 128   ;;  %s3834_s27 = smov 8  }
  0xe6   : > { %p5129_p10 = scmp.ne.s32.totalorder %s5110_s23, 0  ;;  %s3835_s14 = smov [#allocation8]  }
  0xe7   : > { %s433_s8 = sshll.u32 %s3835_s14, 4  ;;  %s3836_s26 = smov [#allocation23]   ;;  %s434_s8 = int_to_ptr.vmem [resolvable:$true] %s433_s8 }
  0xe8   : > { %3137 = dma.hbm_to_vmem [thread:$0]  (!%p5129_p10), %s5051_s0, 256, %s409_s1, [#allocation4], %s3833_s28, %s3833_s28, %s3834_s27  }
  0xe9   : > { %s468_s24 = sshll.u32 %s3836_s26, 4  ;;  %s3522_s17 = scalar_lea.hbm %s5053_s2, 32  ;;  %s469_s24 = int_to_ptr.vmem [resolvable:$true] %s468_s24 }
  0xea   : > { %p3523_p13 = scmp.ne.s32.totalorder %s5053_s2, %s3522_s17  ;;  %p3529_p6 = scmp.lt.u32.totalorder %s3522_s17, %s5053_s2 }
  0xec   : > { %p3525_p9 = pnand %p3523_p13, %p5128_p5 }
  0xee   : > { %p3526_p3 = pneg %p3525_p9 }
  0xf0   : > { %p3531_p8 = pnand %p3529_p6, %p3526_p3 }
  0xf2   : > { %3534 = shalt.err (!%p3531_p8)
}
  0xf3   : > { %s3535_s1 = scalar_lea.vmem %s434_s8, 32  ;;  %p3543_p4 = scmp.lt.s32.totalorder %s434_s8, %s434_s8 }
  0xf4   : > { %p3536_p7 = scmp.ne.s32.totalorder %s434_s8, %s3535_s1  ;;  %p3544_p12 = scmp.lt.s32.totalorder %s3535_s1, %s3535_s1 }
  0xf6   : > { %p3538_p1 = pnand %p3536_p7, %p5128_p5  ;;  %p3545_p0 = por %p3544_p12, %p3543_p4 }
  0xf8   : > { %p3539_p11 = pneg %p3538_p1 }
  0xfa   : > { %p3546_p2 = pnand %p3545_p0, %p3539_p11 }
  0xfc   : > { %3549 = shalt.err (!%p3546_p2)
}
  0xfd   : > { %3143 = dma.hbm_to_vmem [thread:$0]  (!%p5129_p10), %s5053_s2, 32, %s434_s8, [#allocation7]  }
  0xfe   : > { %s3550_s28 = scalar_lea.hbm %s5063_s12, 128 }
  0xff   : > { %p3551_p13 = scmp.ne.s32.totalorder %s5063_s12, %s3550_s28  ;;  %p3557_p2 = scmp.lt.u32.totalorder %s3550_s28, %s5063_s12 }
 0x101   : > { %p3553_p9 = pnand %p3551_p13, %p5128_p5 }
 0x103   : > { %p3554_p3 = pneg %p3553_p9 }
 0x105   : > { %p3559_p6 = pnand %p3557_p2, %p3554_p3 }
 0x107   : > { %3562 = shalt.err (!%p3559_p6)
}
 0x108   : > { %s3563_s26 = scalar_lea.vmem %s469_s24, 128  ;;  %p3571_p11 = scmp.lt.s32.totalorder %s469_s24, %s469_s24 }
 0x109   : > { %p3564_p8 = scmp.ne.s32.totalorder %s469_s24, %s3563_s26  ;;  %p3572_p4 = scmp.lt.s32.totalorder %s3563_s26, %s3563_s26 }
 0x10b   : > { %p3566_p7 = pnand %p3564_p8, %p5128_p5  ;;  %p3573_p12 = por %p3572_p4, %p3571_p11 }
 0x10d   : > { %p3567_p1 = pneg %p3566_p7 }
 0x10f   : > { %p3574_p0 = pnand %p3573_p12, %p3567_p1 }
 0x111   : > { %3577 = shalt.err (!%p3574_p0)
}
 0x112   : > { %3152 = dma.hbm_to_vmem [thread:$0]  (!%p5129_p10), %s5063_s12, 128, %s469_s24, [#allocation22]  }
 0x113   : > { %s3837_s15 = smov [#allocation24]   ;;  %s2892_s1 = sshll.u32 %s3822_s16, 4 }
 0x114   : > { %s479_s17 = sshll.u32 %s3837_s15, 4  ;;  %s3578_s7 = scalar_lea.hbm %s5064_s13, 32  ;;  %s480_s17 = int_to_ptr.vmem [resolvable:$true] %s479_s17 }
 0x115   : > { %p3579_p13 = scmp.ne.s32.totalorder %s5064_s13, %s3578_s7  ;;  %p3585_p2 = scmp.lt.u32.totalorder %s3578_s7, %s5064_s13 }
 0x117   : > { %p3581_p9 = pnand %p3579_p13, %p5128_p5 }
 0x119   : > { %p3582_p3 = pneg %p3581_p9 }
 0x11b   : > { %p3587_p6 = pnand %p3585_p2, %p3582_p3 }
 0x11d   : > { %3590 = shalt.err (!%p3587_p6)
}
 0x11e   : > { %s3591_s24 = scalar_lea.vmem %s480_s17, 32  ;;  %p3599_p11 = scmp.lt.s32.totalorder %s480_s17, %s480_s17 }
 0x11f   : > { %p3592_p8 = scmp.ne.s32.totalorder %s480_s17, %s3591_s24  ;;  %p3600_p4 = scmp.lt.s32.totalorder %s3591_s24, %s3591_s24 }
 0x121   : > { %p3594_p7 = pnand %p3592_p8, %p5128_p5  ;;  %p3601_p12 = por %p3600_p4, %p3599_p11 }
 0x123   : > { %p3595_p1 = pneg %p3594_p7 }
 0x125   : > { %p3602_p0 = pnand %p3601_p12, %p3595_p1 }
 0x127   : > { %3605 = shalt.err (!%p3602_p0)
}
 0x128   : > { %3155 = dma.hbm_to_vmem [thread:$0]  (!%p5129_p10), %s5064_s13, 32, %s480_s17, [#allocation25]  }
 0x129   : > { %s4286_s8 = scalar_lea.hbm %s5055_s4, %s2892_s1  ;;  %s514_s22 = scalar_lea.vmem [#allocation11], %s4079_s25 }
 0x12a   : > { %s521_s23 = sshll.u32 %s514_s22, 4  ;;  %s2896_s15 = sshll.u32 %s4079_s25, 3  ;;  %s522_s23 = int_to_ptr.vmem [resolvable:$true] %s521_s23 }
 0x12b   : > { %s3606_s5 = scalar_lea.hbm %s4286_s8, 16  ;;  %p5130_p13 = scmp.ne.s32.totalorder %s5122_s29, 0 }
 0x12c   : > { %p3607_p5 = scmp.ne.s32.totalorder %s4286_s8, %s3606_s5  ;;  %s3611_s7 = scalar_lea.hbm %s5055_s4, 32 }
 0x12d   : > { %p3612_p10 = scmp.lt.u32.totalorder %s4286_s8, %s5055_s4  ;;  %p3613_p2 = scmp.lt.u32.totalorder %s3611_s7, %s3606_s5 }
 0x12e   : > { %p3609_p9 = pnand %p3607_p5, %p5130_p13  ;;  %p3615_p8 = scmp.lt.u32.totalorder %s3606_s5, %s4286_s8 }
 0x12f   : > { %p3614_p6 = por %p3613_p2, %p3612_p10 }
 0x130   : > { %p3610_p3 = pneg %p3609_p9 }
 0x131   : > { %p3616_p7 = por %p3615_p8, %p3614_p6 }
 0x133   : > { %p3617_p1 = pnand %p3616_p7, %p3610_p3 }
 0x135   : > { %3620 = shalt.err (!%p3617_p1)
}
 0x136   : > { %s3621_s27 = scalar_lea.vmem %s522_s23, 16  ;;  %s3838_s3 = smov [#allocation11]  }
 0x137   : > { %p3622_p11 = scmp.ne.s32.totalorder %s522_s23, %s3621_s27  ;;  %s3626_s24 = sshll.u32 %s3838_s3, 4  ;;  %s3627_s24 = int_to_ptr.vmem [resolvable:$false] %s3626_s24 }
 0x138   : > { %s3628_s30 = scalar_lea.vmem %s3627_s24, 32  ;;  %p3629_p0 = scmp.lt.s32.totalorder %s522_s23, %s3627_s24 }
 0x139   : > { %p3624_p4 = pnand %p3622_p11, %p5130_p13  ;;  %p3630_p5 = scmp.lt.s32.totalorder %s3628_s30, %s3621_s27 }
 0x13b   : > { %p3625_p12 = pneg %p3624_p4  ;;  %p3631_p9 = por %p3630_p5, %p3629_p0 }
 0x13d   : > { %p3632_p2 = pnand %p3631_p9, %p3625_p12 }
 0x13f   : > { %3635 = shalt.err (!%p3632_p2)
}
 0x140   : > { %p5131_p10 = scmp.ne.s32.totalorder %s5121_s9, 0  ;;  %s5132_s14 = scalar_lea.sflag [#allocation10], %s4076_s18 }
 0x141   : > { %s2897_s26 = sshll.u32 %s3822_s16, 7  ;;  %s553_s17 = scalar_lea.vmem [#allocation14], %s2896_s15 }
 0x142   : > { %3162 = dma.hbm_to_vmem [thread:$0]  (!%p5131_p10), %s4286_s8, 16, %s522_s23, %s5132_s14  }
 0x143   : > { %s4313_s5 = scalar_lea.hbm %s5057_s6, %s2897_s26  ;;  %s560_s20 = sshll.u32 %s553_s17, 4  ;;  %s561_s20 = int_to_ptr.vmem [resolvable:$true] %s560_s20 }
 0x144   : > { %s3636_s7 = scalar_lea.hbm %s4313_s5, 128  ;;  %s3641_s19 = scalar_lea.hbm %s5057_s6, 256 }
 0x145   : > { %p3637_p3 = scmp.ne.s32.totalorder %s4313_s5, %s3636_s7  ;;  %p3642_p7 = scmp.lt.u32.totalorder %s4313_s5, %s5057_s6 }
 0x146   : > { %p3643_p1 = scmp.lt.u32.totalorder %s3641_s19, %s3636_s7  ;;  %p3645_p4 = scmp.lt.u32.totalorder %s3636_s7, %s4313_s5 }
 0x147   : > { %p3639_p6 = pnand %p3637_p3, %p5130_p13 }
 0x148   : > { %p3644_p11 = por %p3643_p1, %p3642_p7 }
 0x149   : > { %p3640_p8 = pneg %p3639_p6 }
 0x14a   : > { %p3646_p12 = por %p3645_p4, %p3644_p11 }
 0x14c   : > { %p3647_p0 = pnand %p3646_p12, %p3640_p8 }
 0x14e   : > { %3650 = shalt.err (!%p3647_p0)
}
 0x14f   : > { %s3651_s15 = scalar_lea.vmem %s561_s20, 128  ;;  %s3839_s3 = smov [#allocation14]  }
 0x150   : > { %p3652_p5 = scmp.ne.s32.totalorder %s561_s20, %s3651_s15  ;;  %s3656_s24 = sshll.u32 %s3839_s3, 4  ;;  %s3657_s24 = int_to_ptr.vmem [resolvable:$false] %s3656_s24 }
 0x151   : > { %s3658_s30 = scalar_lea.vmem %s3657_s24, 256  ;;  %p3659_p3 = scmp.lt.s32.totalorder %s561_s20, %s3657_s24 }
 0x152   : > { %p3654_p9 = pnand %p3652_p5, %p5130_p13  ;;  %p3660_p6 = scmp.lt.s32.totalorder %s3658_s30, %s3651_s15 }
 0x154   : > { %p3655_p2 = pneg %p3654_p9  ;;  %p3661_p10 = por %p3660_p6, %p3659_p3 }
 0x156   : > { %p3662_p1 = pnand %p3661_p10, %p3655_p2 }
 0x158   : > { %3665 = shalt.err (!%p3662_p1)
}
 0x159   : > { %p5133_p7 = scmp.ne.s32.totalorder %s5121_s9, 0  ;;  %s5134_s14 = scalar_lea.sflag [#allocation13], %s4076_s18 }
 0x15a   : > { %s5135_s22 = sld [smem:[#allocation48_spill]]  ;;  %s591_s7 = scalar_lea.vmem [#allocation17], %s4079_s25 }
 0x15b   : > { %3168 = dma.hbm_to_vmem [thread:$0]  (!%p5133_p7), %s4313_s5, 128, %s561_s20, %s5134_s14  }
 0x15c   : > { %s598_s8 = sshll.u32 %s591_s7, 4  ;;  %s599_s8 = int_to_ptr.vmem [resolvable:$true] %s598_s8 }
 0x160   : > { %s4341_s17 = scalar_lea.hbm %s5135_s22, %s2892_s1  ;;  %s3671_s20 = scalar_lea.hbm %s5135_s22, 32 }
 0x161   : > { %s3666_s23 = scalar_lea.hbm %s4341_s17, 16  ;;  %p3672_p4 = scmp.lt.u32.totalorder %s4341_s17, %s5135_s22 }
 0x162   : > { %p3667_p10 = scmp.ne.s32.totalorder %s4341_s17, %s3666_s23  ;;  %p3673_p12 = scmp.lt.u32.totalorder %s3671_s20, %s3666_s23 }
 0x163   : > { %p3675_p5 = scmp.lt.u32.totalorder %s3666_s23, %s4341_s17 }
 0x164   : > { %p3669_p8 = pnand %p3667_p10, %p5130_p13  ;;  %p3674_p0 = por %p3673_p12, %p3672_p4 }
 0x166   : > { %p3670_p11 = pneg %p3669_p8  ;;  %p3676_p9 = por %p3675_p5, %p3674_p0 }
 0x168   : > { %p3677_p2 = pnand %p3676_p9, %p3670_p11 }
 0x16a   : > { %3680 = shalt.err (!%p3677_p2)
}
 0x16b   : > { %s3681_s1 = scalar_lea.vmem %s599_s8, 16  ;;  %s3840_s15 = smov [#allocation17]  }
 0x16c   : > { %p3682_p3 = scmp.ne.s32.totalorder %s599_s8, %s3681_s1  ;;  %s3686_s3 = sshll.u32 %s3840_s15, 4  ;;  %s3687_s3 = int_to_ptr.vmem [resolvable:$false] %s3686_s3 }
 0x16d   : > { %s3688_s24 = scalar_lea.vmem %s3687_s3, 32  ;;  %p3689_p10 = scmp.lt.s32.totalorder %s599_s8, %s3687_s3 }
 0x16e   : > { %p3684_p6 = pnand %p3682_p3, %p5130_p13  ;;  %p3690_p8 = scmp.lt.s32.totalorder %s3688_s24, %s3681_s1 }
 0x170   : > { %p3685_p1 = pneg %p3684_p6  ;;  %p3691_p7 = por %p3690_p8, %p3689_p10 }
 0x172   : > { %p3692_p4 = pnand %p3691_p7, %p3685_p1 }
 0x174   : > { %3695 = shalt.err (!%p3692_p4)
}
 0x175   : > { %p5136_p12 = scmp.ne.s32.totalorder %s5121_s9, 0  ;;  %s5137_s30 = scalar_lea.sflag [#allocation16], %s4076_s18 }
 0x176   : > { %s2902_s14 = sshll.u32 %s4079_s25, 5  ;;  %s2960_s26 = sshll.u32 %s3822_s16, 9 }
 0x177   : > { %3174 = dma.hbm_to_vmem [thread:$0]  (!%p5136_p12), %s4341_s17, 16, %s599_s8, %s5137_s30  }
 0x178   : > { %s5138_s23 = sld [smem:[#allocation49_spill]]  ;;  %s609_s5 = scalar_lea.vmem [#allocation18], %s2902_s14 }
 0x179   : > { %s616_s20 = sshll.u32 %s609_s5, 4  ;;  %s606_s28 = scalar_lea.sflag [#allocation19], %s4076_s18  ;;  %s4370_s20 = int_to_ptr.vmem [resolvable:$true] %s616_s20 }
 0x17e   : > { %s4368_s19 = scalar_lea.hbm %s5138_s23, %s2960_s26  ;;  %s3701_s17 = scalar_lea.hbm %s5138_s23, 1024 }
 0x17f   : > { %s3696_s27 = scalar_lea.hbm %s4368_s19, 512  ;;  %p3702_p5 = scmp.lt.u32.totalorder %s4368_s19, %s5138_s23 }
 0x180   : > { %p3697_p7 = scmp.ne.s32.totalorder %s4368_s19, %s3696_s27  ;;  %p3703_p9 = scmp.lt.u32.totalorder %s3701_s17, %s3696_s27 }
 0x181   : > { %p3705_p3 = scmp.lt.u32.totalorder %s3696_s27, %s4368_s19 }
 0x182   : > { %p3699_p11 = pnand %p3697_p7, %p5130_p13  ;;  %p3704_p2 = por %p3703_p9, %p3702_p5 }
 0x184   : > { %p3700_p0 = pneg %p3699_p11  ;;  %p3706_p6 = por %p3705_p3, %p3704_p2 }
 0x186   : > { %p3707_p1 = pnand %p3706_p6, %p3700_p0 }
 0x188   : > { %3710 = shalt.err (!%p3707_p1)
}
 0x189   : > { %s3711_s15 = scalar_lea.vmem %s4370_s20, 512  ;;  %s3841_s3 = smov [#allocation18]  }
 0x18a   : > { %p3712_p10 = scmp.ne.s32.totalorder %s4370_s20, %s3711_s15  ;;  %s3716_s24 = sshll.u32 %s3841_s3, 4  ;;  %s3717_s24 = int_to_ptr.vmem [resolvable:$false] %s3716_s24 }
 0x18b   : > { %s3718_s30 = scalar_lea.vmem %s3717_s24, 1024  ;;  %p3719_p7 = scmp.lt.s32.totalorder %s4370_s20, %s3717_s24 }
 0x18c   : > { %p3714_p8 = pnand %p3712_p10, %p5130_p13  ;;  %p3720_p11 = scmp.lt.s32.totalorder %s3718_s30, %s3711_s15 }
 0x18e   : > { %p3715_p4 = pneg %p3714_p8  ;;  %p3721_p5 = por %p3720_p11, %p3719_p7 }
 0x190   : > { %p3722_p9 = pnand %p3721_p5, %p3715_p4 }
 0x192   : > { %3725 = shalt.err (!%p3722_p9)
}
 0x193   : > { %3177 = dma.hbm_to_vmem [thread:$0]  (!%p5136_p12), %s4368_s19, 512, %s4370_s20, %s606_s28, %s5124_s11, %s5124_s11, %s5123_s10  }
 0x194   : > { %s5139_s29 = sld [smem:[#allocation40_spill]] }
 0x19a   : > { %p5140_p13 = scmp.ne.s32.totalorder %s5139_s29, 0 }
 0x19b   : > { %s5141_s14 = sld [smem:[#allocation39_spill]] (!%p5140_p13) }
 0x19c   : > { %628 = sbr.rel (%p5140_p13) target bundleno = 7474 (0x1d32), region = 76 }
 0x1a1   : > { %p5142_p0 = scmp.eq.s32.totalorder (!%p5140_p13), %s5141_s14, 0 }
 0x1a3   : > { %3769 = dma.done.wait (%p5142_p0), [#allocation4], 256   ;;  %p5143_p2 = pmov %p5142_p0 }
 0x1a4   : > { %p5144_p3 = pmov %p5142_p0 }
 0x1a5   : > { %3771 = vsyncadd (%p5143_p2), [#allocation4], 4294967040 }
 0x1a6   : > { %3773 = dma.done.wait (%p5144_p3), [#allocation7], 64   ;;  %p5145_p6 = pmov %p5142_p0 }
 0x1a7   : > { %s5146_s9 = sld [smem:[#allocation37_spill]]  ;;  %s5147_s18 = sld [smem:[#allocation43_spill]] }
 0x1a8   : > { %3775 = vsyncadd (%p5145_p6), [#allocation7], 4294967232  ;;  %s642_s26 = sand.u32 1, %s5141_s14  }
 0x1a9   : > { %s643_s21 = scalar_lea.sflag [#allocation10], %s642_s26 }
 0x1ad   : > { %s4411_s10 = sand.u32 1, %s5146_s9   ;;  %p5148_p12 = scmp.ne.s32.totalorder %s5147_s18, 0 }
 0x1ae   : > { %s4414_s11 = sshll.u32 %s4411_s10, 4 }
 0x1af   : > { %s646_s7 = scalar_lea.vmem [#allocation9], %s4414_s11 }
 0x1b0   : > { %3777 = dma.done.wait (%p5148_p12), %s643_s21, 272  }
 0x1b1   : > { %3779 = vsyncadd (%p5148_p12), %s643_s21, 4294967024  ;;  %s654_s19 = scalar_lea.vmem [#allocation11], %s4411_s10  ;;  %s660_s5 = scalar_lea.sflag [#allocation13], %s642_s26 }
 0x1b2   : > { %s663_s20 = scalar_lea.vmem [#allocation12], %s4414_s11 }
 0x1b3   : > { %3781 = dma.done.wait (%p5148_p12), %s660_s5, 384  }
 0x1b4   : > { %3783 = vsyncadd (%p5148_p12), %s660_s5, 4294966912  ;;  %s2911_s28 = sshll.u32 %s4411_s10, 3  ;;  %s678_s16 = scalar_lea.sflag [#allocation16], %s642_s26 }
 0x1b5   : > { %s4428_s27 = scalar_lea.vmem [#allocation14], %s2911_s28  ;;  %s681_s25 = scalar_lea.vmem [#allocation15], %s4414_s11 }
 0x1b6   : > { %3785 = dma.done.wait (%p5148_p12), %s678_s16, 272  }
 0x1b7   : > { %3787 = vsyncadd (%p5148_p12), %s678_s16, 4294967024  ;;  %s2913_s17 = sshll.u32 %s4411_s10, 5  ;;  %s689_s8 = scalar_lea.vmem [#allocation17], %s4411_s10 }
 0x1b8   : > { %s695_s1 = scalar_lea.sflag [#allocation19], %s642_s26  ;;  %s4437_s15 = scalar_lea.vmem [#allocation18], %s2913_s17 }
 0x1b9   : > { %3789 = dma.done.wait (%p5148_p12), %s695_s1, 512  }
 0x1ba   : > { %3791 = vsyncadd (%p5148_p12), %s695_s1, 4294966784  ;;  %p5149_p1 = pmov %p5142_p0 }
 0x1bb   : > { %p5150_p10 = pmov %p5142_p0 }
 0x1bc   : > { %3793 = dma.done.wait (%p5149_p1), [#allocation19], 256  }
 0x1bd   : > { %3795 = vsyncadd (%p5150_p10), [#allocation19], 4294967040  ;;  %p5151_p8 = pmov %p5142_p0 }
 0x1be   : > { %p5152_p4 = pmov %p5142_p0 }
 0x1bf   : > { %3797 = dma.done.wait (%p5151_p8), [#allocation22], 144  }
 0x1c0   : > { %3799 = vsyncadd (%p5152_p4), [#allocation22], 4294967152  ;;  %p5153_p7 = pmov %p5142_p0 }
 0x1c1   : > { %p5154_p11 = pmov %p5142_p0 }
 0x1c2   : > { %3801 = dma.done.wait (%p5153_p7), [#allocation25], 32  }
 0x1c3   : > { %3803 = vsyncadd (%p5154_p11), [#allocation25], 4294967264  ;;  %v790_v0 = vlaneseq  ;;  %v3842_v1 = vmov 1966171168   ;;  %v4458_v5 = vld [vmem:[#allocation6] sm:$0x3] }
 0x1c4   : > { %v788_v2 = vunpack.c.l.s4 %v3842_v1  ;;  %v784_v6 = vsub.f32 1.0, %v4458_v5  ;;  %p5155_p5 = scmp.ne.s32.totalorder %s5141_s14, 0 }
 0x1c5   : > { %v4456_v4 = vshrl.u32 %v790_v0, 7  ;;  %v813_v13 = vld [vmem:[#allocation3] sm:$0xff] (!%p5155_p5)  ;;  %vm817_vm0 = vcmask (!%p5155_p5), 261120   ;;  %v814_v14 = vld [vmem:[#allocation3 + $0x8] sm:$0xff] (!%p5155_p5)  ;;  %v2919_v34 = vld [vmem:[#allocation8] ss:$0 sm:$0xff] (!%p5155_p5) }
 0x1c6   : > { %v789_v3 = vunpack.c.0.s8 %v788_v2  ;;  %v785_v8 = vmul.f32 -1e+09, %v784_v6  ;;  %v818_v15 = vsel (!%p5155_p5), %vm817_vm0, %v813_v13, 0.0  ;;  %v821_v16 = vsel (!%p5155_p5), %vm817_vm0, %v814_v14, 0.0  ;;  %v2920_v36 = vld [vmem:[#allocation8 + $0x1] ss:$0 sm:$0xff] (!%p5155_p5) }
 0x1c7   : > { %819 = vadd.xlane.f32.xlu0 (!%p5155_p5), %v818_v15 }
 0x1c8   : > { %v4462_v7 = vsub.s32 %v789_v3, %v4456_v4  ;;  %812 = sbr.rel (%p5155_p5) target bundleno = 772 (0x304), region = 136 }
 0x1ca   : > { %v4465_v9 = vrot.slane %v785_v8, %v4462_v7 }
 0x1cb   : > { %822 = vadd.xlane.f32.xlu0 (!%p5155_p5), %v821_v16 }
 0x1cc   : > { %v794_v10 = vcombine.high %v4465_v9, %v4465_v9  ;;  %v801_v11 = vrot.slane %v4465_v9, %v4462_v7 }
 0x1ce   : > { %v4472_v12 = vrot.slane %v794_v10, %v4462_v7 }
 0x254   : > { %v820_v17 = vpop.xlane.xlu0 %819 }
 0x255   : > { %v825_v18 = vmul.f32 0.03125, %v820_v17 }
 0x257   : > { %v827_v19 = vsub.f32 %v813_v13, %v825_v18 }
 0x258   : > { %v823_v20 = vpop.xlane.xlu0 %822 }
 0x259   : > { %v826_v21 = vmul.f32 0.03125, %v823_v20  ;;  %v829_v22 = vmul.f32 %v827_v19, %v827_v19 }
 0x25b   : > { %v828_v23 = vsub.f32 %v814_v14, %v826_v21  ;;  %v831_v24 = vsel %vm817_vm0, %v829_v22, 0.0 }
 0x25c   : > { %832 = vadd.xlane.f32.xlu1 %v831_v24 }
 0x25d   : > { %v830_v25 = vmul.f32 %v828_v23, %v828_v23 }
 0x25f   : > { %v834_v26 = vsel %vm817_vm0, %v830_v25, 0.0 }
 0x260   : > { %835 = vadd.xlane.f32.xlu1 %v834_v26 }
 0x2e9   : > { %v833_v27 = vpop.xlane.xlu1 %832 }
 0x2ea   : > { %v837_v28 = vmul.f32 0.03125, %v833_v27 }
 0x2ec   : > { %v839_v29 = vadd.f32 1e-05, %v837_v28 }
 0x2ed   : > { %v836_v30 = vpop.xlane.xlu1 %835 }
 0x2ee   : > { %3258 = vrsqrt.f32 %v839_v29  ;;  %v838_v31 = vmul.f32 0.03125, %v836_v30 }
 0x2f0   : > { %v840_v32 = vadd.f32 1e-05, %v838_v31 }
 0x2f2   : > { %3260 = vrsqrt.f32 %v840_v32 }
 0x2f8   : > { %v3259_v33 = vpop.eup %3258 }
 0x2f9   : > { %v843_v35 = vmul.f32 %v3259_v33, %v827_v19 }
 0x2fb   : > { %v849_v37 = vmul.f32 %v2919_v34, %v843_v35 }
 0x2fc   : > { %v3261_v38 = vpop.eup %3260 }
 0x2fd   : > { %v855_v39 = vadd.f32 %v2920_v36, %v849_v37  ;;  %v844_v40 = vmul.f32 %v3261_v38, %v828_v23 }
 0x2ff   : > { %857 = vst.msk [vmem:[#allocation2] sm:$0xff] %vm817_vm0, %v855_v39  ;;  %v850_v41 = vmul.f32 %v2919_v34, %v844_v40 }
 0x301   : > { %v856_v42 = vadd.f32 %v2920_v36, %v850_v41 }
 0x303   : > { %858 = vst.msk [vmem:[#allocation2 + $0x8] sm:$0xff] %vm817_vm0, %v856_v42 }
 0x304 PF: > { %v3267_v43 = vld [vmem:[%s646_s7] sm:$0xff]   ;;  %v3843_v44 = vmov 0.0   ;;  %v3268_v45 = vld [vmem:[%s646_s7 + $0x8] sm:$0xff]   ;;  %vm3844_vm1 = vmmov 0   ;;  %vm886_vm2 = vcmask 261120   ;;  %s3845_s3 = smov 96  }
 0x305   : > { %2994 = vmatprep.subr.bf16.mxu0 %v3843_v44  ;;  %3002 = vmatprep.subr.bf16.mxu1 %v3843_v44  ;;  %v2921_v49 = vld [vmem:[%s654_s19] ss:$0 sm:$0xff]  ;;  %vm946_vm3 = vcmask 130048   ;;  %v4524_v62 = vsub.s32 0, %v4456_v4  ;;  %vm1042_vm4 = vcmask 64512   ;;  %s3846_s24 = smov 64  }
 0x306   : > { %2995 = vmatpush3.bf16.msra.mxu0 %v3267_v43  ;;  %2998 = vmatprep.mubr.msk.bf16.mxu0 %vm3844_vm1, %v3843_v44  ;;  %v4490_v46 = vld [vmem:[#allocation2] sm:$0xff]  ;;  %s3847_s30 = smov 80   ;;  %vm1072_vm5 = vcmask 1043456   ;;  %s3848_s29 = smov 112   ;;  %vm1623_vm6 = vcmask 523264  }
 0x307   : > { %2996 = vmatprep.subr.bf16.mxu0 %v3843_v44  ;;  %3004 = vmatprep.mubr.msk.bf16.mxu1 %vm3844_vm1, %v3843_v44  ;;  %v4530_v63 = vrot.slane %v801_v11, %v4524_v62  ;;  %v4535_v6 = vrot.slane %v4472_v12, %v4524_v62  ;;  %s3849_s14 = smov 48   ;;  %s3850_s9 = smov 16  }
 0x308   : > { %s5156_s18 = sld [smem:[#allocation39_spill]] }
 0x30a   : > { %v4492_v47 = vld [vmem:[#allocation2 + $0x8] sm:$0xff]  ;;  %2997 = vmatpush3.bf16.msra.mxu0 %v3268_v45 }
 0x30b   : > { %v862_v48 = vpack.c.bf16 %v4492_v47, %v4490_v46  ;;  %3008 = vmatprep.subr.bf16.mxu0 %v3843_v44 }
 0x30d   : > { %2999 = vmatmul.mubr.msk.bf16.vlgmr.msra.gmra.mrb[0].mxu0 %vm886_vm2, %v862_v48 }
 0x30e   : > { %3010 = vmatprep.mubr.msk.bf16.mxu0 %vm3844_vm1, %v3843_v44  ;;  %p2945_p9 = scmp.ne.s32.totalorder %s5156_s18, 1 }
 0x30f   : > { %vm3852_vm7 = vmmov (!%p2945_p9), 0   ;;  %vm1795_vm8 = vcmask (!%p2945_p9), 1041409   ;;  %vm1834_vm9 = vcmask (!%p2945_p9), 36864   ;;  %vm1869_vm10 = vcmp.gt.f32.partialorder (!%p2945_p9), %v4458_v5, 0.5 }
 0x3e0   : > { %v924_v50 = vpop.f32.mrb[0].mxu0 }
 0x3e1   : > { %v925_v51 = vadd.f32 %v2921_v49, %v924_v50  ;;  %v3000_v52 = vpop.f32.mrb[1].mxu0 }
 0x3e2   : > { %v927_v53 = vpop.f32.mrb[2].mxu0 }
 0x3e3   : > { %v4505_v54 = vpack.c.bf16 %v925_v51, %v925_v51  ;;  %v928_v55 = vadd.f32 %v2921_v49, %v927_v53  ;;  %v3001_v56 = vpop.f32.mrb[3].mxu0 }
 0x3e5   : > { %944 = vrot.lane.b32.xlu0 %v4505_v54, %s3845_s3  ;;  %v4508_v57 = vpack.c.bf16 %v928_v55, %v928_v55 }
 0x3e9   : > { %994 = vrot.lane.b32.xlu0 %v4508_v57, %s3845_s3 }
 0x457   : > { %v945_v58 = vpop.permute.xlu0 %944 }
 0x458   : > { %v951_v59 = vsel %vm946_vm3, %v945_v58, 0 }
 0x459   : > { %3003 = vmatpush3.bf16.xpose.msra.mxu1 %v951_v59 }
 0x45a   : > { %3014 = vmatprep.subr.bf16.mxu1 %v3843_v44 }
 0x45b   : > { %v995_v60 = vpop.permute.xlu0 %994 }
 0x45c   : > { %v1000_v61 = vsel %vm946_vm3, %v995_v60, 0 }
 0x45d   : > { %3009 = vmatpush3.bf16.xpose.msra.mxu0 %v1000_v61 }
 0x45e   : > { %3020 = vmatprep.subr.bf16.mxu0 %v3843_v44 }
 0x460   : > { %3005 = vmatmul.mubr.msk.bf16.vlgmr.msra.gmra.mrb[0].mxu1 %vm946_vm3, %v4505_v54 }
 0x461   : > { %3016 = vmatprep.mubr.msk.bf16.mxu1 %vm3844_vm1, %v3843_v44 }
 0x464   : > { %3011 = vmatmul.mubr.msk.bf16.vlgmr.msra.gmra.mrb[4].mxu0 %vm946_vm3, %v4508_v57 }
 0x465   : > { %3022 = vmatprep.mubr.msk.bf16.mxu0 %vm3844_vm1, %v3843_v44 }
 0x533   : > { %v987_v1 = vpop.f32.mrb[0].mxu1 }
 0x534   : > { %v988_v2 = vadd.f32 %v987_v1, %v4530_v63  ;;  %v3006_v3 = vpop.f32.mrb[1].mxu1 }
 0x535   : > { %v990_v8 = vpop.f32.mrb[2].mxu1 }
 0x536   : > { %v3007_v10 = vpop.f32.mrb[3].mxu1  ;;  %v1043_v13 = vsel %vm1042_vm4, %v988_v2, -inf }
 0x537   : > { %1044 = vmax.xlane.f32.xlu1 %v1043_v13  ;;  %v1036_v14 = vpop.f32.mrb[4].mxu0 }
 0x538   : > { %v1037_v15 = vadd.f32 %v1036_v14, %v4535_v6  ;;  %v3012_v9 = vpop.f32.mrb[5].mxu0 }
 0x539   : > { %v1039_v11 = vpop.f32.mrb[6].mxu0 }
 0x53a   : > { %v3013_v16 = vpop.f32.mrb[7].mxu0  ;;  %v1046_v17 = vsel %vm1042_vm4, %v1037_v15, -inf }
 0x53b   : > { %1047 = vmax.xlane.f32.xlu1 %v1046_v17 }
 0x54c   : > { %1067 = vrot.lane.b32.xlu1 %v4505_v54, %s3846_s24 }
 0x550   : > { %1116 = vrot.lane.b32.xlu1 %v4508_v57, %s3846_s24 }
 0x554   : > { %1166 = vrot.lane.b32.xlu1 %v4505_v54, %s3847_s30 }
 0x5c4   : > { %v1045_v12 = vpop.xlane.xlu1 %1044 }
 0x5c5   : > { %v1049_v18 = vsub.f32 %v988_v2, %v1045_v12 }
 0x5c7   : > { %v1051_v19 = vmul.f32 1.442695, %v1049_v18 }
 0x5c8   : > { %v1048_v20 = vpop.xlane.xlu1 %1047 }
 0x5c9   : > { %3277 = vpow2.f32 %v1051_v19  ;;  %v1050_v21 = vsub.f32 %v1037_v15, %v1048_v20 }
 0x5cb   : > { %v1053_v22 = vmul.f32 1.442695, %v1050_v21 }
 0x5cc   : > { %v1068_v23 = vpop.permute.xlu1 %1067 }
 0x5cd   : > { %3279 = vpow2.f32 %v1053_v22  ;;  %v1074_v24 = vsel %vm1072_vm5, %v1068_v23, 0 }
 0x5ce   : > { %3015 = vmatpush3.bf16.msra.mxu1 %v1074_v24 }
 0x5cf   : > { %3026 = vmatprep.subr.bf16.mxu1 %v3843_v44 }
 0x5d0   : > { %v1117_v25 = vpop.permute.xlu1 %1116 }
 0x5d1   : > { %v1122_v26 = vsel %vm1072_vm5, %v1117_v25, 0 }
 0x5d2   : > { %3021 = vmatpush3.bf16.msra.mxu0 %v1122_v26 }
 0x5d3   : > { %v3278_v27 = vpop.eup %3277  ;;  %3032 = vmatprep.subr.bf16.mxu0 %v3843_v44 }
 0x5d4   : > { %v1055_v28 = vsel %vm1042_vm4, %v3278_v27, 0.0  ;;  %v1167_v31 = vpop.permute.xlu1 %1166 }
 0x5d5   : > { %1056 = vadd.xlane.f32.xlu0 %v1055_v28  ;;  %v1172_v38 = vsel %vm946_vm3, %v1167_v31, 0  ;;  %v3269_v31 = vld [vmem:[%s663_s20] sm:$0xff]  }
 0x5d7   : > { %v3280_v29 = vpop.eup %3279 }
 0x5d8   : > { %v1058_v30 = vsel %vm1042_vm4, %v3280_v29, 0.0 }
 0x5d9   : > { %1059 = vadd.xlane.f32.xlu1 %v1058_v30 }
 0x5ea   : > { %1216 = vrot.lane.b32.xlu1 %v4508_v57, %s3847_s30 }
 0x5eb   : > { %1164 = vrot.lane.b32.xlu0 %v4505_v54, %s3848_s29 }
 0x5ee   : > { %1214 = vrot.lane.b32.xlu1 %v4508_v57, %s3848_s29 }
 0x662   : > { %v1057_v32 = vpop.xlane.xlu0 %1056 }
 0x663   : > { %3281 = vrcp.f32 %v1057_v32  ;;  %v3270_v32 = vld [vmem:[%s663_s20 + $0x8] sm:$0xff]  }
 0x666   : > { %v1060_v33 = vpop.xlane.xlu1 %1059  ;;  %v1165_v43 = vpop.permute.xlu0 %1164 }
 0x667   : > { %3283 = vrcp.f32 %v1060_v33 }
 0x66a   : > { %v1217_v40 = vpop.permute.xlu1 %1216 }
 0x66b   : > { %v1222_v42 = vsel %vm946_vm3, %v1217_v40, 0 }
 0x66d   : > { %v3282_v34 = vpop.eup %3281 }
 0x66e   : > { %v1063_v35 = vmul.f32 %v3282_v34, %v3278_v27  ;;  %v1215_v45 = vpop.permute.xlu1 %1214 }
 0x670   : > { %v1065_v36 = vpack.c.bf16 %v1063_v35, %v1063_v35 }
 0x671   : > { %v3284_v37 = vpop.eup %3283 }
 0x672   : > { %v1064_v39 = vmul.f32 %v3284_v37, %v3280_v29  ;;  %3017 = vmatmul.mubr.msk.bf16.vlgmr.msra.gmra.mrb[4].mxu1 %vm1042_vm4, %v1065_v36 }
 0x673   : > { %3027 = vmatpush3.bf16.xpose.msra.mxu1 %v1172_v38  ;;  %3028 = vmatprep.mubr.msk.bf16.mxu1 %vm3844_vm1, %v3843_v44 }
 0x674   : > { %v1066_v41 = vpack.c.bf16 %v1064_v39, %v1064_v39  ;;  %3038 = vmatprep.subr.bf16.mxu1 %v3843_v44 }
 0x676   : > { %3023 = vmatmul.mubr.msk.bf16.vlgmr.msra.gmra.mrb[8].mxu0 %vm1042_vm4, %v1066_v41 }
 0x677   : > { %3033 = vmatpush3.bf16.xpose.msra.mxu0 %v1222_v42  ;;  %3034 = vmatprep.mubr.msk.bf16.mxu0 %vm3844_vm1, %v3843_v44 }
 0x678   : > { %3044 = vmatprep.subr.bf16.mxu0 %v3843_v44 }
 0x67a   : > { %3029 = vmatmul.mubr.msk.bf16.vlgmr.msra.gmra.mrb[8].mxu1 %vm946_vm3, %v1165_v43 }
 0x67b   : > { %3040 = vmatprep.mubr.msk.bf16.mxu1 %vm3844_vm1, %v3843_v44 }
 0x67e   : > { %3035 = vmatmul.mubr.msk.bf16.vlgmr.msra.gmra.mrb[12].mxu0 %vm946_vm3, %v1215_v45 }
 0x67f   : > { %3046 = vmatprep.mubr.msk.bf16.mxu0 %vm3844_vm1, %v3843_v44 }
 0x745   : > { %v4568_v48 = vpop.f32.mrb[4].mxu1 }
 0x746   : > { %v3018_v49 = vpop.f32.mrb[5].mxu1 }
 0x747   : > { %v1113_v50 = vpop.f32.mrb[6].mxu1 }
 0x748   : > { %v3019_v51 = vpop.f32.mrb[7].mxu1 }
 0x749   : > { %v4570_v52 = vpop.f32.mrb[8].mxu0 }
 0x74a   : > { %v3024_v53 = vpop.f32.mrb[9].mxu0 }
 0x74b   : > { %v1161_v55 = vpop.f32.mrb[10].mxu0  ;;  %v4604_v53 = vld [vmem:[%s4428_s27] sm:$0x3f] }
 0x74c   : > { %v3025_v56 = vpop.f32.mrb[11].mxu0  ;;  %v1402_v55 = vrot.slane %v4604_v53, %v4524_v62 }
 0x74d   : > { %v1208_v58 = vpop.f32.mrb[8].mxu1 }
 0x74e   : > { %v1209_v59 = vadd.f32 %v1208_v58, %v4530_v63  ;;  %v3030_v60 = vpop.f32.mrb[9].mxu1 }
 0x74f   : > { %v1211_v61 = vpop.f32.mrb[10].mxu1 }
 0x750   : > { %v3031_v1 = vpop.f32.mrb[11].mxu1  ;;  %v1264_v2 = vsel %vm1042_vm4, %v1209_v59, -inf }
 0x751   : > { %1265 = vmax.xlane.f32.xlu1 %v1264_v2  ;;  %v1258_v3 = vpop.f32.mrb[12].mxu0 }
 0x752   : > { %v1259_v8 = vadd.f32 %v1258_v3, %v4535_v6  ;;  %v3036_v10 = vpop.f32.mrb[13].mxu0 }
 0x753   : > { %v1261_v13 = vpop.f32.mrb[14].mxu0 }
 0x754   : > { %v3037_v14 = vpop.f32.mrb[15].mxu0  ;;  %v1267_v15 = vsel %vm1042_vm4, %v1259_v8, -inf }
 0x755   : > { %1268 = vmax.xlane.f32.xlu0 %v1267_v15 }
 0x76b   : > { %1336 = vrot.lane.b32.xlu0 %v4508_v57, %s3849_s14 }
 0x7de   : > { %v1266_v9 = vpop.xlane.xlu1 %1265 }
 0x7df   : > { %v1270_v63 = vsub.f32 %v1209_v59, %v1266_v9 }
 0x7e1   : > { %v1272_v11 = vmul.f32 1.442695, %v1270_v63 }
 0x7e2   : > { %v1269_v16 = vpop.xlane.xlu0 %1268 }
 0x7e3   : > { %3285 = vpow2.f32 %v1272_v11  ;;  %v1271_v17 = vsub.f32 %v1259_v8, %v1269_v16 }
 0x7e5   : > { %v1274_v12 = vmul.f32 1.442695, %v1271_v17  ;;  %v3272_v17 = vld [vmem:[%s681_s25 + $0x8] sm:$0xff]  }
 0x7e6   : > { %v1337_v18 = vpop.permute.xlu0 %1336 }
 0x7e7   : > { %3287 = vpow2.f32 %v1274_v12  ;;  %v1342_v6 = vsel %vm1072_vm5, %v1337_v18, 0 }
 0x7e8   : > { %3045 = vmatpush3.bf16.msra.mxu0 %v1342_v6 }
 0x7e9   : > { %3058 = vmatprep.subr.bf16.mxu0 %v3843_v44 }
 0x7ed   : > { %v3286_v19 = vpop.eup %3285 }
 0x7ee   : > { %v1276_v20 = vsel %vm1042_vm4, %v3286_v19, 0.0 }
 0x7ef   : > { %1277 = vadd.xlane.f32.xlu1 %v1276_v20 }
 0x7f1   : > { %v3288_v21 = vpop.eup %3287 }
 0x7f2   : > { %v1279_v57 = vsel %vm1042_vm4, %v3288_v21, 0.0 }
 0x7f3   : > { %1280 = vadd.xlane.f32.xlu1 %v1279_v57  ;;  %v4620_v57 = vsub.s32 1, %v4456_v4 }
 0x804   : > { %1288 = vrot.lane.b32.xlu1 %v4505_v54, %s3849_s14 }
 0x87c   : > { %v1278_v22 = vpop.xlane.xlu1 %1277 }
 0x87d   : > { %3289 = vrcp.f32 %v1278_v22  ;;  %v1491_v22 = vrot.slane %v4604_v53, %v4620_v57 }
 0x880   : > { %v1281_v23 = vpop.xlane.xlu1 %1280 }
 0x881   : > { %3291 = vrcp.f32 %v1281_v23  ;;  %v4625_v23 = vsub.s32 2, %v4456_v4 }
 0x884   : > { %v1289_v24 = vpop.permute.xlu1 %1288 }
 0x885   : > { %v1294_v25 = vsel %vm1072_vm5, %v1289_v24, 0  ;;  %vm2460_vm5 = vcmask (!%p2945_p9), 58368  }
 0x886   : > { %3039 = vmatpush3.bf16.msra.mxu1 %v1294_v25 }
 0x887   : > { %v3290_v26 = vpop.eup %3289  ;;  %3050 = vmatprep.subr.bf16.mxu1 %v3843_v44 }
 0x888   : > { %v1284_v27 = vmul.f32 %v3290_v26, %v3286_v19 }
 0x88a   : > { %v1286_v28 = vpack.c.bf16 %v1284_v27, %v1284_v27 }
 0x88b   : > { %v3292_v29 = vpop.eup %3291 }
 0x88c   : > { %v1285_v30 = vmul.f32 %v3292_v29, %v3288_v21  ;;  %3041 = vmatmul.mubr.msk.bf16.vlgmr.msra.gmra.mrb[12].mxu1 %vm1042_vm4, %v1286_v28  ;;  %v1497_v29 = vrot.slane %v4604_v53, %v4625_v23 }
 0x88d   : > { %3054 = vmatprep.mubr.msk.bf16.mxu1 %vm3844_vm1, %v3843_v44  ;;  %3051 = vmatpush3.bf16.msra.mxu1 %v3269_v31 }
 0x88e   : > { %v1287_v54 = vpack.c.bf16 %v1285_v30, %v1285_v30  ;;  %3052 = vmatprep.subr.bf16.mxu1 %v3843_v44 }
 0x890   : > { %3047 = vmatmul.mubr.msk.bf16.vlgmr.msra.gmra.mrb[16].mxu0 %vm1042_vm4, %v1287_v54 }
 0x891   : > { %3062 = vmatprep.mubr.msk.bf16.mxu0 %vm3844_vm1, %v3843_v44  ;;  %3053 = vmatpush3.bf16.msra.mxu1 %v3270_v32 }
 0x892   : > { %3066 = vmatprep.subr.bf16.mxu1 %v3843_v44 }
 0x95f   : > { %v1330_v33 = vpop.f32.mrb[12].mxu1 }
 0x960   : > { %v3042_v34 = vpop.f32.mrb[13].mxu1 }
 0x961   : > { %v1333_v35 = vpop.f32.mrb[14].mxu1  ;;  %v3274_v34 = vld [vmem:[%s4437_s15 + $0x8] sm:$0xff]  }
 0x962   : > { %v3043_v36 = vpop.f32.mrb[15].mxu1  ;;  %v3275_v35 = vld [vmem:[%s4437_s15 + $0x10] sm:$0xff]  }
 0x963   : > { %v1378_v37 = vpop.f32.mrb[16].mxu0  ;;  %v3276_v36 = vld [vmem:[%s4437_s15 + $0x18] sm:$0xff]  }
 0x964   : > { %v3262_v38 = vpack.i.bf16 %v1378_v37, %v1330_v33  ;;  %v3048_v39 = vpop.f32.mrb[17].mxu0  ;;  %v3273_v33 = vld [vmem:[%s4437_s15] sm:$0xff]   ;;  %v2936_v37 = vld [vmem:[%s689_s8] ss:$0 sm:$0xff] }
 0x965   : > { %v1381_v40 = vpop.f32.mrb[18].mxu0 }
 0x966   : > { %3263 = vrot.lane.b32.xlu1 %v3262_v38, %s3850_s9  ;;  %v3049_v41 = vpop.f32.mrb[19].mxu0 }
 0x9d8   : > { %v3264_v42 = vpop.permute.xlu1 %3263 }
 0x9d9   : > { %v3266_v43 = vunpack.i.h.bf16 %v3264_v42  ;;  %v3265_v45 = vunpack.i.l.bf16 %v3264_v42 }
 0x9db   : > { %v1393_v49 = vsel %vm946_vm3, %v4570_v52, %v3266_v43  ;;  %v1392_v50 = vsel %vm946_vm3, %v4568_v48, %v3265_v45  ;;  %vm2451_vm3 = vcmask (!%p2945_p9), 33792  }
 0x9dc   : > { %v1394_v51 = vpack.c.bf16 %v1393_v49, %v1392_v50 }
 0x9de   : > { %3055 = vmatmul.mubr.msk.bf16.vlgmr.msra.gmra.mrb[16].mxu1 %vm886_vm2, %v1394_v51 }
 0x9df   : > { %3074 = vmatprep.mubr.msk.bf16.mxu1 %vm3844_vm1, %v3843_v44  ;;  %3067 = vmatpush3.bf16.msra.mxu1 %v3273_v33 }
 0x9e0   : > { %3068 = vmatprep.subr.bf16.mxu1 %v3843_v44 }
 0x9e3   : > { %3069 = vmatpush3.bf16.msra.mxu1 %v3274_v34 }
 0x9e4   : > { %3070 = vmatprep.subr.bf16.mxu1 %v3843_v44 }
 0x9e7   : > { %3071 = vmatpush3.bf16.msra.mxu1 %v3275_v35  ;;  %v4649_v35 = vsub.s32 4, %v4456_v4 }
 0x9e8   : > { %3072 = vmatprep.subr.bf16.mxu1 %v3843_v44 }
 0x9eb   : > { %3073 = vmatpush3.bf16.msra.mxu1 %v3276_v36  ;;  %v4652_v36 = vsub.s32 5, %v4456_v4 }
 0xab1   : > { %v1452_v56 = vpop.f32.mrb[16].mxu1 }
 0xab2   : > { %v1453_v58 = vadd.f32 %v1452_v56, %v1402_v55  ;;  %v3056_v59 = vpop.f32.mrb[17].mxu1 }
 0xab3   : > { %v1455_v60 = vpop.f32.mrb[18].mxu1 }
 0xab4   : > { %v1456_v61 = vadd.f32 %v1455_v60, %v1402_v55  ;;  %v3057_v52 = vpop.f32.mrb[19].mxu1  ;;  %v1459_v1 = vadd.f32 %v1453_v58, %v4490_v46 }
 0xab6   : > { %v1461_v48 = vsel %vm886_vm2, %v1459_v1, 0.0  ;;  %v1460_v2 = vadd.f32 %v1456_v61, %v4492_v47  ;;  %v3271_v47 = vld [vmem:[%s681_s25] sm:$0xff]  }
 0xab7   : > { %1462 = vadd.xlane.f32.xlu1 %v1461_v48  ;;  %3059 = vmatpush3.bf16.msra.mxu0 %v3271_v47 }
 0xab8   : > { %v1464_v3 = vsel %vm886_vm2, %v1460_v2, 0.0  ;;  %3060 = vmatprep.subr.bf16.mxu0 %v3843_v44 }
 0xab9   : > { %1465 = vadd.xlane.f32.xlu0 %v1464_v3 }
 0xabb   : > { %3061 = vmatpush3.bf16.msra.mxu0 %v3272_v17 }
 0xb44   : > { %v1463_v8 = vpop.xlane.xlu1 %1462 }
 0xb45   : > { %v1468_v10 = vmul.f32 0.03125, %v1463_v8 }
 0xb46   : > { %v1466_v13 = vpop.xlane.xlu0 %1465 }
 0xb47   : > { %v1470_v14 = vsub.f32 %v1459_v1, %v1468_v10  ;;  %v1469_v15 = vmul.f32 0.03125, %v1466_v13 }
 0xb49   : > { %v1471_v9 = vsub.f32 %v1460_v2, %v1469_v15  ;;  %v1472_v63 = vmul.f32 %v1470_v14, %v1470_v14 }
 0xb4b   : > { %v1474_v11 = vsel %vm886_vm2, %v1472_v63, 0.0  ;;  %v1473_v46 = vmul.f32 %v1471_v9, %v1471_v9 }
 0xb4c   : > { %1475 = vadd.xlane.f32.xlu0 %v1474_v11 }
 0xb4d   : > { %v1477_v16 = vsel %vm886_vm2, %v1473_v46, 0.0 }
 0xb4e   : > { %1478 = vadd.xlane.f32.xlu1 %v1477_v16 }
 0xbd9   : > { %v1476_v12 = vpop.xlane.xlu0 %1475 }
 0xbda   : > { %v1480_v18 = vmul.f32 0.03125, %v1476_v12 }
 0xbdb   : > { %v1479_v6 = vpop.xlane.xlu1 %1478 }
 0xbdc   : > { %v1482_v19 = vadd.f32 1e-05, %v1480_v18  ;;  %v1481_v20 = vmul.f32 0.03125, %v1479_v6 }
 0xbde   : > { %3293 = vrsqrt.f32 %v1482_v19  ;;  %v1483_v21 = vadd.f32 1e-05, %v1481_v20 }
 0xbe0   : > { %3295 = vrsqrt.f32 %v1483_v21 }
 0xbe8   : > { %v3294_v24 = vpop.eup %3293 }
 0xbe9   : > { %v1486_v25 = vmul.f32 %v3294_v24, %v1470_v14  ;;  %v4640_v14 = vsub.s32 3, %v4456_v4 }
 0xbea   : > { %v3296_v26 = vpop.eup %3295 }
 0xbeb   : > { %v1492_v27 = vmul.f32 %v1491_v22, %v1486_v25  ;;  %v1487_v28 = vmul.f32 %v3296_v26, %v1471_v9  ;;  %v1598_v15 = vrot.slane %v4604_v53, %v4640_v14 }
 0xbed   : > { %v1493_v30 = vmul.f32 %v1491_v22, %v1487_v28  ;;  %v1498_v54 = vadd.f32 %v1497_v29, %v1492_v27 }
 0xbef   : > { %v1499_v31 = vadd.f32 %v1497_v29, %v1493_v30 }
 0xbf1   : > { %v1500_v32 = vpack.c.bf16 %v1499_v31, %v1498_v54 }
 0xbf3   : > { %3063 = vmatmul.mubr.msk.bf16.vlgmr.msra.gmra.mrb[20].mxu0 %vm886_vm2, %v1500_v32 }
 0xcc6   : > { %v1561_v38 = vpop.f32.mrb[20].mxu0 }
 0xcc7   : > { %v1562_v39 = vadd.f32 %v2936_v37, %v1561_v38  ;;  %v3064_v40 = vpop.f32.mrb[21].mxu0 }
 0xcc8   : > { %v1564_v41 = vpop.f32.mrb[22].mxu0 }
 0xcc9   : > { %v1570_v42 = vmul.f32 0.044715, %v1562_v39  ;;  %v1565_v43 = vadd.f32 %v2936_v37, %v1564_v41  ;;  %v3065_v45 = vpop.f32.mrb[23].mxu0  ;;  %v1568_v48 = vmul.f32 0.5, %v1562_v39  ;;  %v1699_v37 = vrot.slane %v4604_v53, %v4649_v35 }
 0xccb   : > { %v1572_v49 = vmul.f32 %v1570_v42, %v1562_v39  ;;  %v1571_v50 = vmul.f32 0.044715, %v1565_v43  ;;  %v1569_v2 = vmul.f32 0.5, %v1565_v43 }
 0xccd   : > { %v1574_v51 = vmul.f32 %v1572_v49, %v1562_v39  ;;  %v1573_v55 = vmul.f32 %v1571_v50, %v1565_v43 }
 0xccf   : > { %v1576_v56 = vadd.f32 %v1574_v51, %v1562_v39  ;;  %v1575_v58 = vmul.f32 %v1573_v55, %v1565_v43  ;;  %v1705_v39 = vrot.slane %v4604_v53, %v4652_v36  ;;  %v3318_v51 = vld [vmem:[#allocation20] sm:$0xff] (!%p2945_p9)   ;;  %v3851_v55 = vmov (!%p2945_p9), 0.0  }
 0xcd0   : > { %3078 = vmatprep.subr.bf16.mxu0 (!%p2945_p9), %v3851_v55  ;;  %3082 = vmatprep.mubr.msk.bf16.mxu0 (!%p2945_p9), %vm3852_vm7, %v3851_v55 }
 0xcd1   : > { %v1578_v59 = vmul.f32 0.7978846, %v1576_v56  ;;  %v1577_v60 = vadd.f32 %v1575_v58, %v1565_v43  ;;  %3079 = vmatpush3.bf16.msra.mxu0 (!%p2945_p9), %v3318_v51  ;;  %v3319_v56 = vld [vmem:[#allocation20 + $0x8] sm:$0xff] (!%p2945_p9)   ;;  %v2946_v58 = vld [vmem:[#allocation21] ss:$0 sm:$0xff] (!%p2945_p9) }
 0xcd2   : > { %3080 = vmatprep.subr.bf16.mxu0 (!%p2945_p9), %v3851_v55 }
 0xcd3   : > { %3297 = vtanh.f32 %v1578_v59  ;;  %v1579_v44 = vmul.f32 0.7978846, %v1577_v60 }
 0xcd5   : > { %3299 = vtanh.f32 %v1579_v44  ;;  %3081 = vmatpush3.bf16.msra.mxu0 (!%p2945_p9), %v3319_v56 }
 0xcdd   : > { %v3298_v61 = vpop.eup %3297 }
 0xcde   : > { %v1582_v52 = vadd.f32 1.0, %v3298_v61 }
 0xcdf   : > { %v3300_v1 = vpop.eup %3299 }
 0xce0   : > { %v1583_v3 = vadd.f32 1.0, %v3300_v1  ;;  %v1584_v8 = vmul.f32 %v1582_v52, %v1568_v48 }
 0xce2   : > { %v1585_v10 = vmul.f32 %v1583_v3, %v1569_v2  ;;  %v2950_v2 = vld [vmem:[#allocation24] ss:$0 sm:$0xff] (!%p2945_p9) }
 0xce4   : > { %v1586_v13 = vpack.c.bf16 %v1585_v10, %v1584_v8 }
 0xce6   : > { %3075 = vmatmul.mubr.msk.bf16.vlgmr.msra.gmra.mrb[20].mxu1 %vm1623_vm6, %v1586_v13 }
 0xdb9   : > { %v1661_v9 = vpop.f32.mrb[20].mxu1 }
 0xdba   : > { %v1662_v63 = vadd.f32 %v1661_v9, %v1598_v15  ;;  %v3076_v11 = vpop.f32.mrb[21].mxu1 }
 0xdbb   : > { %v1664_v46 = vpop.f32.mrb[22].mxu1  ;;  %v4675_v11 = vld [vmem:[#allocation23] sm:$0x1f] (!%p2945_p9) }
 0xdbc   : > { %v1665_v16 = vadd.f32 %v1664_v46, %v1598_v15  ;;  %v3077_v47 = vpop.f32.mrb[23].mxu1  ;;  %v1668_v17 = vadd.f32 %v1662_v63, %v1498_v54 }
 0xdbe   : > { %v1670_v12 = vsel %vm886_vm2, %v1668_v17, 0.0  ;;  %v1669_v18 = vadd.f32 %v1665_v16, %v1499_v31 }
 0xdbf   : > { %1671 = vadd.xlane.f32.xlu0 %v1670_v12 }
 0xdc0   : > { %v1673_v6 = vsel %vm886_vm2, %v1669_v18, 0.0 }
 0xdc1   : > { %1674 = vadd.xlane.f32.xlu1 %v1673_v6  ;;  %v3853_v6 = vmov (!%p2945_p9), 0  }
 0xdc2   : > { %3305 = vset.pattern.permute.xlu0 (!%p2945_p9), %v3853_v6  ;;  %3306 = vset.pattern.permute.xlu1 (!%p2945_p9), %v3853_v6 }
 0xe4c   : > { %v1672_v19 = vpop.xlane.xlu0 %1671 }
 0xe4d   : > { %v1676_v20 = vmul.f32 0.03125, %v1672_v19 }
 0xe4e   : > { %v1675_v21 = vpop.xlane.xlu1 %1674 }
 0xe4f   : > { %v1678_v22 = vsub.f32 %v1668_v17, %v1676_v20  ;;  %v1677_v24 = vmul.f32 0.03125, %v1675_v21 }
 0xe51   : > { %v1679_v25 = vsub.f32 %v1669_v18, %v1677_v24  ;;  %v1680_v26 = vmul.f32 %v1678_v22, %v1678_v22 }
 0xe53   : > { %v1682_v27 = vsel %vm886_vm2, %v1680_v26, 0.0  ;;  %v1681_v28 = vmul.f32 %v1679_v25, %v1679_v25  ;;  %v4700_v26 = vsel (!%p2945_p9), %vm1869_vm10, 1, %v3853_v6 }
 0xe54   : > { %1683 = vadd.xlane.f32.xlu0 %v1682_v27  ;;  %v3854_v27 = vmov (!%p2945_p9), 1  }
 0xe55   : > { %v1685_v29 = vsel %vm886_vm2, %v1681_v28, 0.0  ;;  %v4705_v28 = vand.u32 (!%p2945_p9), 127, %v790_v0 }
 0xe56   : > { %1686 = vadd.xlane.f32.xlu1 %v1685_v29 }
 0xe57   : > { %v4709_v29 = vsub.s32 (!%p2945_p9), %v4705_v28, %v4456_v4 }
 0xee1   : > { %v1684_v30 = vpop.xlane.xlu0 %1683 }
 0xee2   : > { %v1688_v54 = vmul.f32 0.03125, %v1684_v30 }
 0xee3   : > { %v1687_v31 = vpop.xlane.xlu1 %1686 }
 0xee4   : > { %v1690_v32 = vadd.f32 1e-05, %v1688_v54  ;;  %v1689_v33 = vmul.f32 0.03125, %v1687_v31 }
 0xee6   : > { %3301 = vrsqrt.f32 %v1690_v32  ;;  %v1691_v34 = vadd.f32 1e-05, %v1689_v33 }
 0xee8   : > { %3303 = vrsqrt.f32 %v1691_v34 }
 0xef0   : > { %v3302_v38 = vpop.eup %3301 }
 0xef1   : > { %v1694_v40 = vmul.f32 %v3302_v38, %v1678_v22 }
 0xef2   : > { %v3304_v41 = vpop.eup %3303 }
 0xef3   : > { %v1700_v42 = vmul.f32 %v1699_v37, %v1694_v40  ;;  %v1695_v43 = vmul.f32 %v3304_v41, %v1679_v25  ;;  %1713 = sbr.rel (%p2945_p9) target bundleno = 7440 (0x1d10), region = 140 }
 0xef5   : > { %v1706_v45 = vadd.f32 %v1705_v39, %v1700_v42  ;;  %v1701_v49 = vmul.f32 %v1699_v37, %v1695_v43 }
 0xef7   : > { %1708 = vst.msk [vmem:[#allocation2] sm:$0xff] %vm886_vm2, %v1706_v45  ;;  %v1707_v50 = vadd.f32 %v1705_v39, %v1701_v49 }
 0xef9   : > { %1709 = vst.msk [vmem:[#allocation2 + $0x8] sm:$0xff] %vm886_vm2, %v1707_v50  ;;  %v1714_v53 = vpack.c.bf16 (!%p2945_p9), %v1707_v50, %v1706_v45 }
 0xefb   : > { %3083 = vmatmul.mubr.msk.bf16.vlgmr.msra.gmra.mrb[0].mxu0 %vm886_vm2, %v1714_v53 }
 0xfce   : > { %v1775_v59 = vpop.f32.mrb[0].mxu0 }
 0xfcf   : > { %v4662_v60 = vadd.f32 %v2946_v58, %v1775_v59  ;;  %v3084_v44 = vpop.f32.mrb[1].mxu0 }
 0xfd0   : > { %v1778_v61 = vpop.f32.mrb[2].mxu0 }
 0xfd1   : > { %v4664_v52 = vadd.f32 %v2946_v58, %v1778_v61  ;;  %v3085_v1 = vpop.f32.mrb[3].mxu0  ;;  %v1854_v48 = vrot.slane %v4662_v60, %v4620_v57  ;;  %v1948_v51 = vrot.slane %v4662_v60, %v4625_v23 }
 0xfd2   : > { %v3855_v1 = vmov 2  }
 0xfd3   : > { %1856 = vbcast.lane.b32.xlu1 %v1854_v48, 256  ;;  %v1794_v3 = vrot.slane %v4664_v52, 7  ;;  %v1861_v8 = vrot.slane %v4664_v52, %v4620_v57  ;;  %v1955_v55 = vrot.slane %v4664_v52, %v4625_v23 }
 0xfd5   : > { %v1796_v10 = vsel %vm1795_vm8, %v1794_v3, %v4662_v60 }
 0xfd6   : > { %v1798_v13 = vadd.f32 %v2950_v2, %v1796_v10 }
 0xfd7   : > { %1863 = vbcast.lane.b32.xlu1 %v1861_v8, 256 }
 0xfd8   : > { %v1806_v15 = vrot.slane %v1798_v13, %v4462_v7 }
 0xfda   : > { %v1814_v9 = vrot.slane %v1806_v15, %v4462_v7  ;;  %v1807_v63 = vcombine.high %v1806_v15, %v1806_v15 }
 0xfdc   : > { %v1825_v46 = vrot.slane %v1814_v9, %v4524_v62  ;;  %v1821_v16 = vrot.slane %v1807_v63, %v4462_v7 }
 0xfde   : > { %v4680_v47 = vadd.f32 %v1825_v46, %v4675_v11  ;;  %v1829_v57 = vrot.slane %v1821_v16, %v4524_v62 }
 0xfe0   : > { %v1835_v17 = vsel %vm1834_vm9, %v4680_v47, -inf  ;;  %v4686_v12 = vadd.f32 %v1829_v57, %v4675_v11 }
 0xfe1   : > { %1836 = vmax.xlane.f32.xlu0 %v1835_v17 }
 0xfe2   : > { %v1838_v18 = vsel %vm1834_vm9, %v4686_v12, -inf }
 0xfe5   : > { %1839 = vmax.xlane.f32.xlu0 %v1838_v18 }
0x1045   : > { %v1857_v19 = vpop.permute.xlu1 %1856 }
0x1049   : > { %v1864_v22 = vpop.permute.xlu1 %1863 }
0x106e   : > { %v4692_v20 = vpop.xlane.xlu0 %1836 }
0x106f   : > { %v1867_v21 = vadd.f32 %v1857_v19, %v4692_v20 }
0x1071   : > { %1878 = vperm.xlu0 %3305, %v1867_v21  }
0x1072   : > { %v4695_v24 = vpop.xlane.xlu0 %1839 }
0x1073   : > { %v1868_v25 = vadd.f32 %v1864_v22, %v4695_v24  ;;  %v2040_v22 = vrot.slane %v4662_v60, %v4640_v14 }
0x1075   : > { %1881 = vperm.xlu1 %3306, %v1868_v25   ;;  %v2047_v25 = vrot.slane %v4664_v52, %v4640_v14  ;;  %v2132_v14 = vrot.slane %v4662_v60, %v4649_v35 }
0x1079   : > { %3307 = vset.pattern.permute.xlu1 %v3854_v27 }
0x107a   : > { %1872 = vperm.xlu1 %3307, %v4700_v26  }
0x107e   : > { %3308 = vset.pattern.permute.xlu1 %v3853_v6 }
0x10f0   : > { %v1879_v54 = vpop.permute.xlu0 %1878 }
0x10f1   : > { %v1886_v32 = vrot.slane %v1879_v54, %v4709_v29 }
0x10f4   : > { %v1882_v30 = vpop.permute.xlu1 %1881 }
0x10f5   : > { %v1890_v31 = vrot.slane %v1882_v30, %v4709_v29 }
0x10f7   : > { %v1891_v34 = vsel %vm1795_vm8, %v1890_v31, %v1886_v32 }
0x10f9   : > { %v1873_v33 = vpop.permute.xlu1 %1872 }
0x10fa   : > { %vm1874_vm11 = vcmp.eq.s32.totalorder %v1873_v33, 1 }
0x10fb   : > { %v1893_v37 = vsel %vm1874_vm11, %v1891_v34, %v1798_v13  ;;  %v3856_v34 = vmov 3  }
0x10fc   : > { %v1901_v38 = vrot.slane %v1893_v37, %v4462_v7 }
0x10fe   : > { %v1909_v0 = vrot.slane %v1901_v38, %v4462_v7  ;;  %v1902_v39 = vcombine.high %v1901_v38, %v1901_v38 }
0x1100   : > { %v1920_v40 = vrot.slane %v1909_v0, %v4524_v62  ;;  %v1916_v41 = vrot.slane %v1902_v39, %v4462_v7 }
0x1102   : > { %v4719_v42 = vadd.f32 %v1920_v40, %v4675_v11  ;;  %v1924_v43 = vrot.slane %v1916_v41, %v4524_v62 }
0x1104   : > { %v1929_v45 = vsel %vm1834_vm9, %v4719_v42, -inf  ;;  %v4725_v49 = vadd.f32 %v1924_v43, %v4675_v11 }
0x1105   : > { %1930 = vmax.xlane.f32.xlu1 %v1929_v45 }
0x1106   : > { %v1932_v50 = vsel %vm1834_vm9, %v4725_v49, -inf }
0x1107   : > { %1933 = vmax.xlane.f32.xlu0 %v1932_v50 }
0x1116   : > { %1950 = vbcast.lane.b32.xlu1 %v1948_v51, 256 }
0x111a   : > { %1957 = vbcast.lane.b32.xlu1 %v1955_v55, 256 }
0x1192   : > { %v4733_v56 = vpop.xlane.xlu1 %1930 }
0x1194   : > { %v4736_v59 = vpop.xlane.xlu0 %1933 }
0x1196   : > { %v1951_v53 = vpop.permute.xlu1 %1950 }
0x1197   : > { %v1961_v58 = vadd.f32 %v1951_v53, %v4733_v56 }
0x1199   : > { %1970 = vperm.xlu1 %3308, %v1961_v58  }
0x119a   : > { %v1958_v44 = vpop.permute.xlu1 %1957 }
0x119b   : > { %v1962_v61 = vadd.f32 %v1958_v44, %v4736_v59 }
0x119d   : > { %1973 = vperm.xlu1 %3308, %v1962_v61  }
0x11a1   : > { %3309 = vset.pattern.permute.xlu1 %v3855_v1 }
0x11a2   : > { %1964 = vperm.xlu1 %3309, %v4700_v26  }
0x11a6   : > { %3313 = vset.pattern.permute.xlu1 %v3853_v6 }
0x1218   : > { %v1971_v23 = vpop.permute.xlu1 %1970 }
0x1219   : > { %v1978_v3 = vrot.slane %v1971_v23, %v4709_v29 }
0x121c   : > { %v1974_v48 = vpop.permute.xlu1 %1973 }
0x121d   : > { %v1982_v2 = vrot.slane %v1974_v48, %v4709_v29  ;;  %v2139_v48 = vrot.slane %v4664_v52, %v4649_v35 }
0x121f   : > { %v1983_v10 = vsel %vm1795_vm8, %v1982_v2, %v1978_v3 }
0x1221   : > { %v1965_v8 = vpop.permute.xlu1 %1964 }
0x1222   : > { %vm1966_vm12 = vcmp.eq.s32.totalorder %v1965_v8, 1 }
0x1223   : > { %v1985_v13 = vsel %vm1966_vm12, %v1983_v10, %v1893_v37 }
0x1224   : > { %v1993_v15 = vrot.slane %v1985_v13, %v4462_v7 }
0x1226   : > { %v2001_v9 = vrot.slane %v1993_v15, %v4462_v7  ;;  %v1994_v63 = vcombine.high %v1993_v15, %v1993_v15 }
0x1228   : > { %v2012_v46 = vrot.slane %v2001_v9, %v4524_v62  ;;  %v2008_v16 = vrot.slane %v1994_v63, %v4462_v7  ;;  %v3857_v9 = vmov 4  }
0x122a   : > { %v4749_v57 = vadd.f32 %v2012_v46, %v4675_v11  ;;  %v2016_v17 = vrot.slane %v2008_v16, %v4524_v62 }
0x122c   : > { %v2021_v18 = vsel %vm1834_vm9, %v4749_v57, -inf  ;;  %v4755_v19 = vadd.f32 %v2016_v17, %v4675_v11 }
0x122d   : > { %2022 = vmax.xlane.f32.xlu0 %v2021_v18 }
0x122e   : > { %v2024_v21 = vsel %vm1834_vm9, %v4755_v19, -inf }
0x122f   : > { %2025 = vmax.xlane.f32.xlu1 %v2024_v21 }
0x1243   : > { %2042 = vbcast.lane.b32.xlu0 %v2040_v22, 256 }
0x1247   : > { %2049 = vbcast.lane.b32.xlu0 %v2047_v25, 256 }
0x12ba   : > { %v4763_v27 = vpop.xlane.xlu0 %2022 }
0x12bc   : > { %v4766_v31 = vpop.xlane.xlu1 %2025 }
0x12be   : > { %v2043_v30 = vpop.permute.xlu0 %2042 }
0x12bf   : > { %v2053_v54 = vadd.f32 %v2043_v30, %v4763_v27 }
0x12c1   : > { %2062 = vperm.xlu0 %3305, %v2053_v54  }
0x12c2   : > { %v2050_v32 = vpop.permute.xlu0 %2049 }
0x12c3   : > { %v2054_v33 = vadd.f32 %v2050_v32, %v4766_v31 }
0x12c5   : > { %2065 = vperm.xlu0 %3305, %v2054_v33  }
0x12c9   : > { %3310 = vset.pattern.permute.xlu0 %v3856_v34 }
0x12ca   : > { %2056 = vperm.xlu0 %3310, %v4700_v26  }
0x12ce   : > { %2134 = vbcast.lane.b32.xlu0 %v2132_v14, 256 }
0x12cf   : > { %3311 = vset.pattern.permute.xlu0 %v3853_v6 }
0x1340   : > { %v2063_v37 = vpop.permute.xlu0 %2062 }
0x1341   : > { %v2070_v39 = vrot.slane %v2063_v37, %v4709_v29 }
0x1344   : > { %v2066_v38 = vpop.permute.xlu0 %2065 }
0x1345   : > { %v2074_v0 = vrot.slane %v2066_v38, %v4709_v29 }
0x1347   : > { %v2075_v41 = vsel %vm1795_vm8, %v2074_v0, %v2070_v39  ;;  %v2224_v0 = vrot.slane %v4662_v60, %v4652_v36  ;;  %v2231_v39 = vrot.slane %v4664_v52, %v4652_v36 }
0x1349   : > { %v2057_v40 = vpop.permute.xlu0 %2056 }
0x134a   : > { %vm2058_vm13 = vcmp.eq.s32.totalorder %v2057_v40, 1  ;;  %v3858_v40 = vmov 5  }
0x134b   : > { %v2077_v43 = vsel %vm2058_vm13, %v2075_v41, %v1985_v13 }
0x134c   : > { %v2085_v45 = vrot.slane %v2077_v43, %v4462_v7 }
0x134d   : > { %v2135_v2 = vpop.permute.xlu0 %2134 }
0x134e   : > { %v2093_v50 = vrot.slane %v2085_v45, %v4462_v7  ;;  %v2086_v51 = vcombine.high %v2085_v45, %v2085_v45 }
0x1350   : > { %v2104_v55 = vrot.slane %v2093_v50, %v4524_v62  ;;  %v2100_v53 = vrot.slane %v2086_v51, %v4462_v7 }
0x1352   : > { %v4781_v58 = vadd.f32 %v2104_v55, %v4675_v11  ;;  %v2108_v44 = vrot.slane %v2100_v53, %v4524_v62 }
0x1354   : > { %v2113_v61 = vsel %vm1834_vm9, %v4781_v58, -inf  ;;  %v4787_v1 = vadd.f32 %v2108_v44, %v4675_v11 }
0x1355   : > { %2114 = vmax.xlane.f32.xlu1 %v2113_v61 }
0x1356   : > { %v2116_v23 = vsel %vm1834_vm9, %v4787_v1, -inf }
0x1359   : > { %2117 = vmax.xlane.f32.xlu1 %v2116_v23 }
0x136a   : > { %2141 = vbcast.lane.b32.xlu1 %v2139_v48, 256 }
0x13e2   : > { %v4793_v3 = vpop.xlane.xlu1 %2114 }
0x13e3   : > { %v2145_v8 = vadd.f32 %v2135_v2, %v4793_v3 }
0x13e5   : > { %2154 = vperm.xlu0 %3311, %v2145_v8  }
0x13e6   : > { %v4796_v10 = vpop.xlane.xlu1 %2117 }
0x13ea   : > { %v2142_v13 = vpop.permute.xlu1 %2141 }
0x13eb   : > { %v2146_v15 = vadd.f32 %v2142_v13, %v4796_v10 }
0x13ed   : > { %2157 = vperm.xlu0 %3311, %v2146_v15  }
0x13f1   : > { %3312 = vset.pattern.permute.xlu0 %v3857_v9 }
0x13f2   : > { %2148 = vperm.xlu0 %3312, %v4700_v26  }
0x13f6   : > { %3314 = vset.pattern.permute.xlu0 %v3858_v40 }
0x1464   : > { %v2155_v63 = vpop.permute.xlu0 %2154 }
0x1465   : > { %v2162_v16 = vrot.slane %v2155_v63, %v4709_v29 }
0x146c   : > { %v2158_v46 = vpop.permute.xlu0 %2157 }
0x146d   : > { %v2166_v35 = vrot.slane %v2158_v46, %v4709_v29 }
0x146f   : > { %v2167_v18 = vsel %vm1795_vm8, %v2166_v35, %v2162_v16 }
0x1471   : > { %v2149_v17 = vpop.permute.xlu0 %2148 }
0x1472   : > { %vm2150_vm14 = vcmp.eq.s32.totalorder %v2149_v17, 1 }
0x1473   : > { %v2169_v21 = vsel %vm2150_vm14, %v2167_v18, %v2077_v43  ;;  %vm2119_vm14 = vcmp.ge.f32.partialorder %v4781_v58, %v4793_v3 }
0x1474   : > { %v2177_v22 = vrot.slane %v2169_v21, %v4462_v7 }
0x1476   : > { %v2185_v25 = vrot.slane %v2177_v22, %v4462_v7  ;;  %v2178_v30 = vcombine.high %v2177_v22, %v2177_v22 }
0x1478   : > { %v2196_v54 = vrot.slane %v2185_v25, %v4524_v62  ;;  %v2192_v32 = vrot.slane %v2178_v30, %v4462_v7  ;;  %v3859_v30 = vmov 6  }
0x147a   : > { %v4808_v33 = vadd.f32 %v2196_v54, %v4675_v11  ;;  %v2200_v34 = vrot.slane %v2192_v32, %v4524_v62 }
0x147c   : > { %v2205_v14 = vsel %vm1834_vm9, %v4808_v33, -inf  ;;  %v4814_v37 = vadd.f32 %v2200_v34, %v4675_v11 }
0x147d   : > { %2206 = vmax.xlane.f32.xlu1 %v2205_v14 }
0x147e   : > { %v2208_v38 = vsel %vm1834_vm9, %v4814_v37, -inf }
0x147f   : > { %2209 = vmax.xlane.f32.xlu0 %v2208_v38 }
0x148e   : > { %2226 = vbcast.lane.b32.xlu1 %v2224_v0, 256 }
0x1495   : > { %2233 = vbcast.lane.b32.xlu0 %v2231_v39, 256  ;;  %v3860_v39 = vmov 7  }
0x1499   : > { %2240 = vperm.xlu0 %3314, %v4700_v26  }
0x149d   : > { %3315 = vset.pattern.permute.xlu0 %v3859_v30 }
0x150a   : > { %v4823_v41 = vpop.xlane.xlu1 %2206 }
0x150b   : > { %vm2211_vm7 = vcmp.ge.f32.partialorder %v4808_v33, %v4823_v41 }
0x150c   : > { %v4825_v43 = vpop.xlane.xlu0 %2209 }
0x150d   : > { %vm2212_vm12 = vcmp.ge.f32.partialorder %v4814_v37, %v4825_v43 }
0x150e   : > { %v2227_v45 = vpop.permute.xlu1 %2226 }
0x150f   : > { %v2237_v50 = vadd.f32 %v2227_v45, %v4823_v41 }
0x1510   : > { %v2234_v51 = vpop.permute.xlu0 %2233 }
0x1511   : > { %2246 = vperm.xlu1 %3313, %v2237_v50   ;;  %v2238_v55 = vadd.f32 %v2234_v51, %v4825_v43 }
0x1515   : > { %2249 = vperm.xlu1 %3313, %v2238_v55  }
0x1518   : > { %v2241_v44 = vpop.permute.xlu0 %2240 }
0x1519   : > { %vm2242_vm15 = vcmp.eq.s32.totalorder %v2241_v44, 1 }
0x1590   : > { %v2247_v53 = vpop.permute.xlu1 %2246 }
0x1591   : > { %v2254_v61 = vrot.slane %v2247_v53, %v4709_v29 }
0x1594   : > { %v2250_v36 = vpop.permute.xlu1 %2249 }
0x1595   : > { %v2258_v23 = vrot.slane %v2250_v36, %v4709_v29 }
0x1597   : > { %v2259_v48 = vsel %vm1795_vm8, %v2258_v23, %v2254_v61 }
0x1598   : > { %v2261_v2 = vsel %vm2242_vm15, %v2259_v48, %v2169_v21  ;;  %v2315_v21 = vsub.s32 6, %v4456_v4 }
0x1599   : > { %v2269_v8 = vrot.slane %v2261_v2, %v4462_v7 }
0x159a   : > { %v2316_v22 = vrot.slane %v4662_v60, %v2315_v21  ;;  %v2323_v25 = vrot.slane %v4664_v52, %v2315_v21 }
0x159b   : > { %v2277_v13 = vrot.slane %v2269_v8, %v4462_v7  ;;  %v2270_v15 = vcombine.high %v2269_v8, %v2269_v8 }
0x159d   : > { %v2288_v9 = vrot.slane %v2277_v13, %v4524_v62  ;;  %v2284_v63 = vrot.slane %v2270_v15, %v4462_v7 }
0x159f   : > { %v4837_v46 = vadd.f32 %v2288_v9, %v4675_v11  ;;  %v2292_v35 = vrot.slane %v2284_v63, %v4524_v62 }
0x15a1   : > { %v2297_v16 = vsel %vm1834_vm9, %v4837_v46, -inf  ;;  %v4843_v17 = vadd.f32 %v2292_v35, %v4675_v11  ;;  %v2407_v35 = vsub.s32 7, %v4456_v4 }
0x15a2   : > { %2298 = vmax.xlane.f32.xlu1 %v2297_v16 }
0x15a3   : > { %v2300_v18 = vsel %vm1834_vm9, %v4843_v17, -inf  ;;  %v2408_v16 = vrot.slane %v4662_v60, %v2407_v35 }
0x15a4   : > { %2301 = vmax.xlane.f32.xlu0 %v2300_v18  ;;  %v2415_v18 = vrot.slane %v4664_v52, %v2407_v35 }
0x15b3   : > { %2318 = vbcast.lane.b32.xlu1 %v2316_v22, 256 }
0x15ba   : > { %2325 = vbcast.lane.b32.xlu0 %v2323_v25, 256 }
0x15be   : > { %2332 = vperm.xlu0 %3315, %v4700_v26  }
0x15c2   : > { %3316 = vset.pattern.permute.xlu0 %v3860_v39 }
0x162f   : > { %v4851_v54 = vpop.xlane.xlu1 %2298 }
0x1630   : > { %vm2303_vm10 = vcmp.ge.f32.partialorder %v4837_v46, %v4851_v54 }
0x1631   : > { %v4853_v32 = vpop.xlane.xlu0 %2301 }
0x1632   : > { %vm2304_vm6 = vcmp.ge.f32.partialorder %v4843_v17, %v4853_v32 }
0x1633   : > { %v2319_v34 = vpop.permute.xlu1 %2318 }
0x1634   : > { %v2329_v14 = vadd.f32 %v2319_v34, %v4851_v54 }
0x1635   : > { %v2326_v38 = vpop.permute.xlu0 %2325 }
0x1636   : > { %2338 = vperm.xlu1 %3313, %v2329_v14   ;;  %v2330_v0 = vadd.f32 %v2326_v38, %v4853_v32  ;;  %v2951_v14 = vld [vmem:[#allocation24 + $0x1] ss:$0 sm:$0xff] }
0x163a   : > { %2341 = vperm.xlu1 %3313, %v2330_v0  }
0x163d   : > { %v2333_v45 = vpop.permute.xlu0 %2332 }
0x163e   : > { %vm2334_vm0 = vcmp.eq.s32.totalorder %v2333_v45, 1 }
0x16b5   : > { %v2339_v40 = vpop.permute.xlu1 %2338 }
0x16b6   : > { %v2346_v51 = vrot.slane %v2339_v40, %v4709_v29 }
0x16b9   : > { %v2342_v50 = vpop.permute.xlu1 %2341 }
0x16ba   : > { %v2350_v55 = vrot.slane %v2342_v50, %v4709_v29 }
0x16bc   : > { %v2351_v53 = vsel %vm1795_vm8, %v2350_v55, %v2346_v51  ;;  %v2461_v51 = vsel %vm2460_vm5, %v4458_v5, 0.0 }
0x16bd   : > { %v2353_v44 = vsel %vm2334_vm0, %v2351_v53, %v2261_v2  ;;  %vm2120_vm0 = vcmp.ge.f32.partialorder %v4787_v1, %v4796_v10 }
0x16be   : > { %v2361_v36 = vrot.slane %v2353_v44, %v4462_v7 }
0x16c0   : > { %v2369_v61 = vrot.slane %v2361_v36, %v4462_v7  ;;  %v2362_v23 = vcombine.high %v2361_v36, %v2361_v36 }
0x16c2   : > { %v2380_v48 = vrot.slane %v2369_v61, %v4524_v62  ;;  %v2376_v8 = vrot.slane %v2362_v23, %v4462_v7 }
0x16c4   : > { %v2387_v13 = vadd.f32 %v2380_v48, %v4675_v11  ;;  %v2384_v15 = vrot.slane %v2376_v8, %v4524_v62  ;;  %v4875_v62 = vcvt.s32.f32 %v4705_v28 }
0x16c6   : > { %v2389_v9 = vsel %vm1834_vm9, %v2387_v13, -inf  ;;  %v2388_v63 = vadd.f32 %v2384_v15, %v4675_v11  ;;  %v2306_v55 = vsel %vm2304_vm6, %v4875_v62, 5.0  ;;  %v2305_v33 = vsel %vm2303_vm10, %v4875_v62, 5.0 }
0x16c7   : > { %2390 = vmax.xlane.f32.xlu1 %v2389_v9  ;;  %v2310_v53 = vsel %vm1834_vm9, %v2306_v55, inf  ;;  %v2307_v41 = vsel %vm1834_vm9, %v2305_v33, inf  ;;  %v2214_v9 = vsel %vm2212_vm12, %v4875_v62, 5.0  ;;  %vm2028_vm6 = vcmp.ge.f32.partialorder %v4755_v19, %v4766_v31 }
0x16c8   : > { %v2392_v2 = vsel %vm1834_vm9, %v2388_v63, -inf  ;;  %vm1935_vm10 = vcmp.ge.f32.partialorder %v4719_v42, %v4733_v56  ;;  %vm1936_vm12 = vcmp.ge.f32.partialorder %v4725_v49, %v4736_v59 }
0x16c9   : > { %2393 = vmax.xlane.f32.xlu0 %v2392_v2  ;;  %v2121_v2 = vsel %vm2119_vm14, %v4875_v62, 5.0  ;;  %vm1841_vm14 = vcmp.ge.f32.partialorder %v4680_v47, %v4692_v20 }
0x16ca   : > { %v2123_v37 = vsel %vm1834_vm9, %v2121_v2, inf }
0x16d8   : > { %2410 = vbcast.lane.b32.xlu1 %v2408_v16, 256 }
0x16df   : > { %2417 = vbcast.lane.b32.xlu0 %v2415_v18, 256 }
0x16e3   : > { %2424 = vperm.xlu0 %3316, %v4700_v26  }
0x16e7   : > { %3317 = vset.pattern.permute.xlu0 %v3853_v6 }
0x1754   : > { %v2391_v7 = vpop.xlane.xlu1 %2390 }
0x1755   : > { %vm2395_vm1 = vcmp.ge.f32.partialorder %v2387_v13, %v2391_v7 }
0x1756   : > { %v2394_v11 = vpop.xlane.xlu0 %2393  ;;  %v2397_v21 = vsel %vm2395_vm1, %v4875_v62, 5.0 }
0x1757   : > { %v2399_v4 = vsel %vm1834_vm9, %v2397_v21, inf  ;;  %vm2396_vm4 = vcmp.ge.f32.partialorder %v2388_v63, %v2394_v11  ;;  %v2218_v63 = vsel %vm1834_vm9, %v2214_v9, inf }
0x1758   : > { %v2411_v22 = vpop.permute.xlu1 %2410  ;;  %2400 = vmin.xlane.f32.xlu0 %v2399_v4  ;;  %v2398_v45 = vsel %vm2396_vm4, %v4875_v62, 5.0 }
0x1759   : > { %v2421_v60 = vadd.f32 %v2411_v22, %v2391_v7  ;;  %v2402_v50 = vsel %vm1834_vm9, %v2398_v45, inf }
0x175a   : > { %v2418_v25 = vpop.permute.xlu0 %2417 }
0x175b   : > { %2430 = vperm.xlu1 %3313, %v2421_v60   ;;  %v2422_v52 = vadd.f32 %v2418_v25, %v2394_v11  ;;  %v2122_v60 = vsel %vm2120_vm0, %v4875_v62, 5.0  ;;  %vm1842_vm0 = vcmp.ge.f32.partialorder %v4686_v12, %v4695_v24 }
0x175c   : > { %v2126_v25 = vsel %vm1834_vm9, %v2122_v60, inf }
0x175f   : > { %2433 = vperm.xlu1 %3313, %v2422_v52  }
0x1762   : > { %v2425_v30 = vpop.permute.xlu0 %2424 }
0x1763   : > { %vm2426_vm2 = vcmp.eq.s32.totalorder %v2425_v30, 1 }
0x17da   : > { %v2431_v26 = vpop.permute.xlu1 %2430 }
0x17db   : > { %v2438_v34 = vrot.slane %v2431_v26, %v4709_v29 }
0x17de   : > { %v2434_v6 = vpop.permute.xlu1 %2433 }
0x17df   : > { %v2442_v28 = vrot.slane %v2434_v6, %v4709_v29 }
0x17e1   : > { %v2443_v38 = vsel %vm1795_vm8, %v2442_v28, %v2438_v34 }
0x17e2   : > { %v2445_v0 = vsel %vm2426_vm2, %v2443_v38, %v2353_v44  ;;  %v2213_v44 = vsel %vm2211_vm7, %v4875_v62, 5.0  ;;  %vm2027_vm2 = vcmp.ge.f32.partialorder %v4749_v57, %v4763_v27  ;;  %v2030_v38 = vsel %vm2028_vm6, %v4875_v62, 5.0 }
0x17e3   : > { %v2450_v39 = vadd.f32 %v2951_v14, %v2445_v0  ;;  %v2215_v36 = vsel %vm1834_vm9, %v2213_v44, inf  ;;  %v2029_v52 = vsel %vm2027_vm2, %v4875_v62, 5.0  ;;  %v2034_v0 = vsel %vm1834_vm9, %v2030_v38, inf }
0x17e4   : > { %v2031_v1 = vsel %vm1834_vm9, %v2029_v52, inf  ;;  %v1938_v44 = vsel %vm1936_vm12, %v4875_v62, 5.0 }
0x17e5   : > { %v2452_v40 = vsel %vm2451_vm3, %v2450_v39, -inf  ;;  %v2401_v23 = vpop.xlane.xlu0 %2400 }
0x17e6   : > { %2453 = vmax.xlane.f32.xlu1 %v2452_v40  ;;  %v2473_v8 = vrot.slane %v2401_v23, %v4709_v29 }
0x17ea   : > { %2403 = vmin.xlane.f32.xlu1 %v2402_v50 }
0x17ee   : > { %2462 = vadd.xlane.f32.xlu1 %v2461_v51 }
0x17f2   : > { %2311 = vmin.xlane.f32.xlu1 %v2310_v53 }
0x17f6   : > { %2216 = vmin.xlane.f32.xlu1 %v2215_v36  ;;  %v1942_v36 = vsel %vm1834_vm9, %v1938_v44, inf }
0x1873   : > { %v2454_v61 = vpop.xlane.xlu1 %2453 }
0x1874   : > { %vm2455_vm11 = vcmp.ge.f32.partialorder %v2450_v39, %v2454_v61  ;;  %v1937_v39 = vsel %vm1935_vm10, %v4875_v62, 5.0  ;;  %v1843_v61 = vsel %vm1841_vm14, %v4875_v62, 5.0  ;;  %vm2616_vm14 = vcmask 15360  }
0x1875   : > { %v2456_v5 = vsel %vm2455_vm11, %v4875_v62, 5.0  ;;  %v1939_v19 = vsel %vm1834_vm9, %v1937_v39, inf  ;;  %v1845_v49 = vsel %vm1834_vm9, %v1843_v61, inf }
0x1876   : > { %v2457_v17 = vsel %vm2451_vm3, %v2456_v5, inf }
0x1877   : > { %2458 = vmin.xlane.f32.xlu0 %v2457_v17  ;;  %v2404_v32 = vpop.xlane.xlu1 %2403 }
0x1878   : > { %v2477_v48 = vrot.slane %v2404_v32, %v4709_v29 }
0x187a   : > { %v2478_v46 = vsel %vm1795_vm8, %v2477_v48, %v2473_v8  ;;  %v1844_v48 = vsel %vm1842_vm0, %v4875_v62, 5.0  ;;  %vm2620_vm0 = vcmask 31744  }
0x187b   : > { %2308 = vmin.xlane.f32.xlu0 %v2307_v41  ;;  %v2463_v43 = vpop.xlane.xlu1 %2462  ;;  %v1848_v8 = vsel %vm1834_vm9, %v1844_v48, inf }
0x187c   : > { %v4917_v18 = vadd.f32 -1.0, %v2463_v43 }
0x187e   : > { %vm2484_vm15 = vcmp.eq.f32.partialorder %v4917_v18, 6.0  ;;  %vm2505_vm4 = vcmp.eq.f32.partialorder %v4917_v18, 5.0  ;;  %vm2526_vm11 = vcmp.eq.f32.partialorder %v4917_v18, 4.0  ;;  %vm2568_vm2 = vcmp.eq.f32.partialorder %v4917_v18, 2.0 }
0x187f   : > { %v2312_v16 = vpop.xlane.xlu1 %2311  ;;  %vm2589_vm9 = vcmp.eq.f32.partialorder %v4917_v18, 1.0  ;;  %vm2610_vm10 = vcmp.eq.f32.partialorder %v4917_v18, 0.0  ;;  %vm2591_vm12 = vcmp.ge.f32.partialorder %v4917_v18, 1.0 }
0x1880   : > { %v2498_v11 = vrot.slane %v2312_v16, %v4709_v29 }
0x1883   : > { %v2217_v26 = vpop.xlane.xlu1 %2216 }
0x1884   : > { %v2515_v6 = vrot.slane %v2217_v26, %v4709_v29 }
0x1904   : > { %v4903_v13 = vpop.xlane.xlu0 %2458 }
0x1905   : > { %vm2467_vm13 = vcmp.eq.f32.partialorder %v4875_v62, %v4903_v13 }
0x1906   : > { %v2480_v54 = vsel %vm2467_vm13, %v2478_v46, 0.0 }
0x1907   : > { %v2481_v15 = vsel %vm2451_vm3, %v2480_v54, 0.0 }
0x1908   : > { %2482 = vadd.xlane.f32.xlu0 %v2481_v15  ;;  %v2309_v35 = vpop.xlane.xlu0 %2308 }
0x1909   : > { %v2494_v7 = vrot.slane %v2309_v35, %v4709_v29 }
0x190b   : > { %v2499_v21 = vsel %vm1795_vm8, %v2498_v11, %v2494_v7 }
0x190c   : > { %2219 = vmin.xlane.f32.xlu0 %v2218_v63 }
0x1910   : > { %2124 = vmin.xlane.f32.xlu0 %v2123_v37 }
0x1995   : > { %v2483_v58 = vpop.xlane.xlu0 %2482 }
0x1996   : > { %v4923_v3 = vsel %vm2484_vm15, %v4903_v13, %v2483_v58  ;;  %vm2547_vm15 = vcmp.eq.f32.partialorder %v4917_v18, 3.0 }
0x1997   : > { %vm2488_vm1 = vcmp.eq.f32.partialorder %v4875_v62, %v4923_v3 }
0x1998   : > { %v2501_v4 = vsel %vm2488_vm1, %v2499_v21, 0.0 }
0x1999   : > { %v2502_v22 = vsel %vm2451_vm3, %v2501_v4, 0.0  ;;  %v2220_v10 = vpop.xlane.xlu0 %2219 }
0x199a   : > { %2503 = vadd.xlane.f32.xlu1 %v2502_v22  ;;  %v2519_v30 = vrot.slane %v2220_v10, %v4709_v29 }
0x199c   : > { %v2520_v57 = vsel %vm1795_vm8, %v2519_v30, %v2515_v6 }
0x199d   : > { %v2125_v40 = vpop.xlane.xlu0 %2124 }
0x199e   : > { %2127 = vmin.xlane.f32.xlu1 %v2126_v25  ;;  %v2536_v50 = vrot.slane %v2125_v40, %v4709_v29 }
0x19a2   : > { %2032 = vmin.xlane.f32.xlu1 %v2031_v1 }
0x1a27   : > { %v2504_v34 = vpop.xlane.xlu1 %2503 }
0x1a28   : > { %v4941_v28 = vsel %vm2505_vm4, %v4903_v13, %v2504_v34 }
0x1a29   : > { %vm2509_vm7 = vcmp.eq.f32.partialorder %v4875_v62, %v4941_v28 }
0x1a2a   : > { %v2522_v27 = vsel %vm2509_vm7, %v2520_v57, 0.0  ;;  %vm2465_vm7 = vcmp.ge.f32.partialorder %v4917_v18, 7.0 }
0x1a2b   : > { %v2523_v14 = vsel %vm2451_vm3, %v2522_v27, 0.0  ;;  %v2128_v31 = vpop.xlane.xlu1 %2127  ;;  %v2466_v38 = vsel %vm2465_vm7, %v4903_v13, -1.0 }
0x1a2c   : > { %2524 = vadd.xlane.f32.xlu0 %v2523_v14  ;;  %v2540_v45 = vrot.slane %v2128_v31, %v4709_v29 }
0x1a2e   : > { %v2541_v42 = vsel %vm1795_vm8, %v2540_v45, %v2536_v50 }
0x1a2f   : > { %v2033_v5 = vpop.xlane.xlu1 %2032 }
0x1a30   : > { %2035 = vmin.xlane.f32.xlu0 %v2034_v0  ;;  %v2557_v33 = vrot.slane %v2033_v5, %v4709_v29 }
0x1a34   : > { %1940 = vmin.xlane.f32.xlu0 %v1939_v19 }
0x1ab9   : > { %v2525_v51 = vpop.xlane.xlu0 %2524 }
0x1aba   : > { %v4959_v55 = vsel %vm2526_vm11, %v4903_v13, %v2525_v51  ;;  %vm2614_vm11 = vcmask 7168  }
0x1abb   : > { %vm2530_vm13 = vcmp.eq.f32.partialorder %v4875_v62, %v4959_v55 }
0x1abc   : > { %v2543_v56 = vsel %vm2530_vm13, %v2541_v42, 0.0  ;;  %vm2612_vm13 = vcmp.ge.f32.partialorder %v4917_v18, 0.0 }
0x1abd   : > { %v2544_v53 = vsel %vm2451_vm3, %v2543_v56, 0.0  ;;  %v2036_v59 = vpop.xlane.xlu0 %2035 }
0x1abe   : > { %2545 = vadd.xlane.f32.xlu1 %v2544_v53  ;;  %v2561_v17 = vrot.slane %v2036_v59, %v4709_v29 }
0x1ac0   : > { %v2562_v47 = vsel %vm1795_vm8, %v2561_v17, %v2557_v33 }
0x1ac1   : > { %v1941_v54 = vpop.xlane.xlu0 %1940 }
0x1ac2   : > { %1943 = vmin.xlane.f32.xlu1 %v1942_v36  ;;  %v2578_v9 = vrot.slane %v1941_v54, %v4709_v29 }
0x1ac6   : > { %1846 = vmin.xlane.f32.xlu1 %v1845_v49 }
0x1b4b   : > { %v2546_v41 = vpop.xlane.xlu1 %2545 }
0x1b4c   : > { %v2548_v32 = vsel %vm2547_vm15, %v4903_v13, %v2546_v41  ;;  %vm2570_vm15 = vcmp.ge.f32.partialorder %v4917_v18, 2.0 }
0x1b4d   : > { %vm2551_vm1 = vcmp.eq.f32.partialorder %v4875_v62, %v2548_v32 }
0x1b4e   : > { %v2564_v20 = vsel %vm2551_vm1, %v2562_v47, 0.0  ;;  %vm2528_vm1 = vcmp.ge.f32.partialorder %v4917_v18, 4.0 }
0x1b4f   : > { %v2565_v23 = vsel %vm2451_vm3, %v2564_v20, 0.0  ;;  %v1944_v46 = vpop.xlane.xlu1 %1943  ;;  %v2529_v30 = vsel %vm2528_vm1, %v4959_v55, -1.0 }
0x1b50   : > { %2566 = vadd.xlane.f32.xlu0 %v2565_v23  ;;  %v2582_v15 = vrot.slane %v1944_v46, %v4709_v29 }
0x1b52   : > { %v2583_v63 = vsel %vm1795_vm8, %v2582_v15, %v2578_v9 }
0x1b53   : > { %v1847_v35 = vpop.xlane.xlu1 %1846 }
0x1b54   : > { %1849 = vmin.xlane.f32.xlu0 %v1848_v8  ;;  %v2599_v7 = vrot.slane %v1847_v35, %v4709_v29 }
0x1bdd   : > { %v2567_v12 = vpop.xlane.xlu0 %2566 }
0x1bde   : > { %v2569_v24 = vsel %vm2568_vm2, %v4903_v13, %v2567_v12  ;;  %vm2622_vm2 = vcmask 39936  }
0x1bdf   : > { %vm2572_vm4 = vcmp.eq.f32.partialorder %v4875_v62, %v2569_v24  ;;  %v2571_v52 = vsel %vm2570_vm15, %v2569_v24, -1.0 }
0x1be0   : > { %v2585_v2 = vsel %vm2572_vm4, %v2583_v63, 0.0  ;;  %vm2507_vm4 = vcmp.ge.f32.partialorder %v4917_v18, 5.0 }
0x1be1   : > { %v2586_v37 = vsel %vm2451_vm3, %v2585_v2, 0.0  ;;  %v1850_v43 = vpop.xlane.xlu0 %1849  ;;  %v2508_v34 = vsel %vm2507_vm4, %v4941_v28, -1.0 }
0x1be2   : > { %2587 = vadd.xlane.f32.xlu1 %v2586_v37  ;;  %v2603_v16 = vrot.slane %v1850_v43, %v4709_v29 }
0x1be4   : > { %v2604_v21 = vsel %vm1795_vm8, %v2603_v16, %v2599_v7  ;;  %vm2618_vm8 = vcmask 23552  }
0x1c6f   : > { %v2588_v11 = vpop.xlane.xlu1 %2587 }
0x1c70   : > { %v2590_v58 = vsel %vm2589_vm9, %v4903_v13, %v2588_v11  ;;  %vm2624_vm9 = vcmask 48128  }
0x1c71   : > { %vm2593_vm6 = vcmp.eq.f32.partialorder %v4875_v62, %v2590_v58  ;;  %v2592_v62 = vsel %vm2591_vm12, %v2590_v58, -1.0 }
0x1c72   : > { %v2606_v4 = vsel %vm2593_vm6, %v2604_v21, 0.0  ;;  %vm2486_vm6 = vcmp.ge.f32.partialorder %v4917_v18, 6.0 }
0x1c73   : > { %v2607_v22 = vsel %vm2451_vm3, %v2606_v4, 0.0  ;;  %vm2549_vm3 = vcmp.ge.f32.partialorder %v4917_v18, 3.0  ;;  %v2487_v27 = vsel %vm2486_vm6, %v4923_v3, -1.0 }
0x1c74   : > { %2608 = vadd.xlane.f32.xlu0 %v2607_v22  ;;  %v2550_v10 = vsel %vm2549_vm3, %v2548_v32, -1.0 }
0x1d01   : > { %v2609_v60 = vpop.xlane.xlu0 %2608 }
0x1d02   : > { %v2611_v29 = vsel %vm2610_vm10, %v4903_v13, %v2609_v60  ;;  %vm2626_vm10 = vcmask 56320  }
0x1d03   : > { %v2613_v25 = vsel %vm2612_vm13, %v2611_v29, -1.0 }
0x1d04   : > { %v2615_v1 = vsel %vm2614_vm11, %v2613_v25, %v2592_v62 }
0x1d05   : > { %v2617_v26 = vsel %vm2616_vm14, %v2615_v1, %v2571_v52 }
0x1d06   : > { %v2619_v6 = vsel %vm2618_vm8, %v2617_v26, %v2550_v10 }
0x1d07   : > { %v2621_v57 = vsel %vm2620_vm0, %v2619_v6, %v2529_v30 }
0x1d08   : > { %v2623_v14 = vsel %vm2622_vm2, %v2621_v57, %v2508_v34 }
0x1d09   : > { %v2625_v0 = vsel %vm2624_vm9, %v2623_v14, %v2487_v27 }
0x1d0a   : > { %v2627_v39 = vsel %vm2626_vm10, %v2625_v0, %v2466_v38 }
0x1d0b   : > { %v3086_v19 = vtrunc.f32 %v2627_v39 }
0x1d0d   : > { %v3087_v31 = vcvt.f32.s32 %v3086_v19 }
0x1d0f   : > { %2629 = vst.msk [vmem:[#allocation26] sm:$0x3] %vm2460_vm5, %v3087_v31 }
0x1d10 PF: > { %s5157_s26 = sld [smem:[#allocation39_spill]]  ;;  %s3861_s10 = smov [#allocation26]  }
0x1d11   : > { %s2637_s11 = sshll.u32 %s3861_s10, 4  ;;  %s2638_s11 = int_to_ptr.vmem [resolvable:$true] %s2637_s11 }
0x1d12   : > { %s3726_s21 = scalar_lea.vmem %s2638_s11, 32  ;;  %p3733_p6 = scmp.lt.s32.totalorder %s2638_s11, %s2638_s11 }
0x1d13   : > { %p3727_p0 = scmp.ne.s32.totalorder %s2638_s11, %s3726_s21  ;;  %p3734_p12 = scmp.lt.s32.totalorder %s3726_s21, %s3726_s21 }
0x1d15   : > { %p3735_p1 = por %p3734_p12, %p3733_p6 }
0x1d16   : > { %p3193_p13 = scmp.eq.s32.totalorder %s5157_s26, 1 }
0x1d18   : > { %p3728_p2 = pnand %p3727_p0, %p3193_p13 }
0x1d1a   : > { %p3729_p3 = pneg %p3728_p2 }
0x1d1c   : > { %p3736_p10 = pnand %p3735_p1, %p3729_p3 }
0x1d1e   : > { %3739 = shalt.err (!%p3736_p10)
}
0x1d1f   : > { %s5158_s5 = sld [smem:[#allocation52_spill]] }
0x1d25   : > { %s3740_s20 = scalar_lea.hbm %s5158_s5, 32 }
0x1d26   : > { %p3741_p8 = scmp.ne.s32.totalorder %s5158_s5, %s3740_s20  ;;  %p3746_p11 = scmp.lt.u32.totalorder %s3740_s20, %s5158_s5 }
0x1d28   : > { %p3742_p4 = pnand %p3741_p8, %p3193_p13 }
0x1d2a   : > { %p3743_p7 = pneg %p3742_p4 }
0x1d2c   : > { %p3748_p5 = pnand %p3746_p11, %p3743_p7 }
0x1d2e   : > { %3751 = shalt.err (!%p3748_p5)
}
0x1d2f   : > { %3131 = dma.vmem_to_hbm [thread:$0]  (%p3193_p13), %s2638_s11, 32, %s5158_s5, [#allocation5]  }
0x1d30   : > { %3805 = dma.done.wait (%p3193_p13), [#allocation5], 32  }
0x1d31   : > { %3807 = vsyncadd (%p3193_p13), [#allocation5], 4294967264 }
0x1d32 PF: > { %s5159_s16 = sld [smem:[#allocation41_spill]]  ;;  %s5160_s29 = sld [smem:[#allocation37_spill]] }
0x1d33   : > { %s5161_s30 = sld [smem:[#allocation38_spill]]  ;;  %s5162_s15 = sld [smem:[#allocation42_spill]] }
0x1d38   : > { %p38_p9 = scmp.ge.s32.totalorder %s5159_s16, 4  }
0x1d3a   :  { %40 = sbr.rel (!%p38_p9) target bundleno = 24 (0x18), region = 222 }
0x1d41   :  { %2650 = vsyncpa [#allocation4], 1 }
0x1d42   :  { %2652 = vsyncpa [#allocation4 + $0x1], 1 }
0x1d43   :  { %2653 = vsyncpa [#allocation7], 1 }
0x1d44   :  { %2654 = vsyncpa [#allocation10], 1 }
0x1d45   :  { %2656 = vsyncpa [#allocation10 + $0x1], 1 }
0x1d46   :  { %2657 = vsyncpa [#allocation13], 1 }
0x1d47   :  { %2659 = vsyncpa [#allocation13 + $0x1], 1 }
0x1d48   :  { %2660 = vsyncpa [#allocation16], 1 }
0x1d49   :  { %2662 = vsyncpa [#allocation16 + $0x1], 1 }
0x1d4a   :  { %2663 = vsyncpa [#allocation19], 1 }
0x1d4b   :  { %2665 = vsyncpa [#allocation19 + $0x1], 1 }
0x1d4c   :  { %2666 = vsyncpa [#allocation22], 1 }
0x1d4d   :  { %2667 = vsyncpa [#allocation25], 1 }
0x1d4e   :  { %2668 = vsyncpa [#allocation5], 1 }
0x1d4f   :  { %2670 = vsyncpa [#allocation5 + $0x1], 1 }

</bundles_post_ra>
